<compile_context>
chip_gen: v7x
topology: tpu7x:2x2x1
jax: 0.10.0
libtpu: 0.0.40
codegen_flags: <defaults>
</compile_context>

<pallas_src>
import functools

import jax
import jax.numpy as jnp
from jax.experimental import pallas as pl
from jax.experimental.pallas import tpu as pltpu


def _round_up(n, m):
    return ((n + m - 1) // m) * m


def _ascent_step(x, *, c2, pcat, bcat, bth, sqh, emat, sg, alpha, k, mxu_dtype):
    """One gradient-ascent step, flat (TB, K*D) layout, segment reductions on the MXU."""
    xm = x.astype(mxu_dtype)
    # pd[:, kD:(k+1)D] = P_k (x - mu_k)    -- one fused lane-dense MXU matmul
    pd = jnp.dot(xm, pcat, preferred_element_type=jnp.float32) - bcat          # (TB, K*D) f32

    # shifted logits_k = (c_k - max(c)) - 0.5 q_k
    #   q_k = x.pd_k - x.b_k + mu_k P_k mu_k   (constant part folded into c2)
    # q_k >= 0 because P_k is PSD, so logits <= ~0 and exp() never overflows.
    xpd = (jnp.tile(x, (1, k)) * pd).astype(mxu_dtype)                         # (TB, K*D)
    logits = (c2
              + jnp.dot(xpd, sqh, preferred_element_type=jnp.float32)          # -0.5 * segsum(x*pd)
              + jnp.dot(xm, bth, preferred_element_type=jnp.float32))          # +0.5 * x.b_k
    e = jnp.exp(logits)                                                        # (TB, K)
    r = e / jnp.sum(e, axis=-1, keepdims=True)     # exact reciprocal: error compounds over iters

    # grad = - sum_k r_k pd_k : expand r along lanes (MXU) then segment-sum (MXU).
    rrep = jnp.dot(r.astype(mxu_dtype), emat, preferred_element_type=jnp.float32)   # (TB, K*D)
    rpd = (rrep * pd).astype(mxu_dtype)
    grad = -jnp.dot(rpd, sg, preferred_element_type=jnp.float32)               # (TB, D)
    return x + alpha * grad


def _denoise_unrolled_kernel(x_ref, c2_ref, pcat_ref, bcat_ref, bth_ref, sqh_ref,
                             emat_ref, sg_ref, alpha_ref, traj_ref, *,
                             n_iterations, k, d, mxu_dtype):
    """Fully unrolled path (short fixed trip counts): lane-dense trajectory slab."""
    tb = x_ref.shape[0]
    t_pad = traj_ref.shape[1]
    t_used = (n_iterations + 1) * d

    x = x_ref[...]                               # (TB, D) f32
    params = dict(c2=c2_ref[...], pcat=pcat_ref[...], bcat=bcat_ref[...],
                  bth=bth_ref[...], sqh=sqh_ref[...], emat=emat_ref[...],
                  sg=sg_ref[...], alpha=alpha_ref[0], k=k, mxu_dtype=mxu_dtype)

    if t_pad > t_used:                           # zero lane padding so the block is fully defined
        traj_ref[:, t_used:] = jnp.zeros((tb, t_pad - t_used), jnp.float32)
    traj_ref[:, 0:d] = x                         # trajectory[0] = initial x (clone semantics)

    for it in range(n_iterations):               # static unroll: full scheduler visibility
        x = _ascent_step(x, **params)
        traj_ref[:, (it + 1) * d:(it + 2) * d] = x


def _denoise_loop_kernel(x_ref, c2_ref, pcat_ref, bcat_ref, bth_ref, sqh_ref,
                         emat_ref, sg_ref, alpha_ref, traj_ref, *,
                         n_iterations, k, mxu_dtype, unroll):
    """Fallback for large n_iterations: partially unrolled fori_loop, 3-D trajectory."""
    x0 = x_ref[...]
    params = dict(c2=c2_ref[...], pcat=pcat_ref[...], bcat=bcat_ref[...],
                  bth=bth_ref[...], sqh=sqh_ref[...], emat=emat_ref[...],
                  sg=sg_ref[...], alpha=alpha_ref[0], k=k, mxu_dtype=mxu_dtype)
    traj_ref[0] = x0

    def body(it, x):
        x_new = _ascent_step(x, **params)
        traj_ref[it + 1] = x_new
        return x_new

    jax.lax.fori_loop(0, n_iterations, body, x0, unroll=unroll)


def denoising_potential_forward(x, c, mu, A, alpha, n_iterations=10, *,
                                block_batch=1024, mxu_dtype=jnp.bfloat16,
                                unroll_limit=32):
    """Returns (x_final, trajectory_list) matching the PyTorch module's forward()."""
    x = jnp.asarray(x, jnp.float32)
    B, D = x.shape
    mu = jnp.asarray(mu, jnp.float32)
    A = jnp.asarray(A, jnp.float32)
    c = jnp.asarray(c, jnp.float32).reshape(-1)
    K = mu.shape[0]
    KD = K * D
    md = jax.dtypes.canonicalize_dtype(mxu_dtype)

    # ---- parameter preprocessing (plain JAX, once per call; A / mu never enter VMEM) ----
    P = jnp.einsum('kij,kil->kjl', A, A)                           # (K, D, D), P_k = A_k^T A_k (PSD)
    P_cat = jnp.transpose(P, (1, 0, 2)).reshape(D, KD)             # (D, K*D): column block k = P_k
    b = jnp.einsum('kd,kde->ke', mu, P)                            # (K, D): b_k = mu_k P_k
    b_cat = b.reshape(1, KD)
    const = jnp.sum(b * mu, axis=-1)                               # mu_k P_k mu_k
    # Constant softmax shift max(c): valid because q >= 0 (P_k PSD) => logits <= max(c).
    c2 = (c - 0.5 * const - jnp.max(c)).reshape(1, K)
    bth = 0.5 * b.T                                                # (D, K)
    emat = jnp.repeat(jnp.eye(K, dtype=jnp.float32), D, axis=1)    # (K, K*D): lane expansion of r
    sqh = -0.5 * emat.T                                            # (K*D, K): segmented row-sum
    sg = jnp.tile(jnp.eye(D, dtype=jnp.float32), (K, 1))           # (K*D, D): stacked identities

    pcat_m, bth_m, sqh_m, emat_m, sg_m = (a.astype(md) for a in (P_cat, bth, sqh, emat, sg))
    alpha_arr = jnp.asarray(alpha, jnp.float32).reshape(1,)

    # ---- generation-aware VMEM budget and batch tiling ----
    try:
        phys_vmem = int(pltpu.get_tpu_info().vmem_capacity_bytes)  # 128 MiB v5e/v6e, 64 MiB v7x
    except Exception:
        phys_vmem = 128 << 20
    budget = int(0.75 * phys_vmem)                                 # headroom for compiler scratch

    unrolled = n_iterations <= unroll_limit
    traj_lanes = (n_iterations + 1) * D
    t_pad = _round_up(traj_lanes, 128) if unrolled else traj_lanes
    const_bytes = (2 * (P_cat.size + bth.size + sqh.size + emat.size + sg.size) * md.itemsize
                   + 2 * (b_cat.size + c2.size) * 4)

    def vmem_need(tb):
        return int(4 * (2 * tb * D            # x input block, double-buffered
                        + 2 * tb * t_pad      # trajectory output block, double-buffered
                        + 8 * tb * KD)        # in-iteration temporaries (f32 + cast copies)
                   + const_bytes)

    TB = _round_up(max(8, min(block_batch, _round_up(B, 8))), 8)
    while TB > 8 and vmem_need(TB) > budget:
        TB = max(8, (TB // 2) // 8 * 8)
    # v7x has two TensorCores: keep >= 2 grid steps on the "parallel" batch axis when possible.
    while _round_up(B, TB) // TB < 2 and TB >= 512:
        TB //= 2
    B_pad = _round_up(B, TB)
    grid = (B_pad // TB,)
    x_in = jnp.pad(x, ((0, B_pad - B), (0, 0))) if B_pad != B else x

    compiler_params = pltpu.CompilerParams(
        dimension_semantics=("parallel",),
        vmem_limit_bytes=budget,
    )

    def run(single_buffer_consts):
        # Grid-invariant constants need no double-buffering; fall back if this Pallas
        # build rejects pipeline_mode=pl.Buffered(1).
        ckw = dict(pipeline_mode=pl.Buffered(1)) if single_buffer_consts else {}

        def cspec(shape):
            return pl.BlockSpec(shape, lambda i: (0, 0), **ckw)

        in_specs = [
            pl.BlockSpec((TB, D), lambda i: (i, 0)),               # x, batch-tiled
            cspec((1, K)),                                         # c2
            cspec((D, KD)),                                        # P_cat
            cspec((1, KD)),                                        # b_cat
            cspec((D, K)),                                         # 0.5 * B^T
            cspec((KD, K)),                                        # -0.5 * segment one-hot
            cspec((K, KD)),                                        # lane expansion of r
            cspec((KD, D)),                                        # stacked identities
            pl.BlockSpec(memory_space=pltpu.MemorySpace.SMEM),     # alpha scalar
        ]
        if unrolled:
            kernel = functools.partial(_denoise_unrolled_kernel, n_iterations=n_iterations,
                                       k=K, d=D, mxu_dtype=md)
            out_shape = jax.ShapeDtypeStruct((B_pad, t_pad), jnp.float32)
            out_specs = pl.BlockSpec((TB, t_pad), lambda i: (i, 0))          # lane-dense slab
        else:
            kernel = functools.partial(_denoise_loop_kernel, n_iterations=n_iterations,
                                       k=K, mxu_dtype=md, unroll=4)
            out_shape = jax.ShapeDtypeStruct((n_iterations + 1, B_pad, D), jnp.float32)
            out_specs = pl.BlockSpec((n_iterations + 1, TB, D), lambda i: (0, i, 0))

        out = pl.pallas_call(
            kernel,
            grid=grid,
            out_shape=out_shape,
            in_specs=in_specs,
            out_specs=out_specs,
            compiler_params=compiler_params,
        )(x_in, c2, pcat_m, b_cat, bth_m, sqh_m, emat_m, sg_m, alpha_arr)
        return jax.block_until_ready(out)

    try:
        traj_raw = run(True)
    except Exception:
        traj_raw = run(False)

    if unrolled:
        traj = traj_raw[:B, :traj_lanes].reshape(B, n_iterations + 1, D)
        trajectory = [traj[:, i, :] for i in range(n_iterations + 1)]
    else:
        trajectory = [traj_raw[i, :B, :] for i in range(n_iterations + 1)]
    x_final = trajectory[-1]
    return x_final, trajectory


def _ref_forward(x, c, mu, A, alpha, n_iterations):
    """Pure-JAX reference (analytic gradient) for correctness checking."""
    P = jnp.einsum('kij,kil->kjl', A, A)
    traj = [x]
    for _ in range(n_iterations):
        diff = x[:, None, :] - mu[None, :, :]                  # (B, K, D)
        q = jnp.einsum('bki,kij,bkj->bk', diff, P, diff)       # (B, K)
        logits = c[None, :] - 0.5 * q
        r = jax.nn.softmax(logits, axis=1)
        g = -jnp.einsum('bk,kij,bkj->bi', r, P, diff)          # (B, D)
        x = x + alpha * g
        traj.append(x)
    return x, traj


if __name__ == "__main__":
    feature_dim, k, batch, n_iter = 16, 4, 8, 10

    key = jax.random.PRNGKey(0)
    kx, kmu = jax.random.split(key)

    # Deterministic parameters matching the module's __init__ shapes.
    x = jax.random.normal(kx, (batch, feature_dim), jnp.float32)
    c = jnp.zeros((k,), jnp.float32)                                    # nn.Parameter(zeros(k))
    mu = 0.1 * jax.random.normal(kmu, (k, feature_dim), jnp.float32)    # randn(k, D) * 0.1
    A = jnp.tile(jnp.eye(feature_dim, dtype=jnp.float32)[None], (k, 1, 1))
    alpha = jnp.float32(0.1)

    x_final, trajectory = denoising_potential_forward(x, c, mu, A, alpha, n_iter)
    jax.block_until_ready(x_final)

    x_ref, traj_ref = _ref_forward(x, c, mu, A, alpha, n_iter)
    assert x_final.shape == (batch, feature_dim)
    assert len(trajectory) == n_iter + 1
    # Tolerance budget: bf16 MXU operands compounding over 10 ascent steps (analytic
    # estimate ~1e-2 worst-case); a real algorithmic bug would show errors >= 1e-1.
    assert jnp.allclose(x_final, x_ref, atol=3e-2, rtol=3e-2)
    for a_t, b_t in zip(trajectory, traj_ref):
        assert jnp.allclose(a_t, b_t, atol=3e-2, rtol=3e-2)

    print("KERNEL_OK")
</pallas_src>

<mosaic_0001>
module attributes {stable_mosaic.version = 11 : i64} {
  func.func @_denoise_unrolled_kernel(%arg0: i32, %arg1: memref<8x16xf32, #tpu.memory_space<vmem>>, %arg2: memref<1x4xf32, #tpu.memory_space<vmem>>, %arg3: memref<16x64xbf16, #tpu.memory_space<vmem>>, %arg4: memref<1x64xf32, #tpu.memory_space<vmem>>, %arg5: memref<16x4xbf16, #tpu.memory_space<vmem>>, %arg6: memref<64x4xbf16, #tpu.memory_space<vmem>>, %arg7: memref<4x64xbf16, #tpu.memory_space<vmem>>, %arg8: memref<64x16xbf16, #tpu.memory_space<vmem>>, %arg9: memref<1xf32, #tpu.memory_space<smem>>, %arg10: memref<8x256xf32, #tpu.memory_space<vmem>>) attributes {dimension_semantics = [#tpu.dimension_semantics<parallel>], iteration_bounds = array<i64: 1>, scalar_prefetch = 0 : i64, scratch_operands = 0 : i64, tpu.core_type = #tpu.core_type<tc>, window_params = [{transform_indices = @transform_0, window_bounds = array<i64: 8, 16>}, {pipeline_mode = #tpu.pipeline_mode<synchronous>, transform_indices = @transform_1, window_bounds = array<i64: 1, 4>}, {pipeline_mode = #tpu.pipeline_mode<synchronous>, transform_indices = @transform_2, window_bounds = array<i64: 16, 64>}, {pipeline_mode = #tpu.pipeline_mode<synchronous>, transform_indices = @transform_3, window_bounds = array<i64: 1, 64>}, {pipeline_mode = #tpu.pipeline_mode<synchronous>, transform_indices = @transform_4, window_bounds = array<i64: 16, 4>}, {pipeline_mode = #tpu.pipeline_mode<synchronous>, transform_indices = @transform_5, window_bounds = array<i64: 64, 4>}, {pipeline_mode = #tpu.pipeline_mode<synchronous>, transform_indices = @transform_6, window_bounds = array<i64: 4, 64>}, {pipeline_mode = #tpu.pipeline_mode<synchronous>, transform_indices = @transform_7, window_bounds = array<i64: 64, 16>}, {transform_indices = @transform_8, window_bounds = array<i64: 1>}, {transform_indices = @transform_9, window_bounds = array<i64: 8, 256>}]} {
    %c0 = arith.constant 0 : index
    %c0_0 = arith.constant 0 : index
    %0 = vector.load %arg1[%c0, %c0_0] : memref<8x16xf32, #tpu.memory_space<vmem>>, vector<8x16xf32>
    %c0_1 = arith.constant 0 : index
    %c0_2 = arith.constant 0 : index
    %1 = vector.load %arg2[%c0_1, %c0_2] : memref<1x4xf32, #tpu.memory_space<vmem>>, vector<1x4xf32>
    %c0_3 = arith.constant 0 : index
    %c0_4 = arith.constant 0 : index
    %2 = vector.load %arg3[%c0_3, %c0_4] : memref<16x64xbf16, #tpu.memory_space<vmem>>, vector<16x64xbf16>
    %c0_5 = arith.constant 0 : index
    %c0_6 = arith.constant 0 : index
    %3 = vector.load %arg4[%c0_5, %c0_6] : memref<1x64xf32, #tpu.memory_space<vmem>>, vector<1x64xf32>
    %c0_7 = arith.constant 0 : index
    %c0_8 = arith.constant 0 : index
    %4 = vector.load %arg5[%c0_7, %c0_8] : memref<16x4xbf16, #tpu.memory_space<vmem>>, vector<16x4xbf16>
    %c0_9 = arith.constant 0 : index
    %c0_10 = arith.constant 0 : index
    %5 = vector.load %arg6[%c0_9, %c0_10] : memref<64x4xbf16, #tpu.memory_space<vmem>>, vector<64x4xbf16>
    %c0_11 = arith.constant 0 : index
    %c0_12 = arith.constant 0 : index
    %6 = vector.load %arg7[%c0_11, %c0_12] : memref<4x64xbf16, #tpu.memory_space<vmem>>, vector<4x64xbf16>
    %c0_13 = arith.constant 0 : index
    %c0_14 = arith.constant 0 : index
    %7 = vector.load %arg8[%c0_13, %c0_14] : memref<64x16xbf16, #tpu.memory_space<vmem>>, vector<64x16xbf16>
    %c0_15 = arith.constant 0 : index
    %8 = memref.load %arg9[%c0_15] : memref<1xf32, #tpu.memory_space<smem>>
    %cst = arith.constant 0.000000e+00 : f32
    %9 = vector.broadcast %cst : f32 to vector<8x80xf32>
    %c0_16 = arith.constant 0 : index
    %c176 = arith.constant 176 : index
    %10 = vector.load %arg10[%c0_16, %c176] : memref<8x256xf32, #tpu.memory_space<vmem>>, vector<8x80xf32>
    tpu.vector_store %arg10[%c0_16, %c176], %9 {strides = array<i32>} : memref<8x256xf32, #tpu.memory_space<vmem>>, vector<8x80xf32>,
    %c0_17 = arith.constant 0 : index
    %c0_18 = arith.constant 0 : index
    %11 = vector.load %arg10[%c0_17, %c0_18] : memref<8x256xf32, #tpu.memory_space<vmem>>, vector<8x16xf32>
    tpu.vector_store %arg10[%c0_17, %c0_18], %0 {strides = array<i32>} : memref<8x256xf32, #tpu.memory_space<vmem>>, vector<8x16xf32>,
    %12 = arith.truncf %0 : vector<8x16xf32> to vector<8x16xbf16>
    %cst_19 = arith.constant dense<0.000000e+00> : vector<8x64xf32>
    %13 = tpu.matmul %12, %2, %cst_19 {dimension_numbers = #tpu.dot_dimension_numbers<[1], [0], [0], [1], [0, 0, 1, 1], [], []>} : vector<8x16xbf16>, vector<16x64xbf16>, vector<8x64xf32> -> vector<8x64xf32>
    %14 = vector.broadcast %3 : vector<1x64xf32> to vector<8x64xf32>
    %15 = arith.subf %13, %14 : vector<8x64xf32>
    %16 = tpu.concatenate %0, %0, %0, %0 in 1 : vector<8x16xf32>, vector<8x16xf32>, vector<8x16xf32>, vector<8x16xf32> -> vector<8x64xf32>
    %17 = arith.mulf %16, %15 : vector<8x64xf32>
    %18 = arith.truncf %17 : vector<8x64xf32> to vector<8x64xbf16>
    %cst_20 = arith.constant dense<0.000000e+00> : vector<8x4xf32>
    %19 = tpu.matmul %18, %5, %cst_20 {dimension_numbers = #tpu.dot_dimension_numbers<[1], [0], [0], [1], [0, 0, 1, 1], [], []>} : vector<8x64xbf16>, vector<64x4xbf16>, vector<8x4xf32> -> vector<8x4xf32>
    %20 = vector.broadcast %1 : vector<1x4xf32> to vector<8x4xf32>
    %21 = arith.addf %20, %19 : vector<8x4xf32>
    %cst_21 = arith.constant dense<0.000000e+00> : vector<8x4xf32>
    %22 = tpu.matmul %12, %4, %cst_21 {dimension_numbers = #tpu.dot_dimension_numbers<[1], [0], [0], [1], [0, 0, 1, 1], [], []>} : vector<8x16xbf16>, vector<16x4xbf16>, vector<8x4xf32> -> vector<8x4xf32>
    %23 = arith.addf %21, %22 : vector<8x4xf32>
    %24 = math.exp %23 : vector<8x4xf32>
    %cst_22 = arith.constant dense<0.000000e+00> : vector<8xf32>
    %25 = vector.multi_reduction <add>, %24, %cst_22 [1] : vector<8x4xf32> to vector<8xf32>
    %26 = vector.shape_cast %25 : vector<8xf32> to vector<8x1xf32>
    %27 = vector.broadcast %26 : vector<8x1xf32> to vector<8x4xf32>
    %28 = arith.divf %24, %27 : vector<8x4xf32>
    %29 = arith.truncf %28 : vector<8x4xf32> to vector<8x4xbf16>
    %cst_23 = arith.constant dense<0.000000e+00> : vector<8x64xf32>
    %30 = tpu.matmul %29, %6, %cst_23 {dimension_numbers = #tpu.dot_dimension_numbers<[1], [0], [0], [1], [0, 0, 1, 1], [], []>} : vector<8x4xbf16>, vector<4x64xbf16>, vector<8x64xf32> -> vector<8x64xf32>
    %31 = arith.mulf %30, %15 : vector<8x64xf32>
    %32 = arith.truncf %31 : vector<8x64xf32> to vector<8x64xbf16>
    %cst_24 = arith.constant dense<0.000000e+00> : vector<8x16xf32>
    %33 = tpu.matmul %32, %7, %cst_24 {dimension_numbers = #tpu.dot_dimension_numbers<[1], [0], [0], [1], [0, 0, 1, 1], [], []>} : vector<8x64xbf16>, vector<64x16xbf16>, vector<8x16xf32> -> vector<8x16xf32>
    %cst_25 = arith.constant 0.000000e+00 : f32
    %34 = vector.broadcast %cst_25 : f32 to vector<8x16xf32>
    %35 = arith.subf %34, %33 : vector<8x16xf32>
    %36 = vector.broadcast %8 : f32 to vector<8x16xf32>
    %37 = arith.mulf %36, %35 : vector<8x16xf32>
    %38 = arith.addf %0, %37 : vector<8x16xf32>
    %c0_26 = arith.constant 0 : index
    %c16 = arith.constant 16 : index
    %39 = vector.load %arg10[%c0_26, %c16] : memref<8x256xf32, #tpu.memory_space<vmem>>, vector<8x16xf32>
    tpu.vector_store %arg10[%c0_26, %c16], %38 {strides = array<i32>} : memref<8x256xf32, #tpu.memory_space<vmem>>, vector<8x16xf32>,
    %40 = arith.truncf %38 : vector<8x16xf32> to vector<8x16xbf16>
    %cst_27 = arith.constant dense<0.000000e+00> : vector<8x64xf32>
    %41 = tpu.matmul %40, %2, %cst_27 {dimension_numbers = #tpu.dot_dimension_numbers<[1], [0], [0], [1], [0, 0, 1, 1], [], []>} : vector<8x16xbf16>, vector<16x64xbf16>, vector<8x64xf32> -> vector<8x64xf32>
    %42 = vector.broadcast %3 : vector<1x64xf32> to vector<8x64xf32>
    %43 = arith.subf %41, %42 : vector<8x64xf32>
    %44 = tpu.concatenate %38, %38, %38, %38 in 1 : vector<8x16xf32>, vector<8x16xf32>, vector<8x16xf32>, vector<8x16xf32> -> vector<8x64xf32>
    %45 = arith.mulf %44, %43 : vector<8x64xf32>
    %46 = arith.truncf %45 : vector<8x64xf32> to vector<8x64xbf16>
    %cst_28 = arith.constant dense<0.000000e+00> : vector<8x4xf32>
    %47 = tpu.matmul %46, %5, %cst_28 {dimension_numbers = #tpu.dot_dimension_numbers<[1], [0], [0], [1], [0, 0, 1, 1], [], []>} : vector<8x64xbf16>, vector<64x4xbf16>, vector<8x4xf32> -> vector<8x4xf32>
    %48 = vector.broadcast %1 : vector<1x4xf32> to vector<8x4xf32>
    %49 = arith.addf %48, %47 : vector<8x4xf32>
    %cst_29 = arith.constant dense<0.000000e+00> : vector<8x4xf32>
    %50 = tpu.matmul %40, %4, %cst_29 {dimension_numbers = #tpu.dot_dimension_numbers<[1], [0], [0], [1], [0, 0, 1, 1], [], []>} : vector<8x16xbf16>, vector<16x4xbf16>, vector<8x4xf32> -> vector<8x4xf32>
    %51 = arith.addf %49, %50 : vector<8x4xf32>
    %52 = math.exp %51 : vector<8x4xf32>
    %cst_30 = arith.constant dense<0.000000e+00> : vector<8xf32>
    %53 = vector.multi_reduction <add>, %52, %cst_30 [1] : vector<8x4xf32> to vector<8xf32>
    %54 = vector.shape_cast %53 : vector<8xf32> to vector<8x1xf32>
    %55 = vector.broadcast %54 : vector<8x1xf32> to vector<8x4xf32>
    %56 = arith.divf %52, %55 : vector<8x4xf32>
    %57 = arith.truncf %56 : vector<8x4xf32> to vector<8x4xbf16>
    %cst_31 = arith.constant dense<0.000000e+00> : vector<8x64xf32>
    %58 = tpu.matmul %57, %6, %cst_31 {dimension_numbers = #tpu.dot_dimension_numbers<[1], [0], [0], [1], [0, 0, 1, 1], [], []>} : vector<8x4xbf16>, vector<4x64xbf16>, vector<8x64xf32> -> vector<8x64xf32>
    %59 = arith.mulf %58, %43 : vector<8x64xf32>
    %60 = arith.truncf %59 : vector<8x64xf32> to vector<8x64xbf16>
    %cst_32 = arith.constant dense<0.000000e+00> : vector<8x16xf32>
    %61 = tpu.matmul %60, %7, %cst_32 {dimension_numbers = #tpu.dot_dimension_numbers<[1], [0], [0], [1], [0, 0, 1, 1], [], []>} : vector<8x64xbf16>, vector<64x16xbf16>, vector<8x16xf32> -> vector<8x16xf32>
    %cst_33 = arith.constant 0.000000e+00 : f32
    %62 = vector.broadcast %cst_33 : f32 to vector<8x16xf32>
    %63 = arith.subf %62, %61 : vector<8x16xf32>
    %64 = vector.broadcast %8 : f32 to vector<8x16xf32>
    %65 = arith.mulf %64, %63 : vector<8x16xf32>
    %66 = arith.addf %38, %65 : vector<8x16xf32>
    %c0_34 = arith.constant 0 : index
    %c32 = arith.constant 32 : index
    %67 = vector.load %arg10[%c0_34, %c32] : memref<8x256xf32, #tpu.memory_space<vmem>>, vector<8x16xf32>
    tpu.vector_store %arg10[%c0_34, %c32], %66 {strides = array<i32>} : memref<8x256xf32, #tpu.memory_space<vmem>>, vector<8x16xf32>,
    %68 = arith.truncf %66 : vector<8x16xf32> to vector<8x16xbf16>
    %cst_35 = arith.constant dense<0.000000e+00> : vector<8x64xf32>
    %69 = tpu.matmul %68, %2, %cst_35 {dimension_numbers = #tpu.dot_dimension_numbers<[1], [0], [0], [1], [0, 0, 1, 1], [], []>} : vector<8x16xbf16>, vector<16x64xbf16>, vector<8x64xf32> -> vector<8x64xf32>
    %70 = vector.broadcast %3 : vector<1x64xf32> to vector<8x64xf32>
    %71 = arith.subf %69, %70 : vector<8x64xf32>
    %72 = tpu.concatenate %66, %66, %66, %66 in 1 : vector<8x16xf32>, vector<8x16xf32>, vector<8x16xf32>, vector<8x16xf32> -> vector<8x64xf32>
    %73 = arith.mulf %72, %71 : vector<8x64xf32>
    %74 = arith.truncf %73 : vector<8x64xf32> to vector<8x64xbf16>
    %cst_36 = arith.constant dense<0.000000e+00> : vector<8x4xf32>
    %75 = tpu.matmul %74, %5, %cst_36 {dimension_numbers = #tpu.dot_dimension_numbers<[1], [0], [0], [1], [0, 0, 1, 1], [], []>} : vector<8x64xbf16>, vector<64x4xbf16>, vector<8x4xf32> -> vector<8x4xf32>
    %76 = vector.broadcast %1 : vector<1x4xf32> to vector<8x4xf32>
    %77 = arith.addf %76, %75 : vector<8x4xf32>
    %cst_37 = arith.constant dense<0.000000e+00> : vector<8x4xf32>
    %78 = tpu.matmul %68, %4, %cst_37 {dimension_numbers = #tpu.dot_dimension_numbers<[1], [0], [0], [1], [0, 0, 1, 1], [], []>} : vector<8x16xbf16>, vector<16x4xbf16>, vector<8x4xf32> -> vector<8x4xf32>
    %79 = arith.addf %77, %78 : vector<8x4xf32>
    %80 = math.exp %79 : vector<8x4xf32>
    %cst_38 = arith.constant dense<0.000000e+00> : vector<8xf32>
    %81 = vector.multi_reduction <add>, %80, %cst_38 [1] : vector<8x4xf32> to vector<8xf32>
    %82 = vector.shape_cast %81 : vector<8xf32> to vector<8x1xf32>
    %83 = vector.broadcast %82 : vector<8x1xf32> to vector<8x4xf32>
    %84 = arith.divf %80, %83 : vector<8x4xf32>
    %85 = arith.truncf %84 : vector<8x4xf32> to vector<8x4xbf16>
    %cst_39 = arith.constant dense<0.000000e+00> : vector<8x64xf32>
    %86 = tpu.matmul %85, %6, %cst_39 {dimension_numbers = #tpu.dot_dimension_numbers<[1], [0], [0], [1], [0, 0, 1, 1], [], []>} : vector<8x4xbf16>, vector<4x64xbf16>, vector<8x64xf32> -> vector<8x64xf32>
    %87 = arith.mulf %86, %71 : vector<8x64xf32>
    %88 = arith.truncf %87 : vector<8x64xf32> to vector<8x64xbf16>
    %cst_40 = arith.constant dense<0.000000e+00> : vector<8x16xf32>
    %89 = tpu.matmul %88, %7, %cst_40 {dimension_numbers = #tpu.dot_dimension_numbers<[1], [0], [0], [1], [0, 0, 1, 1], [], []>} : vector<8x64xbf16>, vector<64x16xbf16>, vector<8x16xf32> -> vector<8x16xf32>
    %cst_41 = arith.constant 0.000000e+00 : f32
    %90 = vector.broadcast %cst_41 : f32 to vector<8x16xf32>
    %91 = arith.subf %90, %89 : vector<8x16xf32>
    %92 = vector.broadcast %8 : f32 to vector<8x16xf32>
    %93 = arith.mulf %92, %91 : vector<8x16xf32>
    %94 = arith.addf %66, %93 : vector<8x16xf32>
    %c0_42 = arith.constant 0 : index
    %c48 = arith.constant 48 : index
    %95 = vector.load %arg10[%c0_42, %c48] : memref<8x256xf32, #tpu.memory_space<vmem>>, vector<8x16xf32>
    tpu.vector_store %arg10[%c0_42, %c48], %94 {strides = array<i32>} : memref<8x256xf32, #tpu.memory_space<vmem>>, vector<8x16xf32>,
    %96 = arith.truncf %94 : vector<8x16xf32> to vector<8x16xbf16>
    %cst_43 = arith.constant dense<0.000000e+00> : vector<8x64xf32>
    %97 = tpu.matmul %96, %2, %cst_43 {dimension_numbers = #tpu.dot_dimension_numbers<[1], [0], [0], [1], [0, 0, 1, 1], [], []>} : vector<8x16xbf16>, vector<16x64xbf16>, vector<8x64xf32> -> vector<8x64xf32>
    %98 = vector.broadcast %3 : vector<1x64xf32> to vector<8x64xf32>
    %99 = arith.subf %97, %98 : vector<8x64xf32>
    %100 = tpu.concatenate %94, %94, %94, %94 in 1 : vector<8x16xf32>, vector<8x16xf32>, vector<8x16xf32>, vector<8x16xf32> -> vector<8x64xf32>
    %101 = arith.mulf %100, %99 : vector<8x64xf32>
    %102 = arith.truncf %101 : vector<8x64xf32> to vector<8x64xbf16>
    %cst_44 = arith.constant dense<0.000000e+00> : vector<8x4xf32>
    %103 = tpu.matmul %102, %5, %cst_44 {dimension_numbers = #tpu.dot_dimension_numbers<[1], [0], [0], [1], [0, 0, 1, 1], [], []>} : vector<8x64xbf16>, vector<64x4xbf16>, vector<8x4xf32> -> vector<8x4xf32>
    %104 = vector.broadcast %1 : vector<1x4xf32> to vector<8x4xf32>
    %105 = arith.addf %104, %103 : vector<8x4xf32>
    %cst_45 = arith.constant dense<0.000000e+00> : vector<8x4xf32>
    %106 = tpu.matmul %96, %4, %cst_45 {dimension_numbers = #tpu.dot_dimension_numbers<[1], [0], [0], [1], [0, 0, 1, 1], [], []>} : vector<8x16xbf16>, vector<16x4xbf16>, vector<8x4xf32> -> vector<8x4xf32>
    %107 = arith.addf %105, %106 : vector<8x4xf32>
    %108 = math.exp %107 : vector<8x4xf32>
    %cst_46 = arith.constant dense<0.000000e+00> : vector<8xf32>
    %109 = vector.multi_reduction <add>, %108, %cst_46 [1] : vector<8x4xf32> to vector<8xf32>
    %110 = vector.shape_cast %109 : vector<8xf32> to vector<8x1xf32>
    %111 = vector.broadcast %110 : vector<8x1xf32> to vector<8x4xf32>
    %112 = arith.divf %108, %111 : vector<8x4xf32>
    %113 = arith.truncf %112 : vector<8x4xf32> to vector<8x4xbf16>
    %cst_47 = arith.constant dense<0.000000e+00> : vector<8x64xf32>
    %114 = tpu.matmul %113, %6, %cst_47 {dimension_numbers = #tpu.dot_dimension_numbers<[1], [0], [0], [1], [0, 0, 1, 1], [], []>} : vector<8x4xbf16>, vector<4x64xbf16>, vector<8x64xf32> -> vector<8x64xf32>
    %115 = arith.mulf %114, %99 : vector<8x64xf32>
    %116 = arith.truncf %115 : vector<8x64xf32> to vector<8x64xbf16>
    %cst_48 = arith.constant dense<0.000000e+00> : vector<8x16xf32>
    %117 = tpu.matmul %116, %7, %cst_48 {dimension_numbers = #tpu.dot_dimension_numbers<[1], [0], [0], [1], [0, 0, 1, 1], [], []>} : vector<8x64xbf16>, vector<64x16xbf16>, vector<8x16xf32> -> vector<8x16xf32>
    %cst_49 = arith.constant 0.000000e+00 : f32
    %118 = vector.broadcast %cst_49 : f32 to vector<8x16xf32>
    %119 = arith.subf %118, %117 : vector<8x16xf32>
    %120 = vector.broadcast %8 : f32 to vector<8x16xf32>
    %121 = arith.mulf %120, %119 : vector<8x16xf32>
    %122 = arith.addf %94, %121 : vector<8x16xf32>
    %c0_50 = arith.constant 0 : index
    %c64 = arith.constant 64 : index
    %123 = vector.load %arg10[%c0_50, %c64] : memref<8x256xf32, #tpu.memory_space<vmem>>, vector<8x16xf32>
    tpu.vector_store %arg10[%c0_50, %c64], %122 {strides = array<i32>} : memref<8x256xf32, #tpu.memory_space<vmem>>, vector<8x16xf32>,
    %124 = arith.truncf %122 : vector<8x16xf32> to vector<8x16xbf16>
    %cst_51 = arith.constant dense<0.000000e+00> : vector<8x64xf32>
    %125 = tpu.matmul %124, %2, %cst_51 {dimension_numbers = #tpu.dot_dimension_numbers<[1], [0], [0], [1], [0, 0, 1, 1], [], []>} : vector<8x16xbf16>, vector<16x64xbf16>, vector<8x64xf32> -> vector<8x64xf32>
    %126 = vector.broadcast %3 : vector<1x64xf32> to vector<8x64xf32>
    %127 = arith.subf %125, %126 : vector<8x64xf32>
    %128 = tpu.concatenate %122, %122, %122, %122 in 1 : vector<8x16xf32>, vector<8x16xf32>, vector<8x16xf32>, vector<8x16xf32> -> vector<8x64xf32>
    %129 = arith.mulf %128, %127 : vector<8x64xf32>
    %130 = arith.truncf %129 : vector<8x64xf32> to vector<8x64xbf16>
    %cst_52 = arith.constant dense<0.000000e+00> : vector<8x4xf32>
    %131 = tpu.matmul %130, %5, %cst_52 {dimension_numbers = #tpu.dot_dimension_numbers<[1], [0], [0], [1], [0, 0, 1, 1], [], []>} : vector<8x64xbf16>, vector<64x4xbf16>, vector<8x4xf32> -> vector<8x4xf32>
    %132 = vector.broadcast %1 : vector<1x4xf32> to vector<8x4xf32>
    %133 = arith.addf %132, %131 : vector<8x4xf32>
    %cst_53 = arith.constant dense<0.000000e+00> : vector<8x4xf32>
    %134 = tpu.matmul %124, %4, %cst_53 {dimension_numbers = #tpu.dot_dimension_numbers<[1], [0], [0], [1], [0, 0, 1, 1], [], []>} : vector<8x16xbf16>, vector<16x4xbf16>, vector<8x4xf32> -> vector<8x4xf32>
    %135 = arith.addf %133, %134 : vector<8x4xf32>
    %136 = math.exp %135 : vector<8x4xf32>
    %cst_54 = arith.constant dense<0.000000e+00> : vector<8xf32>
    %137 = vector.multi_reduction <add>, %136, %cst_54 [1] : vector<8x4xf32> to vector<8xf32>
    %138 = vector.shape_cast %137 : vector<8xf32> to vector<8x1xf32>
    %139 = vector.broadcast %138 : vector<8x1xf32> to vector<8x4xf32>
    %140 = arith.divf %136, %139 : vector<8x4xf32>
    %141 = arith.truncf %140 : vector<8x4xf32> to vector<8x4xbf16>
    %cst_55 = arith.constant dense<0.000000e+00> : vector<8x64xf32>
    %142 = tpu.matmul %141, %6, %cst_55 {dimension_numbers = #tpu.dot_dimension_numbers<[1], [0], [0], [1], [0, 0, 1, 1], [], []>} : vector<8x4xbf16>, vector<4x64xbf16>, vector<8x64xf32> -> vector<8x64xf32>
    %143 = arith.mulf %142, %127 : vector<8x64xf32>
    %144 = arith.truncf %143 : vector<8x64xf32> to vector<8x64xbf16>
    %cst_56 = arith.constant dense<0.000000e+00> : vector<8x16xf32>
    %145 = tpu.matmul %144, %7, %cst_56 {dimension_numbers = #tpu.dot_dimension_numbers<[1], [0], [0], [1], [0, 0, 1, 1], [], []>} : vector<8x64xbf16>, vector<64x16xbf16>, vector<8x16xf32> -> vector<8x16xf32>
    %cst_57 = arith.constant 0.000000e+00 : f32
    %146 = vector.broadcast %cst_57 : f32 to vector<8x16xf32>
    %147 = arith.subf %146, %145 : vector<8x16xf32>
    %148 = vector.broadcast %8 : f32 to vector<8x16xf32>
    %149 = arith.mulf %148, %147 : vector<8x16xf32>
    %150 = arith.addf %122, %149 : vector<8x16xf32>
    %c0_58 = arith.constant 0 : index
    %c80 = arith.constant 80 : index
    %151 = vector.load %arg10[%c0_58, %c80] : memref<8x256xf32, #tpu.memory_space<vmem>>, vector<8x16xf32>
    tpu.vector_store %arg10[%c0_58, %c80], %150 {strides = array<i32>} : memref<8x256xf32, #tpu.memory_space<vmem>>, vector<8x16xf32>,
    %152 = arith.truncf %150 : vector<8x16xf32> to vector<8x16xbf16>
    %cst_59 = arith.constant dense<0.000000e+00> : vector<8x64xf32>
    %153 = tpu.matmul %152, %2, %cst_59 {dimension_numbers = #tpu.dot_dimension_numbers<[1], [0], [0], [1], [0, 0, 1, 1], [], []>} : vector<8x16xbf16>, vector<16x64xbf16>, vector<8x64xf32> -> vector<8x64xf32>
    %154 = vector.broadcast %3 : vector<1x64xf32> to vector<8x64xf32>
    %155 = arith.subf %153, %154 : vector<8x64xf32>
    %156 = tpu.concatenate %150, %150, %150, %150 in 1 : vector<8x16xf32>, vector<8x16xf32>, vector<8x16xf32>, vector<8x16xf32> -> vector<8x64xf32>
    %157 = arith.mulf %156, %155 : vector<8x64xf32>
    %158 = arith.truncf %157 : vector<8x64xf32> to vector<8x64xbf16>
    %cst_60 = arith.constant dense<0.000000e+00> : vector<8x4xf32>
    %159 = tpu.matmul %158, %5, %cst_60 {dimension_numbers = #tpu.dot_dimension_numbers<[1], [0], [0], [1], [0, 0, 1, 1], [], []>} : vector<8x64xbf16>, vector<64x4xbf16>, vector<8x4xf32> -> vector<8x4xf32>
    %160 = vector.broadcast %1 : vector<1x4xf32> to vector<8x4xf32>
    %161 = arith.addf %160, %159 : vector<8x4xf32>
    %cst_61 = arith.constant dense<0.000000e+00> : vector<8x4xf32>
    %162 = tpu.matmul %152, %4, %cst_61 {dimension_numbers = #tpu.dot_dimension_numbers<[1], [0], [0], [1], [0, 0, 1, 1], [], []>} : vector<8x16xbf16>, vector<16x4xbf16>, vector<8x4xf32> -> vector<8x4xf32>
    %163 = arith.addf %161, %162 : vector<8x4xf32>
    %164 = math.exp %163 : vector<8x4xf32>
    %cst_62 = arith.constant dense<0.000000e+00> : vector<8xf32>
    %165 = vector.multi_reduction <add>, %164, %cst_62 [1] : vector<8x4xf32> to vector<8xf32>
    %166 = vector.shape_cast %165 : vector<8xf32> to vector<8x1xf32>
    %167 = vector.broadcast %166 : vector<8x1xf32> to vector<8x4xf32>
    %168 = arith.divf %164, %167 : vector<8x4xf32>
    %169 = arith.truncf %168 : vector<8x4xf32> to vector<8x4xbf16>
    %cst_63 = arith.constant dense<0.000000e+00> : vector<8x64xf32>
    %170 = tpu.matmul %169, %6, %cst_63 {dimension_numbers = #tpu.dot_dimension_numbers<[1], [0], [0], [1], [0, 0, 1, 1], [], []>} : vector<8x4xbf16>, vector<4x64xbf16>, vector<8x64xf32> -> vector<8x64xf32>
    %171 = arith.mulf %170, %155 : vector<8x64xf32>
    %172 = arith.truncf %171 : vector<8x64xf32> to vector<8x64xbf16>
    %cst_64 = arith.constant dense<0.000000e+00> : vector<8x16xf32>
    %173 = tpu.matmul %172, %7, %cst_64 {dimension_numbers = #tpu.dot_dimension_numbers<[1], [0], [0], [1], [0, 0, 1, 1], [], []>} : vector<8x64xbf16>, vector<64x16xbf16>, vector<8x16xf32> -> vector<8x16xf32>
    %cst_65 = arith.constant 0.000000e+00 : f32
    %174 = vector.broadcast %cst_65 : f32 to vector<8x16xf32>
    %175 = arith.subf %174, %173 : vector<8x16xf32>
    %176 = vector.broadcast %8 : f32 to vector<8x16xf32>
    %177 = arith.mulf %176, %175 : vector<8x16xf32>
    %178 = arith.addf %150, %177 : vector<8x16xf32>
    %c0_66 = arith.constant 0 : index
    %c96 = arith.constant 96 : index
    %179 = vector.load %arg10[%c0_66, %c96] : memref<8x256xf32, #tpu.memory_space<vmem>>, vector<8x16xf32>
    tpu.vector_store %arg10[%c0_66, %c96], %178 {strides = array<i32>} : memref<8x256xf32, #tpu.memory_space<vmem>>, vector<8x16xf32>,
    %180 = arith.truncf %178 : vector<8x16xf32> to vector<8x16xbf16>
    %cst_67 = arith.constant dense<0.000000e+00> : vector<8x64xf32>
    %181 = tpu.matmul %180, %2, %cst_67 {dimension_numbers = #tpu.dot_dimension_numbers<[1], [0], [0], [1], [0, 0, 1, 1], [], []>} : vector<8x16xbf16>, vector<16x64xbf16>, vector<8x64xf32> -> vector<8x64xf32>
    %182 = vector.broadcast %3 : vector<1x64xf32> to vector<8x64xf32>
    %183 = arith.subf %181, %182 : vector<8x64xf32>
    %184 = tpu.concatenate %178, %178, %178, %178 in 1 : vector<8x16xf32>, vector<8x16xf32>, vector<8x16xf32>, vector<8x16xf32> -> vector<8x64xf32>
    %185 = arith.mulf %184, %183 : vector<8x64xf32>
    %186 = arith.truncf %185 : vector<8x64xf32> to vector<8x64xbf16>
    %cst_68 = arith.constant dense<0.000000e+00> : vector<8x4xf32>
    %187 = tpu.matmul %186, %5, %cst_68 {dimension_numbers = #tpu.dot_dimension_numbers<[1], [0], [0], [1], [0, 0, 1, 1], [], []>} : vector<8x64xbf16>, vector<64x4xbf16>, vector<8x4xf32> -> vector<8x4xf32>
    %188 = vector.broadcast %1 : vector<1x4xf32> to vector<8x4xf32>
    %189 = arith.addf %188, %187 : vector<8x4xf32>
    %cst_69 = arith.constant dense<0.000000e+00> : vector<8x4xf32>
    %190 = tpu.matmul %180, %4, %cst_69 {dimension_numbers = #tpu.dot_dimension_numbers<[1], [0], [0], [1], [0, 0, 1, 1], [], []>} : vector<8x16xbf16>, vector<16x4xbf16>, vector<8x4xf32> -> vector<8x4xf32>
    %191 = arith.addf %189, %190 : vector<8x4xf32>
    %192 = math.exp %191 : vector<8x4xf32>
    %cst_70 = arith.constant dense<0.000000e+00> : vector<8xf32>
    %193 = vector.multi_reduction <add>, %192, %cst_70 [1] : vector<8x4xf32> to vector<8xf32>
    %194 = vector.shape_cast %193 : vector<8xf32> to vector<8x1xf32>
    %195 = vector.broadcast %194 : vector<8x1xf32> to vector<8x4xf32>
    %196 = arith.divf %192, %195 : vector<8x4xf32>
    %197 = arith.truncf %196 : vector<8x4xf32> to vector<8x4xbf16>
    %cst_71 = arith.constant dense<0.000000e+00> : vector<8x64xf32>
    %198 = tpu.matmul %197, %6, %cst_71 {dimension_numbers = #tpu.dot_dimension_numbers<[1], [0], [0], [1], [0, 0, 1, 1], [], []>} : vector<8x4xbf16>, vector<4x64xbf16>, vector<8x64xf32> -> vector<8x64xf32>
    %199 = arith.mulf %198, %183 : vector<8x64xf32>
    %200 = arith.truncf %199 : vector<8x64xf32> to vector<8x64xbf16>
    %cst_72 = arith.constant dense<0.000000e+00> : vector<8x16xf32>
    %201 = tpu.matmul %200, %7, %cst_72 {dimension_numbers = #tpu.dot_dimension_numbers<[1], [0], [0], [1], [0, 0, 1, 1], [], []>} : vector<8x64xbf16>, vector<64x16xbf16>, vector<8x16xf32> -> vector<8x16xf32>
    %cst_73 = arith.constant 0.000000e+00 : f32
    %202 = vector.broadcast %cst_73 : f32 to vector<8x16xf32>
    %203 = arith.subf %202, %201 : vector<8x16xf32>
    %204 = vector.broadcast %8 : f32 to vector<8x16xf32>
    %205 = arith.mulf %204, %203 : vector<8x16xf32>
    %206 = arith.addf %178, %205 : vector<8x16xf32>
    %c0_74 = arith.constant 0 : index
    %c112 = arith.constant 112 : index
    %207 = vector.load %arg10[%c0_74, %c112] : memref<8x256xf32, #tpu.memory_space<vmem>>, vector<8x16xf32>
    tpu.vector_store %arg10[%c0_74, %c112], %206 {strides = array<i32>} : memref<8x256xf32, #tpu.memory_space<vmem>>, vector<8x16xf32>,
    %208 = arith.truncf %206 : vector<8x16xf32> to vector<8x16xbf16>
    %cst_75 = arith.constant dense<0.000000e+00> : vector<8x64xf32>
    %209 = tpu.matmul %208, %2, %cst_75 {dimension_numbers = #tpu.dot_dimension_numbers<[1], [0], [0], [1], [0, 0, 1, 1], [], []>} : vector<8x16xbf16>, vector<16x64xbf16>, vector<8x64xf32> -> vector<8x64xf32>
    %210 = vector.broadcast %3 : vector<1x64xf32> to vector<8x64xf32>
    %211 = arith.subf %209, %210 : vector<8x64xf32>
    %212 = tpu.concatenate %206, %206, %206, %206 in 1 : vector<8x16xf32>, vector<8x16xf32>, vector<8x16xf32>, vector<8x16xf32> -> vector<8x64xf32>
    %213 = arith.mulf %212, %211 : vector<8x64xf32>
    %214 = arith.truncf %213 : vector<8x64xf32> to vector<8x64xbf16>
    %cst_76 = arith.constant dense<0.000000e+00> : vector<8x4xf32>
    %215 = tpu.matmul %214, %5, %cst_76 {dimension_numbers = #tpu.dot_dimension_numbers<[1], [0], [0], [1], [0, 0, 1, 1], [], []>} : vector<8x64xbf16>, vector<64x4xbf16>, vector<8x4xf32> -> vector<8x4xf32>
    %216 = vector.broadcast %1 : vector<1x4xf32> to vector<8x4xf32>
    %217 = arith.addf %216, %215 : vector<8x4xf32>
    %cst_77 = arith.constant dense<0.000000e+00> : vector<8x4xf32>
    %218 = tpu.matmul %208, %4, %cst_77 {dimension_numbers = #tpu.dot_dimension_numbers<[1], [0], [0], [1], [0, 0, 1, 1], [], []>} : vector<8x16xbf16>, vector<16x4xbf16>, vector<8x4xf32> -> vector<8x4xf32>
    %219 = arith.addf %217, %218 : vector<8x4xf32>
    %220 = math.exp %219 : vector<8x4xf32>
    %cst_78 = arith.constant dense<0.000000e+00> : vector<8xf32>
    %221 = vector.multi_reduction <add>, %220, %cst_78 [1] : vector<8x4xf32> to vector<8xf32>
    %222 = vector.shape_cast %221 : vector<8xf32> to vector<8x1xf32>
    %223 = vector.broadcast %222 : vector<8x1xf32> to vector<8x4xf32>
    %224 = arith.divf %220, %223 : vector<8x4xf32>
    %225 = arith.truncf %224 : vector<8x4xf32> to vector<8x4xbf16>
    %cst_79 = arith.constant dense<0.000000e+00> : vector<8x64xf32>
    %226 = tpu.matmul %225, %6, %cst_79 {dimension_numbers = #tpu.dot_dimension_numbers<[1], [0], [0], [1], [0, 0, 1, 1], [], []>} : vector<8x4xbf16>, vector<4x64xbf16>, vector<8x64xf32> -> vector<8x64xf32>
    %227 = arith.mulf %226, %211 : vector<8x64xf32>
    %228 = arith.truncf %227 : vector<8x64xf32> to vector<8x64xbf16>
    %cst_80 = arith.constant dense<0.000000e+00> : vector<8x16xf32>
    %229 = tpu.matmul %228, %7, %cst_80 {dimension_numbers = #tpu.dot_dimension_numbers<[1], [0], [0], [1], [0, 0, 1, 1], [], []>} : vector<8x64xbf16>, vector<64x16xbf16>, vector<8x16xf32> -> vector<8x16xf32>
    %cst_81 = arith.constant 0.000000e+00 : f32
    %230 = vector.broadcast %cst_81 : f32 to vector<8x16xf32>
    %231 = arith.subf %230, %229 : vector<8x16xf32>
    %232 = vector.broadcast %8 : f32 to vector<8x16xf32>
    %233 = arith.mulf %232, %231 : vector<8x16xf32>
    %234 = arith.addf %206, %233 : vector<8x16xf32>
    %c0_82 = arith.constant 0 : index
    %c128 = arith.constant 128 : index
    %235 = vector.load %arg10[%c0_82, %c128] : memref<8x256xf32, #tpu.memory_space<vmem>>, vector<8x16xf32>
    tpu.vector_store %arg10[%c0_82, %c128], %234 {strides = array<i32>} : memref<8x256xf32, #tpu.memory_space<vmem>>, vector<8x16xf32>,
    %236 = arith.truncf %234 : vector<8x16xf32> to vector<8x16xbf16>
    %cst_83 = arith.constant dense<0.000000e+00> : vector<8x64xf32>
    %237 = tpu.matmul %236, %2, %cst_83 {dimension_numbers = #tpu.dot_dimension_numbers<[1], [0], [0], [1], [0, 0, 1, 1], [], []>} : vector<8x16xbf16>, vector<16x64xbf16>, vector<8x64xf32> -> vector<8x64xf32>
    %238 = vector.broadcast %3 : vector<1x64xf32> to vector<8x64xf32>
    %239 = arith.subf %237, %238 : vector<8x64xf32>
    %240 = tpu.concatenate %234, %234, %234, %234 in 1 : vector<8x16xf32>, vector<8x16xf32>, vector<8x16xf32>, vector<8x16xf32> -> vector<8x64xf32>
    %241 = arith.mulf %240, %239 : vector<8x64xf32>
    %242 = arith.truncf %241 : vector<8x64xf32> to vector<8x64xbf16>
    %cst_84 = arith.constant dense<0.000000e+00> : vector<8x4xf32>
    %243 = tpu.matmul %242, %5, %cst_84 {dimension_numbers = #tpu.dot_dimension_numbers<[1], [0], [0], [1], [0, 0, 1, 1], [], []>} : vector<8x64xbf16>, vector<64x4xbf16>, vector<8x4xf32> -> vector<8x4xf32>
    %244 = vector.broadcast %1 : vector<1x4xf32> to vector<8x4xf32>
    %245 = arith.addf %244, %243 : vector<8x4xf32>
    %cst_85 = arith.constant dense<0.000000e+00> : vector<8x4xf32>
    %246 = tpu.matmul %236, %4, %cst_85 {dimension_numbers = #tpu.dot_dimension_numbers<[1], [0], [0], [1], [0, 0, 1, 1], [], []>} : vector<8x16xbf16>, vector<16x4xbf16>, vector<8x4xf32> -> vector<8x4xf32>
    %247 = arith.addf %245, %246 : vector<8x4xf32>
    %248 = math.exp %247 : vector<8x4xf32>
    %cst_86 = arith.constant dense<0.000000e+00> : vector<8xf32>
    %249 = vector.multi_reduction <add>, %248, %cst_86 [1] : vector<8x4xf32> to vector<8xf32>
    %250 = vector.shape_cast %249 : vector<8xf32> to vector<8x1xf32>
    %251 = vector.broadcast %250 : vector<8x1xf32> to vector<8x4xf32>
    %252 = arith.divf %248, %251 : vector<8x4xf32>
    %253 = arith.truncf %252 : vector<8x4xf32> to vector<8x4xbf16>
    %cst_87 = arith.constant dense<0.000000e+00> : vector<8x64xf32>
    %254 = tpu.matmul %253, %6, %cst_87 {dimension_numbers = #tpu.dot_dimension_numbers<[1], [0], [0], [1], [0, 0, 1, 1], [], []>} : vector<8x4xbf16>, vector<4x64xbf16>, vector<8x64xf32> -> vector<8x64xf32>
    %255 = arith.mulf %254, %239 : vector<8x64xf32>
    %256 = arith.truncf %255 : vector<8x64xf32> to vector<8x64xbf16>
    %cst_88 = arith.constant dense<0.000000e+00> : vector<8x16xf32>
    %257 = tpu.matmul %256, %7, %cst_88 {dimension_numbers = #tpu.dot_dimension_numbers<[1], [0], [0], [1], [0, 0, 1, 1], [], []>} : vector<8x64xbf16>, vector<64x16xbf16>, vector<8x16xf32> -> vector<8x16xf32>
    %cst_89 = arith.constant 0.000000e+00 : f32
    %258 = vector.broadcast %cst_89 : f32 to vector<8x16xf32>
    %259 = arith.subf %258, %257 : vector<8x16xf32>
    %260 = vector.broadcast %8 : f32 to vector<8x16xf32>
    %261 = arith.mulf %260, %259 : vector<8x16xf32>
    %262 = arith.addf %234, %261 : vector<8x16xf32>
    %c0_90 = arith.constant 0 : index
    %c144 = arith.constant 144 : index
    %263 = vector.load %arg10[%c0_90, %c144] : memref<8x256xf32, #tpu.memory_space<vmem>>, vector<8x16xf32>
    tpu.vector_store %arg10[%c0_90, %c144], %262 {strides = array<i32>} : memref<8x256xf32, #tpu.memory_space<vmem>>, vector<8x16xf32>,
    %264 = arith.truncf %262 : vector<8x16xf32> to vector<8x16xbf16>
    %cst_91 = arith.constant dense<0.000000e+00> : vector<8x64xf32>
    %265 = tpu.matmul %264, %2, %cst_91 {dimension_numbers = #tpu.dot_dimension_numbers<[1], [0], [0], [1], [0, 0, 1, 1], [], []>} : vector<8x16xbf16>, vector<16x64xbf16>, vector<8x64xf32> -> vector<8x64xf32>
    %266 = vector.broadcast %3 : vector<1x64xf32> to vector<8x64xf32>
    %267 = arith.subf %265, %266 : vector<8x64xf32>
    %268 = tpu.concatenate %262, %262, %262, %262 in 1 : vector<8x16xf32>, vector<8x16xf32>, vector<8x16xf32>, vector<8x16xf32> -> vector<8x64xf32>
    %269 = arith.mulf %268, %267 : vector<8x64xf32>
    %270 = arith.truncf %269 : vector<8x64xf32> to vector<8x64xbf16>
    %cst_92 = arith.constant dense<0.000000e+00> : vector<8x4xf32>
    %271 = tpu.matmul %270, %5, %cst_92 {dimension_numbers = #tpu.dot_dimension_numbers<[1], [0], [0], [1], [0, 0, 1, 1], [], []>} : vector<8x64xbf16>, vector<64x4xbf16>, vector<8x4xf32> -> vector<8x4xf32>
    %272 = vector.broadcast %1 : vector<1x4xf32> to vector<8x4xf32>
    %273 = arith.addf %272, %271 : vector<8x4xf32>
    %cst_93 = arith.constant dense<0.000000e+00> : vector<8x4xf32>
    %274 = tpu.matmul %264, %4, %cst_93 {dimension_numbers = #tpu.dot_dimension_numbers<[1], [0], [0], [1], [0, 0, 1, 1], [], []>} : vector<8x16xbf16>, vector<16x4xbf16>, vector<8x4xf32> -> vector<8x4xf32>
    %275 = arith.addf %273, %274 : vector<8x4xf32>
    %276 = math.exp %275 : vector<8x4xf32>
    %cst_94 = arith.constant dense<0.000000e+00> : vector<8xf32>
    %277 = vector.multi_reduction <add>, %276, %cst_94 [1] : vector<8x4xf32> to vector<8xf32>
    %278 = vector.shape_cast %277 : vector<8xf32> to vector<8x1xf32>
    %279 = vector.broadcast %278 : vector<8x1xf32> to vector<8x4xf32>
    %280 = arith.divf %276, %279 : vector<8x4xf32>
    %281 = arith.truncf %280 : vector<8x4xf32> to vector<8x4xbf16>
    %cst_95 = arith.constant dense<0.000000e+00> : vector<8x64xf32>
    %282 = tpu.matmul %281, %6, %cst_95 {dimension_numbers = #tpu.dot_dimension_numbers<[1], [0], [0], [1], [0, 0, 1, 1], [], []>} : vector<8x4xbf16>, vector<4x64xbf16>, vector<8x64xf32> -> vector<8x64xf32>
    %283 = arith.mulf %282, %267 : vector<8x64xf32>
    %284 = arith.truncf %283 : vector<8x64xf32> to vector<8x64xbf16>
    %cst_96 = arith.constant dense<0.000000e+00> : vector<8x16xf32>
    %285 = tpu.matmul %284, %7, %cst_96 {dimension_numbers = #tpu.dot_dimension_numbers<[1], [0], [0], [1], [0, 0, 1, 1], [], []>} : vector<8x64xbf16>, vector<64x16xbf16>, vector<8x16xf32> -> vector<8x16xf32>
    %cst_97 = arith.constant 0.000000e+00 : f32
    %286 = vector.broadcast %cst_97 : f32 to vector<8x16xf32>
    %287 = arith.subf %286, %285 : vector<8x16xf32>
    %288 = vector.broadcast %8 : f32 to vector<8x16xf32>
    %289 = arith.mulf %288, %287 : vector<8x16xf32>
    %290 = arith.addf %262, %289 : vector<8x16xf32>
    %c0_98 = arith.constant 0 : index
    %c160 = arith.constant 160 : index
    %291 = vector.load %arg10[%c0_98, %c160] : memref<8x256xf32, #tpu.memory_space<vmem>>, vector<8x16xf32>
    tpu.vector_store %arg10[%c0_98, %c160], %290 {strides = array<i32>} : memref<8x256xf32, #tpu.memory_space<vmem>>, vector<8x16xf32>,
    return
  }
  func.func @transform_0(%arg0: i32) -> (i32, i32) {
    %c0_i32 = arith.constant 0 : i32
    %c0_i32_0 = arith.constant 0 : i32
    return %arg0, %c0_i32 : i32, i32
  }
  func.func @transform_1(%arg0: i32) -> (i32, i32) {
    %c0_i32 = arith.constant 0 : i32
    %c0_i32_0 = arith.constant 0 : i32
    %c0_i32_1 = arith.constant 0 : i32
    return %c0_i32, %c0_i32_0 : i32, i32
  }
  func.func @transform_2(%arg0: i32) -> (i32, i32) {
    %c0_i32 = arith.constant 0 : i32
    %c0_i32_0 = arith.constant 0 : i32
    %c0_i32_1 = arith.constant 0 : i32
    return %c0_i32, %c0_i32_0 : i32, i32
  }
  func.func @transform_3(%arg0: i32) -> (i32, i32) {
    %c0_i32 = arith.constant 0 : i32
    %c0_i32_0 = arith.constant 0 : i32
    %c0_i32_1 = arith.constant 0 : i32
    return %c0_i32, %c0_i32_0 : i32, i32
  }
  func.func @transform_4(%arg0: i32) -> (i32, i32) {
    %c0_i32 = arith.constant 0 : i32
    %c0_i32_0 = arith.constant 0 : i32
    %c0_i32_1 = arith.constant 0 : i32
    return %c0_i32, %c0_i32_0 : i32, i32
  }
  func.func @transform_5(%arg0: i32) -> (i32, i32) {
    %c0_i32 = arith.constant 0 : i32
    %c0_i32_0 = arith.constant 0 : i32
    %c0_i32_1 = arith.constant 0 : i32
    return %c0_i32, %c0_i32_0 : i32, i32
  }
  func.func @transform_6(%arg0: i32) -> (i32, i32) {
    %c0_i32 = arith.constant 0 : i32
    %c0_i32_0 = arith.constant 0 : i32
    %c0_i32_1 = arith.constant 0 : i32
    return %c0_i32, %c0_i32_0 : i32, i32
  }
  func.func @transform_7(%arg0: i32) -> (i32, i32) {
    %c0_i32 = arith.constant 0 : i32
    %c0_i32_0 = arith.constant 0 : i32
    %c0_i32_1 = arith.constant 0 : i32
    return %c0_i32, %c0_i32_0 : i32, i32
  }
  func.func @transform_8(%arg0: i32) -> i32 {
    %c0_i32 = arith.constant 0 : i32
    %c0_i32_0 = arith.constant 0 : i32
    return %c0_i32 : i32
  }
  func.func @transform_9(%arg0: i32) -> (i32, i32) {
    %c0_i32 = arith.constant 0 : i32
    %c0_i32_0 = arith.constant 0 : i32
    return %arg0, %c0_i32 : i32, i32
  }
}

module attributes {stable_mosaic.version = 11 : i64} {
  func.func @_denoise_unrolled_kernel(%arg0: i32, %arg1: memref<8x16xf32, #tpu.memory_space<vmem>>, %arg2: memref<1x4xf32, #tpu.memory_space<vmem>>, %arg3: memref<16x64xbf16, #tpu.memory_space<vmem>>, %arg4: memref<1x64xf32, #tpu.memory_space<vmem>>, %arg5: memref<16x4xbf16, #tpu.memory_space<vmem>>, %arg6: memref<64x4xbf16, #tpu.memory_space<vmem>>, %arg7: memref<4x64xbf16, #tpu.memory_space<vmem>>, %arg8: memref<64x16xbf16, #tpu.memory_space<vmem>>, %arg9: memref<1xf32, #tpu.memory_space<smem>>, %arg10: memref<8x256xf32, #tpu.memory_space<vmem>>) attributes {dimension_semantics = [#tpu.dimension_semantics<parallel>], iteration_bounds = array<i64: 1>, scalar_prefetch = 0 : i64, scratch_operands = 0 : i64, tpu.core_type = #tpu.core_type<tc>, window_params = [{transform_indices = @transform_0, window_bounds = array<i64: 8, 16>}, {pipeline_mode = #tpu.pipeline_mode<synchronous>, transform_indices = @transform_1, window_bounds = array<i64: 1, 4>}, {pipeline_mode = #tpu.pipeline_mode<synchronous>, transform_indices = @transform_2, window_bounds = array<i64: 16, 64>}, {pipeline_mode = #tpu.pipeline_mode<synchronous>, transform_indices = @transform_3, window_bounds = array<i64: 1, 64>}, {pipeline_mode = #tpu.pipeline_mode<synchronous>, transform_indices = @transform_4, window_bounds = array<i64: 16, 4>}, {pipeline_mode = #tpu.pipeline_mode<synchronous>, transform_indices = @transform_5, window_bounds = array<i64: 64, 4>}, {pipeline_mode = #tpu.pipeline_mode<synchronous>, transform_indices = @transform_6, window_bounds = array<i64: 4, 64>}, {pipeline_mode = #tpu.pipeline_mode<synchronous>, transform_indices = @transform_7, window_bounds = array<i64: 64, 16>}, {transform_indices = @transform_8, window_bounds = array<i64: 1>}, {transform_indices = @transform_9, window_bounds = array<i64: 8, 256>}]} {
    %c0 = arith.constant 0 : index
    %c0_0 = arith.constant 0 : index
    %0 = vector.load %arg1[%c0, %c0_0] : memref<8x16xf32, #tpu.memory_space<vmem>>, vector<8x16xf32>
    %c0_1 = arith.constant 0 : index
    %c0_2 = arith.constant 0 : index
    %1 = vector.load %arg2[%c0_1, %c0_2] : memref<1x4xf32, #tpu.memory_space<vmem>>, vector<1x4xf32>
    %c0_3 = arith.constant 0 : index
    %c0_4 = arith.constant 0 : index
    %2 = vector.load %arg3[%c0_3, %c0_4] : memref<16x64xbf16, #tpu.memory_space<vmem>>, vector<16x64xbf16>
    %c0_5 = arith.constant 0 : index
    %c0_6 = arith.constant 0 : index
    %3 = vector.load %arg4[%c0_5, %c0_6] : memref<1x64xf32, #tpu.memory_space<vmem>>, vector<1x64xf32>
    %c0_7 = arith.constant 0 : index
    %c0_8 = arith.constant 0 : index
    %4 = vector.load %arg5[%c0_7, %c0_8] : memref<16x4xbf16, #tpu.memory_space<vmem>>, vector<16x4xbf16>
    %c0_9 = arith.constant 0 : index
    %c0_10 = arith.constant 0 : index
    %5 = vector.load %arg6[%c0_9, %c0_10] : memref<64x4xbf16, #tpu.memory_space<vmem>>, vector<64x4xbf16>
    %c0_11 = arith.constant 0 : index
    %c0_12 = arith.constant 0 : index
    %6 = vector.load %arg7[%c0_11, %c0_12] : memref<4x64xbf16, #tpu.memory_space<vmem>>, vector<4x64xbf16>
    %c0_13 = arith.constant 0 : index
    %c0_14 = arith.constant 0 : index
    %7 = vector.load %arg8[%c0_13, %c0_14] : memref<64x16xbf16, #tpu.memory_space<vmem>>, vector<64x16xbf16>
    %c0_15 = arith.constant 0 : index
    %8 = memref.load %arg9[%c0_15] : memref<1xf32, #tpu.memory_space<smem>>
    %cst = arith.constant 0.000000e+00 : f32
    %9 = vector.broadcast %cst : f32 to vector<8x80xf32>
    %c0_16 = arith.constant 0 : index
    %c176 = arith.constant 176 : index
    %10 = vector.load %arg10[%c0_16, %c176] : memref<8x256xf32, #tpu.memory_space<vmem>>, vector<8x80xf32>
    tpu.vector_store %arg10[%c0_16, %c176], %9 {strides = array<i32>} : memref<8x256xf32, #tpu.memory_space<vmem>>, vector<8x80xf32>,
    %c0_17 = arith.constant 0 : index
    %c0_18 = arith.constant 0 : index
    %11 = vector.load %arg10[%c0_17, %c0_18] : memref<8x256xf32, #tpu.memory_space<vmem>>, vector<8x16xf32>
    tpu.vector_store %arg10[%c0_17, %c0_18], %0 {strides = array<i32>} : memref<8x256xf32, #tpu.memory_space<vmem>>, vector<8x16xf32>,
    %12 = arith.truncf %0 : vector<8x16xf32> to vector<8x16xbf16>
    %cst_19 = arith.constant dense<0.000000e+00> : vector<8x64xf32>
    %13 = tpu.matmul %12, %2, %cst_19 {dimension_numbers = #tpu.dot_dimension_numbers<[1], [0], [0], [1], [0, 0, 1, 1], [], []>} : vector<8x16xbf16>, vector<16x64xbf16>, vector<8x64xf32> -> vector<8x64xf32>
    %14 = vector.broadcast %3 : vector<1x64xf32> to vector<8x64xf32>
    %15 = arith.subf %13, %14 : vector<8x64xf32>
    %16 = tpu.concatenate %0, %0, %0, %0 in 1 : vector<8x16xf32>, vector<8x16xf32>, vector<8x16xf32>, vector<8x16xf32> -> vector<8x64xf32>
    %17 = arith.mulf %16, %15 : vector<8x64xf32>
    %18 = arith.truncf %17 : vector<8x64xf32> to vector<8x64xbf16>
    %cst_20 = arith.constant dense<0.000000e+00> : vector<8x4xf32>
    %19 = tpu.matmul %18, %5, %cst_20 {dimension_numbers = #tpu.dot_dimension_numbers<[1], [0], [0], [1], [0, 0, 1, 1], [], []>} : vector<8x64xbf16>, vector<64x4xbf16>, vector<8x4xf32> -> vector<8x4xf32>
    %20 = vector.broadcast %1 : vector<1x4xf32> to vector<8x4xf32>
    %21 = arith.addf %20, %19 : vector<8x4xf32>
    %cst_21 = arith.constant dense<0.000000e+00> : vector<8x4xf32>
    %22 = tpu.matmul %12, %4, %cst_21 {dimension_numbers = #tpu.dot_dimension_numbers<[1], [0], [0], [1], [0, 0, 1, 1], [], []>} : vector<8x16xbf16>, vector<16x4xbf16>, vector<8x4xf32> -> vector<8x4xf32>
    %23 = arith.addf %21, %22 : vector<8x4xf32>
    %24 = math.exp %23 : vector<8x4xf32>
    %cst_22 = arith.constant dense<0.000000e+00> : vector<8xf32>
    %25 = vector.multi_reduction <add>, %24, %cst_22 [1] : vector<8x4xf32> to vector<8xf32>
    %26 = vector.shape_cast %25 : vector<8xf32> to vector<8x1xf32>
    %27 = vector.broadcast %26 : vector<8x1xf32> to vector<8x4xf32>
    %28 = arith.divf %24, %27 : vector<8x4xf32>
    %29 = arith.truncf %28 : vector<8x4xf32> to vector<8x4xbf16>
    %cst_23 = arith.constant dense<0.000000e+00> : vector<8x64xf32>
    %30 = tpu.matmul %29, %6, %cst_23 {dimension_numbers = #tpu.dot_dimension_numbers<[1], [0], [0], [1], [0, 0, 1, 1], [], []>} : vector<8x4xbf16>, vector<4x64xbf16>, vector<8x64xf32> -> vector<8x64xf32>
    %31 = arith.mulf %30, %15 : vector<8x64xf32>
    %32 = arith.truncf %31 : vector<8x64xf32> to vector<8x64xbf16>
    %cst_24 = arith.constant dense<0.000000e+00> : vector<8x16xf32>
    %33 = tpu.matmul %32, %7, %cst_24 {dimension_numbers = #tpu.dot_dimension_numbers<[1], [0], [0], [1], [0, 0, 1, 1], [], []>} : vector<8x64xbf16>, vector<64x16xbf16>, vector<8x16xf32> -> vector<8x16xf32>
    %cst_25 = arith.constant 0.000000e+00 : f32
    %34 = vector.broadcast %cst_25 : f32 to vector<8x16xf32>
    %35 = arith.subf %34, %33 : vector<8x16xf32>
    %36 = vector.broadcast %8 : f32 to vector<8x16xf32>
    %37 = arith.mulf %36, %35 : vector<8x16xf32>
    %38 = arith.addf %0, %37 : vector<8x16xf32>
    %c0_26 = arith.constant 0 : index
    %c16 = arith.constant 16 : index
    %39 = vector.load %arg10[%c0_26, %c16] : memref<8x256xf32, #tpu.memory_space<vmem>>, vector<8x16xf32>
    tpu.vector_store %arg10[%c0_26, %c16], %38 {strides = array<i32>} : memref<8x256xf32, #tpu.memory_space<vmem>>, vector<8x16xf32>,
    %40 = arith.truncf %38 : vector<8x16xf32> to vector<8x16xbf16>
    %cst_27 = arith.constant dense<0.000000e+00> : vector<8x64xf32>
    %41 = tpu.matmul %40, %2, %cst_27 {dimension_numbers = #tpu.dot_dimension_numbers<[1], [0], [0], [1], [0, 0, 1, 1], [], []>} : vector<8x16xbf16>, vector<16x64xbf16>, vector<8x64xf32> -> vector<8x64xf32>
    %42 = vector.broadcast %3 : vector<1x64xf32> to vector<8x64xf32>
    %43 = arith.subf %41, %42 : vector<8x64xf32>
    %44 = tpu.concatenate %38, %38, %38, %38 in 1 : vector<8x16xf32>, vector<8x16xf32>, vector<8x16xf32>, vector<8x16xf32> -> vector<8x64xf32>
    %45 = arith.mulf %44, %43 : vector<8x64xf32>
    %46 = arith.truncf %45 : vector<8x64xf32> to vector<8x64xbf16>
    %cst_28 = arith.constant dense<0.000000e+00> : vector<8x4xf32>
    %47 = tpu.matmul %46, %5, %cst_28 {dimension_numbers = #tpu.dot_dimension_numbers<[1], [0], [0], [1], [0, 0, 1, 1], [], []>} : vector<8x64xbf16>, vector<64x4xbf16>, vector<8x4xf32> -> vector<8x4xf32>
    %48 = vector.broadcast %1 : vector<1x4xf32> to vector<8x4xf32>
    %49 = arith.addf %48, %47 : vector<8x4xf32>
    %cst_29 = arith.constant dense<0.000000e+00> : vector<8x4xf32>
    %50 = tpu.matmul %40, %4, %cst_29 {dimension_numbers = #tpu.dot_dimension_numbers<[1], [0], [0], [1], [0, 0, 1, 1], [], []>} : vector<8x16xbf16>, vector<16x4xbf16>, vector<8x4xf32> -> vector<8x4xf32>
    %51 = arith.addf %49, %50 : vector<8x4xf32>
    %52 = math.exp %51 : vector<8x4xf32>
    %cst_30 = arith.constant dense<0.000000e+00> : vector<8xf32>
    %53 = vector.multi_reduction <add>, %52, %cst_30 [1] : vector<8x4xf32> to vector<8xf32>
    %54 = vector.shape_cast %53 : vector<8xf32> to vector<8x1xf32>
    %55 = vector.broadcast %54 : vector<8x1xf32> to vector<8x4xf32>
    %56 = arith.divf %52, %55 : vector<8x4xf32>
    %57 = arith.truncf %56 : vector<8x4xf32> to vector<8x4xbf16>
    %cst_31 = arith.constant dense<0.000000e+00> : vector<8x64xf32>
    %58 = tpu.matmul %57, %6, %cst_31 {dimension_numbers = #tpu.dot_dimension_numbers<[1], [0], [0], [1], [0, 0, 1, 1], [], []>} : vector<8x4xbf16>, vector<4x64xbf16>, vector<8x64xf32> -> vector<8x64xf32>
    %59 = arith.mulf %58, %43 : vector<8x64xf32>
    %60 = arith.truncf %59 : vector<8x64xf32> to vector<8x64xbf16>
    %cst_32 = arith.constant dense<0.000000e+00> : vector<8x16xf32>
    %61 = tpu.matmul %60, %7, %cst_32 {dimension_numbers = #tpu.dot_dimension_numbers<[1], [0], [0], [1], [0, 0, 1, 1], [], []>} : vector<8x64xbf16>, vector<64x16xbf16>, vector<8x16xf32> -> vector<8x16xf32>
    %cst_33 = arith.constant 0.000000e+00 : f32
    %62 = vector.broadcast %cst_33 : f32 to vector<8x16xf32>
    %63 = arith.subf %62, %61 : vector<8x16xf32>
    %64 = vector.broadcast %8 : f32 to vector<8x16xf32>
    %65 = arith.mulf %64, %63 : vector<8x16xf32>
    %66 = arith.addf %38, %65 : vector<8x16xf32>
    %c0_34 = arith.constant 0 : index
    %c32 = arith.constant 32 : index
    %67 = vector.load %arg10[%c0_34, %c32] : memref<8x256xf32, #tpu.memory_space<vmem>>, vector<8x16xf32>
    tpu.vector_store %arg10[%c0_34, %c32], %66 {strides = array<i32>} : memref<8x256xf32, #tpu.memory_space<vmem>>, vector<8x16xf32>,
    %68 = arith.truncf %66 : vector<8x16xf32> to vector<8x16xbf16>
    %cst_35 = arith.constant dense<0.000000e+00> : vector<8x64xf32>
    %69 = tpu.matmul %68, %2, %cst_35 {dimension_numbers = #tpu.dot_dimension_numbers<[1], [0], [0], [1], [0, 0, 1, 1], [], []>} : vector<8x16xbf16>, vector<16x64xbf16>, vector<8x64xf32> -> vector<8x64xf32>
    %70 = vector.broadcast %3 : vector<1x64xf32> to vector<8x64xf32>
    %71 = arith.subf %69, %70 : vector<8x64xf32>
    %72 = tpu.concatenate %66, %66, %66, %66 in 1 : vector<8x16xf32>, vector<8x16xf32>, vector<8x16xf32>, vector<8x16xf32> -> vector<8x64xf32>
    %73 = arith.mulf %72, %71 : vector<8x64xf32>
    %74 = arith.truncf %73 : vector<8x64xf32> to vector<8x64xbf16>
    %cst_36 = arith.constant dense<0.000000e+00> : vector<8x4xf32>
    %75 = tpu.matmul %74, %5, %cst_36 {dimension_numbers = #tpu.dot_dimension_numbers<[1], [0], [0], [1], [0, 0, 1, 1], [], []>} : vector<8x64xbf16>, vector<64x4xbf16>, vector<8x4xf32> -> vector<8x4xf32>
    %76 = vector.broadcast %1 : vector<1x4xf32> to vector<8x4xf32>
    %77 = arith.addf %76, %75 : vector<8x4xf32>
    %cst_37 = arith.constant dense<0.000000e+00> : vector<8x4xf32>
    %78 = tpu.matmul %68, %4, %cst_37 {dimension_numbers = #tpu.dot_dimension_numbers<[1], [0], [0], [1], [0, 0, 1, 1], [], []>} : vector<8x16xbf16>, vector<16x4xbf16>, vector<8x4xf32> -> vector<8x4xf32>
    %79 = arith.addf %77, %78 : vector<8x4xf32>
    %80 = math.exp %79 : vector<8x4xf32>
    %cst_38 = arith.constant dense<0.000000e+00> : vector<8xf32>
    %81 = vector.multi_reduction <add>, %80, %cst_38 [1] : vector<8x4xf32> to vector<8xf32>
    %82 = vector.shape_cast %81 : vector<8xf32> to vector<8x1xf32>
    %83 = vector.broadcast %82 : vector<8x1xf32> to vector<8x4xf32>
    %84 = arith.divf %80, %83 : vector<8x4xf32>
    %85 = arith.truncf %84 : vector<8x4xf32> to vector<8x4xbf16>
    %cst_39 = arith.constant dense<0.000000e+00> : vector<8x64xf32>
    %86 = tpu.matmul %85, %6, %cst_39 {dimension_numbers = #tpu.dot_dimension_numbers<[1], [0], [0], [1], [0, 0, 1, 1], [], []>} : vector<8x4xbf16>, vector<4x64xbf16>, vector<8x64xf32> -> vector<8x64xf32>
    %87 = arith.mulf %86, %71 : vector<8x64xf32>
    %88 = arith.truncf %87 : vector<8x64xf32> to vector<8x64xbf16>
    %cst_40 = arith.constant dense<0.000000e+00> : vector<8x16xf32>
    %89 = tpu.matmul %88, %7, %cst_40 {dimension_numbers = #tpu.dot_dimension_numbers<[1], [0], [0], [1], [0, 0, 1, 1], [], []>} : vector<8x64xbf16>, vector<64x16xbf16>, vector<8x16xf32> -> vector<8x16xf32>
    %cst_41 = arith.constant 0.000000e+00 : f32
    %90 = vector.broadcast %cst_41 : f32 to vector<8x16xf32>
    %91 = arith.subf %90, %89 : vector<8x16xf32>
    %92 = vector.broadcast %8 : f32 to vector<8x16xf32>
    %93 = arith.mulf %92, %91 : vector<8x16xf32>
    %94 = arith.addf %66, %93 : vector<8x16xf32>
    %c0_42 = arith.constant 0 : index
    %c48 = arith.constant 48 : index
    %95 = vector.load %arg10[%c0_42, %c48] : memref<8x256xf32, #tpu.memory_space<vmem>>, vector<8x16xf32>
    tpu.vector_store %arg10[%c0_42, %c48], %94 {strides = array<i32>} : memref<8x256xf32, #tpu.memory_space<vmem>>, vector<8x16xf32>,
    %96 = arith.truncf %94 : vector<8x16xf32> to vector<8x16xbf16>
    %cst_43 = arith.constant dense<0.000000e+00> : vector<8x64xf32>
    %97 = tpu.matmul %96, %2, %cst_43 {dimension_numbers = #tpu.dot_dimension_numbers<[1], [0], [0], [1], [0, 0, 1, 1], [], []>} : vector<8x16xbf16>, vector<16x64xbf16>, vector<8x64xf32> -> vector<8x64xf32>
    %98 = vector.broadcast %3 : vector<1x64xf32> to vector<8x64xf32>
    %99 = arith.subf %97, %98 : vector<8x64xf32>
    %100 = tpu.concatenate %94, %94, %94, %94 in 1 : vector<8x16xf32>, vector<8x16xf32>, vector<8x16xf32>, vector<8x16xf32> -> vector<8x64xf32>
    %101 = arith.mulf %100, %99 : vector<8x64xf32>
    %102 = arith.truncf %101 : vector<8x64xf32> to vector<8x64xbf16>
    %cst_44 = arith.constant dense<0.000000e+00> : vector<8x4xf32>
    %103 = tpu.matmul %102, %5, %cst_44 {dimension_numbers = #tpu.dot_dimension_numbers<[1], [0], [0], [1], [0, 0, 1, 1], [], []>} : vector<8x64xbf16>, vector<64x4xbf16>, vector<8x4xf32> -> vector<8x4xf32>
    %104 = vector.broadcast %1 : vector<1x4xf32> to vector<8x4xf32>
    %105 = arith.addf %104, %103 : vector<8x4xf32>
    %cst_45 = arith.constant dense<0.000000e+00> : vector<8x4xf32>
    %106 = tpu.matmul %96, %4, %cst_45 {dimension_numbers = #tpu.dot_dimension_numbers<[1], [0], [0], [1], [0, 0, 1, 1], [], []>} : vector<8x16xbf16>, vector<16x4xbf16>, vector<8x4xf32> -> vector<8x4xf32>
    %107 = arith.addf %105, %106 : vector<8x4xf32>
    %108 = math.exp %107 : vector<8x4xf32>
    %cst_46 = arith.constant dense<0.000000e+00> : vector<8xf32>
    %109 = vector.multi_reduction <add>, %108, %cst_46 [1] : vector<8x4xf32> to vector<8xf32>
    %110 = vector.shape_cast %109 : vector<8xf32> to vector<8x1xf32>
    %111 = vector.broadcast %110 : vector<8x1xf32> to vector<8x4xf32>
    %112 = arith.divf %108, %111 : vector<8x4xf32>
    %113 = arith.truncf %112 : vector<8x4xf32> to vector<8x4xbf16>
    %cst_47 = arith.constant dense<0.000000e+00> : vector<8x64xf32>
    %114 = tpu.matmul %113, %6, %cst_47 {dimension_numbers = #tpu.dot_dimension_numbers<[1], [0], [0], [1], [0, 0, 1, 1], [], []>} : vector<8x4xbf16>, vector<4x64xbf16>, vector<8x64xf32> -> vector<8x64xf32>
    %115 = arith.mulf %114, %99 : vector<8x64xf32>
    %116 = arith.truncf %115 : vector<8x64xf32> to vector<8x64xbf16>
    %cst_48 = arith.constant dense<0.000000e+00> : vector<8x16xf32>
    %117 = tpu.matmul %116, %7, %cst_48 {dimension_numbers = #tpu.dot_dimension_numbers<[1], [0], [0], [1], [0, 0, 1, 1], [], []>} : vector<8x64xbf16>, vector<64x16xbf16>, vector<8x16xf32> -> vector<8x16xf32>
    %cst_49 = arith.constant 0.000000e+00 : f32
    %118 = vector.broadcast %cst_49 : f32 to vector<8x16xf32>
    %119 = arith.subf %118, %117 : vector<8x16xf32>
    %120 = vector.broadcast %8 : f32 to vector<8x16xf32>
    %121 = arith.mulf %120, %119 : vector<8x16xf32>
    %122 = arith.addf %94, %121 : vector<8x16xf32>
    %c0_50 = arith.constant 0 : index
    %c64 = arith.constant 64 : index
    %123 = vector.load %arg10[%c0_50, %c64] : memref<8x256xf32, #tpu.memory_space<vmem>>, vector<8x16xf32>
    tpu.vector_store %arg10[%c0_50, %c64], %122 {strides = array<i32>} : memref<8x256xf32, #tpu.memory_space<vmem>>, vector<8x16xf32>,
    %124 = arith.truncf %122 : vector<8x16xf32> to vector<8x16xbf16>
    %cst_51 = arith.constant dense<0.000000e+00> : vector<8x64xf32>
    %125 = tpu.matmul %124, %2, %cst_51 {dimension_numbers = #tpu.dot_dimension_numbers<[1], [0], [0], [1], [0, 0, 1, 1], [], []>} : vector<8x16xbf16>, vector<16x64xbf16>, vector<8x64xf32> -> vector<8x64xf32>
    %126 = vector.broadcast %3 : vector<1x64xf32> to vector<8x64xf32>
    %127 = arith.subf %125, %126 : vector<8x64xf32>
    %128 = tpu.concatenate %122, %122, %122, %122 in 1 : vector<8x16xf32>, vector<8x16xf32>, vector<8x16xf32>, vector<8x16xf32> -> vector<8x64xf32>
    %129 = arith.mulf %128, %127 : vector<8x64xf32>
    %130 = arith.truncf %129 : vector<8x64xf32> to vector<8x64xbf16>
    %cst_52 = arith.constant dense<0.000000e+00> : vector<8x4xf32>
    %131 = tpu.matmul %130, %5, %cst_52 {dimension_numbers = #tpu.dot_dimension_numbers<[1], [0], [0], [1], [0, 0, 1, 1], [], []>} : vector<8x64xbf16>, vector<64x4xbf16>, vector<8x4xf32> -> vector<8x4xf32>
    %132 = vector.broadcast %1 : vector<1x4xf32> to vector<8x4xf32>
    %133 = arith.addf %132, %131 : vector<8x4xf32>
    %cst_53 = arith.constant dense<0.000000e+00> : vector<8x4xf32>
    %134 = tpu.matmul %124, %4, %cst_53 {dimension_numbers = #tpu.dot_dimension_numbers<[1], [0], [0], [1], [0, 0, 1, 1], [], []>} : vector<8x16xbf16>, vector<16x4xbf16>, vector<8x4xf32> -> vector<8x4xf32>
    %135 = arith.addf %133, %134 : vector<8x4xf32>
    %136 = math.exp %135 : vector<8x4xf32>
    %cst_54 = arith.constant dense<0.000000e+00> : vector<8xf32>
    %137 = vector.multi_reduction <add>, %136, %cst_54 [1] : vector<8x4xf32> to vector<8xf32>
    %138 = vector.shape_cast %137 : vector<8xf32> to vector<8x1xf32>
    %139 = vector.broadcast %138 : vector<8x1xf32> to vector<8x4xf32>
    %140 = arith.divf %136, %139 : vector<8x4xf32>
    %141 = arith.truncf %140 : vector<8x4xf32> to vector<8x4xbf16>
    %cst_55 = arith.constant dense<0.000000e+00> : vector<8x64xf32>
    %142 = tpu.matmul %141, %6, %cst_55 {dimension_numbers = #tpu.dot_dimension_numbers<[1], [0], [0], [1], [0, 0, 1, 1], [], []>} : vector<8x4xbf16>, vector<4x64xbf16>, vector<8x64xf32> -> vector<8x64xf32>
    %143 = arith.mulf %142, %127 : vector<8x64xf32>
    %144 = arith.truncf %143 : vector<8x64xf32> to vector<8x64xbf16>
    %cst_56 = arith.constant dense<0.000000e+00> : vector<8x16xf32>
    %145 = tpu.matmul %144, %7, %cst_56 {dimension_numbers = #tpu.dot_dimension_numbers<[1], [0], [0], [1], [0, 0, 1, 1], [], []>} : vector<8x64xbf16>, vector<64x16xbf16>, vector<8x16xf32> -> vector<8x16xf32>
    %cst_57 = arith.constant 0.000000e+00 : f32
    %146 = vector.broadcast %cst_57 : f32 to vector<8x16xf32>
    %147 = arith.subf %146, %145 : vector<8x16xf32>
    %148 = vector.broadcast %8 : f32 to vector<8x16xf32>
    %149 = arith.mulf %148, %147 : vector<8x16xf32>
    %150 = arith.addf %122, %149 : vector<8x16xf32>
    %c0_58 = arith.constant 0 : index
    %c80 = arith.constant 80 : index
    %151 = vector.load %arg10[%c0_58, %c80] : memref<8x256xf32, #tpu.memory_space<vmem>>, vector<8x16xf32>
    tpu.vector_store %arg10[%c0_58, %c80], %150 {strides = array<i32>} : memref<8x256xf32, #tpu.memory_space<vmem>>, vector<8x16xf32>,
    %152 = arith.truncf %150 : vector<8x16xf32> to vector<8x16xbf16>
    %cst_59 = arith.constant dense<0.000000e+00> : vector<8x64xf32>
    %153 = tpu.matmul %152, %2, %cst_59 {dimension_numbers = #tpu.dot_dimension_numbers<[1], [0], [0], [1], [0, 0, 1, 1], [], []>} : vector<8x16xbf16>, vector<16x64xbf16>, vector<8x64xf32> -> vector<8x64xf32>
    %154 = vector.broadcast %3 : vector<1x64xf32> to vector<8x64xf32>
    %155 = arith.subf %153, %154 : vector<8x64xf32>
    %156 = tpu.concatenate %150, %150, %150, %150 in 1 : vector<8x16xf32>, vector<8x16xf32>, vector<8x16xf32>, vector<8x16xf32> -> vector<8x64xf32>
    %157 = arith.mulf %156, %155 : vector<8x64xf32>
    %158 = arith.truncf %157 : vector<8x64xf32> to vector<8x64xbf16>
    %cst_60 = arith.constant dense<0.000000e+00> : vector<8x4xf32>
    %159 = tpu.matmul %158, %5, %cst_60 {dimension_numbers = #tpu.dot_dimension_numbers<[1], [0], [0], [1], [0, 0, 1, 1], [], []>} : vector<8x64xbf16>, vector<64x4xbf16>, vector<8x4xf32> -> vector<8x4xf32>
    %160 = vector.broadcast %1 : vector<1x4xf32> to vector<8x4xf32>
    %161 = arith.addf %160, %159 : vector<8x4xf32>
    %cst_61 = arith.constant dense<0.000000e+00> : vector<8x4xf32>
    %162 = tpu.matmul %152, %4, %cst_61 {dimension_numbers = #tpu.dot_dimension_numbers<[1], [0], [0], [1], [0, 0, 1, 1], [], []>} : vector<8x16xbf16>, vector<16x4xbf16>, vector<8x4xf32> -> vector<8x4xf32>
    %163 = arith.addf %161, %162 : vector<8x4xf32>
    %164 = math.exp %163 : vector<8x4xf32>
    %cst_62 = arith.constant dense<0.000000e+00> : vector<8xf32>
    %165 = vector.multi_reduction <add>, %164, %cst_62 [1] : vector<8x4xf32> to vector<8xf32>
    %166 = vector.shape_cast %165 : vector<8xf32> to vector<8x1xf32>
    %167 = vector.broadcast %166 : vector<8x1xf32> to vector<8x4xf32>
    %168 = arith.divf %164, %167 : vector<8x4xf32>
    %169 = arith.truncf %168 : vector<8x4xf32> to vector<8x4xbf16>
    %cst_63 = arith.constant dense<0.000000e+00> : vector<8x64xf32>
    %170 = tpu.matmul %169, %6, %cst_63 {dimension_numbers = #tpu.dot_dimension_numbers<[1], [0], [0], [1], [0, 0, 1, 1], [], []>} : vector<8x4xbf16>, vector<4x64xbf16>, vector<8x64xf32> -> vector<8x64xf32>
    %171 = arith.mulf %170, %155 : vector<8x64xf32>
    %172 = arith.truncf %171 : vector<8x64xf32> to vector<8x64xbf16>
    %cst_64 = arith.constant dense<0.000000e+00> : vector<8x16xf32>
    %173 = tpu.matmul %172, %7, %cst_64 {dimension_numbers = #tpu.dot_dimension_numbers<[1], [0], [0], [1], [0, 0, 1, 1], [], []>} : vector<8x64xbf16>, vector<64x16xbf16>, vector<8x16xf32> -> vector<8x16xf32>
    %cst_65 = arith.constant 0.000000e+00 : f32
    %174 = vector.broadcast %cst_65 : f32 to vector<8x16xf32>
    %175 = arith.subf %174, %173 : vector<8x16xf32>
    %176 = vector.broadcast %8 : f32 to vector<8x16xf32>
    %177 = arith.mulf %176, %175 : vector<8x16xf32>
    %178 = arith.addf %150, %177 : vector<8x16xf32>
    %c0_66 = arith.constant 0 : index
    %c96 = arith.constant 96 : index
    %179 = vector.load %arg10[%c0_66, %c96] : memref<8x256xf32, #tpu.memory_space<vmem>>, vector<8x16xf32>
    tpu.vector_store %arg10[%c0_66, %c96], %178 {strides = array<i32>} : memref<8x256xf32, #tpu.memory_space<vmem>>, vector<8x16xf32>,
    %180 = arith.truncf %178 : vector<8x16xf32> to vector<8x16xbf16>
    %cst_67 = arith.constant dense<0.000000e+00> : vector<8x64xf32>
    %181 = tpu.matmul %180, %2, %cst_67 {dimension_numbers = #tpu.dot_dimension_numbers<[1], [0], [0], [1], [0, 0, 1, 1], [], []>} : vector<8x16xbf16>, vector<16x64xbf16>, vector<8x64xf32> -> vector<8x64xf32>
    %182 = vector.broadcast %3 : vector<1x64xf32> to vector<8x64xf32>
    %183 = arith.subf %181, %182 : vector<8x64xf32>
    %184 = tpu.concatenate %178, %178, %178, %178 in 1 : vector<8x16xf32>, vector<8x16xf32>, vector<8x16xf32>, vector<8x16xf32> -> vector<8x64xf32>
    %185 = arith.mulf %184, %183 : vector<8x64xf32>
    %186 = arith.truncf %185 : vector<8x64xf32> to vector<8x64xbf16>
    %cst_68 = arith.constant dense<0.000000e+00> : vector<8x4xf32>
    %187 = tpu.matmul %186, %5, %cst_68 {dimension_numbers = #tpu.dot_dimension_numbers<[1], [0], [0], [1], [0, 0, 1, 1], [], []>} : vector<8x64xbf16>, vector<64x4xbf16>, vector<8x4xf32> -> vector<8x4xf32>
    %188 = vector.broadcast %1 : vector<1x4xf32> to vector<8x4xf32>
    %189 = arith.addf %188, %187 : vector<8x4xf32>
    %cst_69 = arith.constant dense<0.000000e+00> : vector<8x4xf32>
    %190 = tpu.matmul %180, %4, %cst_69 {dimension_numbers = #tpu.dot_dimension_numbers<[1], [0], [0], [1], [0, 0, 1, 1], [], []>} : vector<8x16xbf16>, vector<16x4xbf16>, vector<8x4xf32> -> vector<8x4xf32>
    %191 = arith.addf %189, %190 : vector<8x4xf32>
    %192 = math.exp %191 : vector<8x4xf32>
    %cst_70 = arith.constant dense<0.000000e+00> : vector<8xf32>
    %193 = vector.multi_reduction <add>, %192, %cst_70 [1] : vector<8x4xf32> to vector<8xf32>
    %194 = vector.shape_cast %193 : vector<8xf32> to vector<8x1xf32>
    %195 = vector.broadcast %194 : vector<8x1xf32> to vector<8x4xf32>
    %196 = arith.divf %192, %195 : vector<8x4xf32>
    %197 = arith.truncf %196 : vector<8x4xf32> to vector<8x4xbf16>
    %cst_71 = arith.constant dense<0.000000e+00> : vector<8x64xf32>
    %198 = tpu.matmul %197, %6, %cst_71 {dimension_numbers = #tpu.dot_dimension_numbers<[1], [0], [0], [1], [0, 0, 1, 1], [], []>} : vector<8x4xbf16>, vector<4x64xbf16>, vector<8x64xf32> -> vector<8x64xf32>
    %199 = arith.mulf %198, %183 : vector<8x64xf32>
    %200 = arith.truncf %199 : vector<8x64xf32> to vector<8x64xbf16>
    %cst_72 = arith.constant dense<0.000000e+00> : vector<8x16xf32>
    %201 = tpu.matmul %200, %7, %cst_72 {dimension_numbers = #tpu.dot_dimension_numbers<[1], [0], [0], [1], [0, 0, 1, 1], [], []>} : vector<8x64xbf16>, vector<64x16xbf16>, vector<8x16xf32> -> vector<8x16xf32>
    %cst_73 = arith.constant 0.000000e+00 : f32
    %202 = vector.broadcast %cst_73 : f32 to vector<8x16xf32>
    %203 = arith.subf %202, %201 : vector<8x16xf32>
    %204 = vector.broadcast %8 : f32 to vector<8x16xf32>
    %205 = arith.mulf %204, %203 : vector<8x16xf32>
    %206 = arith.addf %178, %205 : vector<8x16xf32>
    %c0_74 = arith.constant 0 : index
    %c112 = arith.constant 112 : index
    %207 = vector.load %arg10[%c0_74, %c112] : memref<8x256xf32, #tpu.memory_space<vmem>>, vector<8x16xf32>
    tpu.vector_store %arg10[%c0_74, %c112], %206 {strides = array<i32>} : memref<8x256xf32, #tpu.memory_space<vmem>>, vector<8x16xf32>,
    %208 = arith.truncf %206 : vector<8x16xf32> to vector<8x16xbf16>
    %cst_75 = arith.constant dense<0.000000e+00> : vector<8x64xf32>
    %209 = tpu.matmul %208, %2, %cst_75 {dimension_numbers = #tpu.dot_dimension_numbers<[1], [0], [0], [1], [0, 0, 1, 1], [], []>} : vector<8x16xbf16>, vector<16x64xbf16>, vector<8x64xf32> -> vector<8x64xf32>
    %210 = vector.broadcast %3 : vector<1x64xf32> to vector<8x64xf32>
    %211 = arith.subf %209, %210 : vector<8x64xf32>
    %212 = tpu.concatenate %206, %206, %206, %206 in 1 : vector<8x16xf32>, vector<8x16xf32>, vector<8x16xf32>, vector<8x16xf32> -> vector<8x64xf32>
    %213 = arith.mulf %212, %211 : vector<8x64xf32>
    %214 = arith.truncf %213 : vector<8x64xf32> to vector<8x64xbf16>
    %cst_76 = arith.constant dense<0.000000e+00> : vector<8x4xf32>
    %215 = tpu.matmul %214, %5, %cst_76 {dimension_numbers = #tpu.dot_dimension_numbers<[1], [0], [0], [1], [0, 0, 1, 1], [], []>} : vector<8x64xbf16>, vector<64x4xbf16>, vector<8x4xf32> -> vector<8x4xf32>
    %216 = vector.broadcast %1 : vector<1x4xf32> to vector<8x4xf32>
    %217 = arith.addf %216, %215 : vector<8x4xf32>
    %cst_77 = arith.constant dense<0.000000e+00> : vector<8x4xf32>
    %218 = tpu.matmul %208, %4, %cst_77 {dimension_numbers = #tpu.dot_dimension_numbers<[1], [0], [0], [1], [0, 0, 1, 1], [], []>} : vector<8x16xbf16>, vector<16x4xbf16>, vector<8x4xf32> -> vector<8x4xf32>
    %219 = arith.addf %217, %218 : vector<8x4xf32>
    %220 = math.exp %219 : vector<8x4xf32>
    %cst_78 = arith.constant dense<0.000000e+00> : vector<8xf32>
    %221 = vector.multi_reduction <add>, %220, %cst_78 [1] : vector<8x4xf32> to vector<8xf32>
    %222 = vector.shape_cast %221 : vector<8xf32> to vector<8x1xf32>
    %223 = vector.broadcast %222 : vector<8x1xf32> to vector<8x4xf32>
    %224 = arith.divf %220, %223 : vector<8x4xf32>
    %225 = arith.truncf %224 : vector<8x4xf32> to vector<8x4xbf16>
    %cst_79 = arith.constant dense<0.000000e+00> : vector<8x64xf32>
    %226 = tpu.matmul %225, %6, %cst_79 {dimension_numbers = #tpu.dot_dimension_numbers<[1], [0], [0], [1], [0, 0, 1, 1], [], []>} : vector<8x4xbf16>, vector<4x64xbf16>, vector<8x64xf32> -> vector<8x64xf32>
    %227 = arith.mulf %226, %211 : vector<8x64xf32>
    %228 = arith.truncf %227 : vector<8x64xf32> to vector<8x64xbf16>
    %cst_80 = arith.constant dense<0.000000e+00> : vector<8x16xf32>
    %229 = tpu.matmul %228, %7, %cst_80 {dimension_numbers = #tpu.dot_dimension_numbers<[1], [0], [0], [1], [0, 0, 1, 1], [], []>} : vector<8x64xbf16>, vector<64x16xbf16>, vector<8x16xf32> -> vector<8x16xf32>
    %cst_81 = arith.constant 0.000000e+00 : f32
    %230 = vector.broadcast %cst_81 : f32 to vector<8x16xf32>
    %231 = arith.subf %230, %229 : vector<8x16xf32>
    %232 = vector.broadcast %8 : f32 to vector<8x16xf32>
    %233 = arith.mulf %232, %231 : vector<8x16xf32>
    %234 = arith.addf %206, %233 : vector<8x16xf32>
    %c0_82 = arith.constant 0 : index
    %c128 = arith.constant 128 : index
    %235 = vector.load %arg10[%c0_82, %c128] : memref<8x256xf32, #tpu.memory_space<vmem>>, vector<8x16xf32>
    tpu.vector_store %arg10[%c0_82, %c128], %234 {strides = array<i32>} : memref<8x256xf32, #tpu.memory_space<vmem>>, vector<8x16xf32>,
    %236 = arith.truncf %234 : vector<8x16xf32> to vector<8x16xbf16>
    %cst_83 = arith.constant dense<0.000000e+00> : vector<8x64xf32>
    %237 = tpu.matmul %236, %2, %cst_83 {dimension_numbers = #tpu.dot_dimension_numbers<[1], [0], [0], [1], [0, 0, 1, 1], [], []>} : vector<8x16xbf16>, vector<16x64xbf16>, vector<8x64xf32> -> vector<8x64xf32>
    %238 = vector.broadcast %3 : vector<1x64xf32> to vector<8x64xf32>
    %239 = arith.subf %237, %238 : vector<8x64xf32>
    %240 = tpu.concatenate %234, %234, %234, %234 in 1 : vector<8x16xf32>, vector<8x16xf32>, vector<8x16xf32>, vector<8x16xf32> -> vector<8x64xf32>
    %241 = arith.mulf %240, %239 : vector<8x64xf32>
    %242 = arith.truncf %241 : vector<8x64xf32> to vector<8x64xbf16>
    %cst_84 = arith.constant dense<0.000000e+00> : vector<8x4xf32>
    %243 = tpu.matmul %242, %5, %cst_84 {dimension_numbers = #tpu.dot_dimension_numbers<[1], [0], [0], [1], [0, 0, 1, 1], [], []>} : vector<8x64xbf16>, vector<64x4xbf16>, vector<8x4xf32> -> vector<8x4xf32>
    %244 = vector.broadcast %1 : vector<1x4xf32> to vector<8x4xf32>
    %245 = arith.addf %244, %243 : vector<8x4xf32>
    %cst_85 = arith.constant dense<0.000000e+00> : vector<8x4xf32>
    %246 = tpu.matmul %236, %4, %cst_85 {dimension_numbers = #tpu.dot_dimension_numbers<[1], [0], [0], [1], [0, 0, 1, 1], [], []>} : vector<8x16xbf16>, vector<16x4xbf16>, vector<8x4xf32> -> vector<8x4xf32>
    %247 = arith.addf %245, %246 : vector<8x4xf32>
    %248 = math.exp %247 : vector<8x4xf32>
    %cst_86 = arith.constant dense<0.000000e+00> : vector<8xf32>
    %249 = vector.multi_reduction <add>, %248, %cst_86 [1] : vector<8x4xf32> to vector<8xf32>
    %250 = vector.shape_cast %249 : vector<8xf32> to vector<8x1xf32>
    %251 = vector.broadcast %250 : vector<8x1xf32> to vector<8x4xf32>
    %252 = arith.divf %248, %251 : vector<8x4xf32>
    %253 = arith.truncf %252 : vector<8x4xf32> to vector<8x4xbf16>
    %cst_87 = arith.constant dense<0.000000e+00> : vector<8x64xf32>
    %254 = tpu.matmul %253, %6, %cst_87 {dimension_numbers = #tpu.dot_dimension_numbers<[1], [0], [0], [1], [0, 0, 1, 1], [], []>} : vector<8x4xbf16>, vector<4x64xbf16>, vector<8x64xf32> -> vector<8x64xf32>
    %255 = arith.mulf %254, %239 : vector<8x64xf32>
    %256 = arith.truncf %255 : vector<8x64xf32> to vector<8x64xbf16>
    %cst_88 = arith.constant dense<0.000000e+00> : vector<8x16xf32>
    %257 = tpu.matmul %256, %7, %cst_88 {dimension_numbers = #tpu.dot_dimension_numbers<[1], [0], [0], [1], [0, 0, 1, 1], [], []>} : vector<8x64xbf16>, vector<64x16xbf16>, vector<8x16xf32> -> vector<8x16xf32>
    %cst_89 = arith.constant 0.000000e+00 : f32
    %258 = vector.broadcast %cst_89 : f32 to vector<8x16xf32>
    %259 = arith.subf %258, %257 : vector<8x16xf32>
    %260 = vector.broadcast %8 : f32 to vector<8x16xf32>
    %261 = arith.mulf %260, %259 : vector<8x16xf32>
    %262 = arith.addf %234, %261 : vector<8x16xf32>
    %c0_90 = arith.constant 0 : index
    %c144 = arith.constant 144 : index
    %263 = vector.load %arg10[%c0_90, %c144] : memref<8x256xf32, #tpu.memory_space<vmem>>, vector<8x16xf32>
    tpu.vector_store %arg10[%c0_90, %c144], %262 {strides = array<i32>} : memref<8x256xf32, #tpu.memory_space<vmem>>, vector<8x16xf32>,
    %264 = arith.truncf %262 : vector<8x16xf32> to vector<8x16xbf16>
    %cst_91 = arith.constant dense<0.000000e+00> : vector<8x64xf32>
    %265 = tpu.matmul %264, %2, %cst_91 {dimension_numbers = #tpu.dot_dimension_numbers<[1], [0], [0], [1], [0, 0, 1, 1], [], []>} : vector<8x16xbf16>, vector<16x64xbf16>, vector<8x64xf32> -> vector<8x64xf32>
    %266 = vector.broadcast %3 : vector<1x64xf32> to vector<8x64xf32>
    %267 = arith.subf %265, %266 : vector<8x64xf32>
    %268 = tpu.concatenate %262, %262, %262, %262 in 1 : vector<8x16xf32>, vector<8x16xf32>, vector<8x16xf32>, vector<8x16xf32> -> vector<8x64xf32>
    %269 = arith.mulf %268, %267 : vector<8x64xf32>
    %270 = arith.truncf %269 : vector<8x64xf32> to vector<8x64xbf16>
    %cst_92 = arith.constant dense<0.000000e+00> : vector<8x4xf32>
    %271 = tpu.matmul %270, %5, %cst_92 {dimension_numbers = #tpu.dot_dimension_numbers<[1], [0], [0], [1], [0, 0, 1, 1], [], []>} : vector<8x64xbf16>, vector<64x4xbf16>, vector<8x4xf32> -> vector<8x4xf32>
    %272 = vector.broadcast %1 : vector<1x4xf32> to vector<8x4xf32>
    %273 = arith.addf %272, %271 : vector<8x4xf32>
    %cst_93 = arith.constant dense<0.000000e+00> : vector<8x4xf32>
    %274 = tpu.matmul %264, %4, %cst_93 {dimension_numbers = #tpu.dot_dimension_numbers<[1], [0], [0], [1], [0, 0, 1, 1], [], []>} : vector<8x16xbf16>, vector<16x4xbf16>, vector<8x4xf32> -> vector<8x4xf32>
    %275 = arith.addf %273, %274 : vector<8x4xf32>
    %276 = math.exp %275 : vector<8x4xf32>
    %cst_94 = arith.constant dense<0.000000e+00> : vector<8xf32>
    %277 = vector.multi_reduction <add>, %276, %cst_94 [1] : vector<8x4xf32> to vector<8xf32>
    %278 = vector.shape_cast %277 : vector<8xf32> to vector<8x1xf32>
    %279 = vector.broadcast %278 : vector<8x1xf32> to vector<8x4xf32>
    %280 = arith.divf %276, %279 : vector<8x4xf32>
    %281 = arith.truncf %280 : vector<8x4xf32> to vector<8x4xbf16>
    %cst_95 = arith.constant dense<0.000000e+00> : vector<8x64xf32>
    %282 = tpu.matmul %281, %6, %cst_95 {dimension_numbers = #tpu.dot_dimension_numbers<[1], [0], [0], [1], [0, 0, 1, 1], [], []>} : vector<8x4xbf16>, vector<4x64xbf16>, vector<8x64xf32> -> vector<8x64xf32>
    %283 = arith.mulf %282, %267 : vector<8x64xf32>
    %284 = arith.truncf %283 : vector<8x64xf32> to vector<8x64xbf16>
    %cst_96 = arith.constant dense<0.000000e+00> : vector<8x16xf32>
    %285 = tpu.matmul %284, %7, %cst_96 {dimension_numbers = #tpu.dot_dimension_numbers<[1], [0], [0], [1], [0, 0, 1, 1], [], []>} : vector<8x64xbf16>, vector<64x16xbf16>, vector<8x16xf32> -> vector<8x16xf32>
    %cst_97 = arith.constant 0.000000e+00 : f32
    %286 = vector.broadcast %cst_97 : f32 to vector<8x16xf32>
    %287 = arith.subf %286, %285 : vector<8x16xf32>
    %288 = vector.broadcast %8 : f32 to vector<8x16xf32>
    %289 = arith.mulf %288, %287 : vector<8x16xf32>
    %290 = arith.addf %262, %289 : vector<8x16xf32>
    %c0_98 = arith.constant 0 : index
    %c160 = arith.constant 160 : index
    %291 = vector.load %arg10[%c0_98, %c160] : memref<8x256xf32, #tpu.memory_space<vmem>>, vector<8x16xf32>
    tpu.vector_store %arg10[%c0_98, %c160], %290 {strides = array<i32>} : memref<8x256xf32, #tpu.memory_space<vmem>>, vector<8x16xf32>,
    return
  }
  func.func @transform_0(%arg0: i32) -> (i32, i32) {
    %c0_i32 = arith.constant 0 : i32
    %c0_i32_0 = arith.constant 0 : i32
    return %arg0, %c0_i32 : i32, i32
  }
  func.func @transform_1(%arg0: i32) -> (i32, i32) {
    %c0_i32 = arith.constant 0 : i32
    %c0_i32_0 = arith.constant 0 : i32
    %c0_i32_1 = arith.constant 0 : i32
    return %c0_i32, %c0_i32_0 : i32, i32
  }
  func.func @transform_2(%arg0: i32) -> (i32, i32) {
    %c0_i32 = arith.constant 0 : i32
    %c0_i32_0 = arith.constant 0 : i32
    %c0_i32_1 = arith.constant 0 : i32
    return %c0_i32, %c0_i32_0 : i32, i32
  }
  func.func @transform_3(%arg0: i32) -> (i32, i32) {
    %c0_i32 = arith.constant 0 : i32
    %c0_i32_0 = arith.constant 0 : i32
    %c0_i32_1 = arith.constant 0 : i32
    return %c0_i32, %c0_i32_0 : i32, i32
  }
  func.func @transform_4(%arg0: i32) -> (i32, i32) {
    %c0_i32 = arith.constant 0 : i32
    %c0_i32_0 = arith.constant 0 : i32
    %c0_i32_1 = arith.constant 0 : i32
    return %c0_i32, %c0_i32_0 : i32, i32
  }
  func.func @transform_5(%arg0: i32) -> (i32, i32) {
    %c0_i32 = arith.constant 0 : i32
    %c0_i32_0 = arith.constant 0 : i32
    %c0_i32_1 = arith.constant 0 : i32
    return %c0_i32, %c0_i32_0 : i32, i32
  }
  func.func @transform_6(%arg0: i32) -> (i32, i32) {
    %c0_i32 = arith.constant 0 : i32
    %c0_i32_0 = arith.constant 0 : i32
    %c0_i32_1 = arith.constant 0 : i32
    return %c0_i32, %c0_i32_0 : i32, i32
  }
  func.func @transform_7(%arg0: i32) -> (i32, i32) {
    %c0_i32 = arith.constant 0 : i32
    %c0_i32_0 = arith.constant 0 : i32
    %c0_i32_1 = arith.constant 0 : i32
    return %c0_i32, %c0_i32_0 : i32, i32
  }
  func.func @transform_8(%arg0: i32) -> i32 {
    %c0_i32 = arith.constant 0 : i32
    %c0_i32_0 = arith.constant 0 : i32
    return %c0_i32 : i32
  }
  func.func @transform_9(%arg0: i32) -> (i32, i32) {
    %c0_i32 = arith.constant 0 : i32
    %c0_i32_0 = arith.constant 0 : i32
    return %arg0, %c0_i32 : i32, i32
  }
}

</mosaic_0001>

<bundles_post_ra>
// kernel: tpu_custom_call.1
= control target key start
LH: loop header
LB: loop body
LE: loop exit
PB: predicated region body
PF: predicated region fallthrough
CT: control target
= control target key end

     0   :  { %15 = vsyncpa [#allocation4], 0  ;;  %s4554_s0 = inlined_call_operand.hbm [shape: f32[8,16], index: 0, kind: input, shape index: {}]   ;;  %s4555_s1 = inlined_call_operand.hbm [shape: f32[1,4], index: 1, kind: input, shape index: {}]   ;;  %s4556_s2 = inlined_call_operand.hbm [shape: bf16[16,64], index: 2, kind: input, shape index: {}]   ;;  %s4557_s3 = inlined_call_operand.hbm [shape: f32[1,64], index: 3, kind: input, shape index: {}]   ;;  %s4558_s4 = inlined_call_operand.hbm [shape: bf16[16,4], index: 4, kind: input, shape index: {}]   ;;  %s4559_s5 = inlined_call_operand.hbm [shape: bf16[64,4], index: 5, kind: input, shape index: {}]   ;;  %s4560_s6 = inlined_call_operand.hbm [shape: bf16[4,64], index: 6, kind: input, shape index: {}]   ;;  %s4561_s7 = inlined_call_operand.hbm [shape: bf16[64,16], index: 7, kind: input, shape index: {}]   ;;  %s4562_s8 = inlined_call_operand.<no memory space> [shape: f32[1], index: 8, kind: input, shape index: {}]   ;;  %s4563_s9 = inlined_call_operand.hbm [shape: f32[8,256], index: 9, kind: output, shape index: {}]  }
   0x1   :  { %16 = vsyncpa [#allocation7], 0 }
   0x2   :  { %17 = vsyncpa [#allocation10], 0 }
   0x3   :  { %18 = vsyncpa [#allocation13], 0 }
   0x4   :  { %19 = vsyncpa [#allocation16], 0 }
   0x5   :  { %20 = vsyncpa [#allocation5], 0  ;;  %s3721_s30 = smov [#allocation6]   ;;  %s3722_s11 = smov [#allocation9]  }
   0x6   :  { %s37_s10 = sshll.u32 %s3721_s30, 4  ;;  %s59_s12 = sshll.u32 %s3722_s11, 4  ;;  %s38_s10 = int_to_ptr.vmem [resolvable:$true] %s37_s10  ;;  %s60_s12 = int_to_ptr.vmem [resolvable:$true] %s59_s12 }
   0x7   :  { %s3511_s15 = scalar_lea.hbm %s4555_s1, 16 }
   0x8   :  { %p3512_p0 = scmp.ne.s32.totalorder %s4555_s1, %s3511_s15  ;;  %p3515_p1 = scmp.lt.u32.totalorder %s3511_s15, %s4555_s1 }
   0xa   :  { %p3517_p2 = pnand %p3515_p1, %p3512_p0 }
   0xc   :  { %3520 = shalt.err (!%p3517_p2)
}
   0xd   :  { %s3521_s20 = scalar_lea.vmem %s38_s10, 16  ;;  %s3525_s21 = scalar_lea.vmem %s38_s10, 32 }
   0xe   :  { %p3522_p3 = scmp.ne.s32.totalorder %s38_s10, %s3521_s20  ;;  %p3526_p4 = scmp.lt.s32.totalorder %s38_s10, %s38_s10 }
   0xf   :  { %p3527_p5 = scmp.lt.s32.totalorder %s3525_s21, %s3521_s20 }
  0x11   :  { %p3528_p6 = por %p3527_p5, %p3526_p4 }
  0x13   :  { %p3529_p7 = pnand %p3528_p6, %p3522_p3 }
  0x15   :  { %3532 = shalt.err (!%p3529_p7)
}
  0x16   :  { %40 = dma.hbm_to_vmem [thread:$0]  %s4555_s1, 16, %s38_s10, [#allocation7]  }
  0x17   :  { %s3533_s26 = scalar_lea.hbm %s4557_s3, 16 }
  0x18   :  { %p3534_p8 = scmp.ne.s32.totalorder %s4557_s3, %s3533_s26  ;;  %p3537_p9 = scmp.lt.u32.totalorder %s3533_s26, %s4557_s3 }
  0x1a   :  { %p3539_p10 = pnand %p3537_p9, %p3534_p8 }
  0x1c   :  { %3542 = shalt.err (!%p3539_p10)
}
  0x1d   :  { %s3543_s11 = scalar_lea.vmem %s60_s12, 16  ;;  %s3547_s13 = scalar_lea.vmem %s60_s12, 32 }
  0x1e   :  { %p3544_p11 = scmp.ne.s32.totalorder %s60_s12, %s3543_s11  ;;  %p3548_p12 = scmp.lt.s32.totalorder %s60_s12, %s60_s12 }
  0x1f   :  { %p3549_p13 = scmp.lt.s32.totalorder %s3547_s13, %s3543_s11 }
  0x21   :  { %p3550_p0 = por %p3549_p13, %p3548_p12 }
  0x23   :  { %p3551_p1 = pnand %p3550_p0, %p3544_p11 }
  0x25   :  { %3554 = shalt.err (!%p3551_p1)
}
  0x26   :  { %62 = dma.hbm_to_vmem [thread:$0]  %s4557_s3, 16, %s60_s12, [#allocation10]  }
  0x27   :  { %s3723_s14 = smov [#allocation12]   ;;  %s3724_s16 = smov [#allocation3]  }
  0x28   :  { %s80_s15 = sshll.u32 %s3723_s14, 4  ;;  %s27_s17 = sshll.u32 %s3724_s16, 4  ;;  %s81_s15 = int_to_ptr.vmem [resolvable:$true] %s80_s15  ;;  %s28_s17 = int_to_ptr.vmem [resolvable:$true] %s27_s17 }
  0x29   :  { %s3555_s20 = scalar_lea.hbm %s4559_s5, 512 }
  0x2a   :  { %p3556_p2 = scmp.ne.s32.totalorder %s4559_s5, %s3555_s20  ;;  %p3559_p3 = scmp.lt.u32.totalorder %s3555_s20, %s4559_s5 }
  0x2c   :  { %p3561_p4 = pnand %p3559_p3, %p3556_p2 }
  0x2e   :  { %3564 = shalt.err (!%p3561_p4)
}
  0x2f   :  { %s3565_s3 = scalar_lea.vmem %s81_s15, 512  ;;  %p3570_p6 = scmp.lt.s32.totalorder %s81_s15, %s81_s15 }
  0x30   :  { %p3566_p5 = scmp.ne.s32.totalorder %s81_s15, %s3565_s3  ;;  %p3571_p7 = scmp.lt.s32.totalorder %s3565_s3, %s3565_s3 }
  0x32   :  { %p3572_p8 = por %p3571_p7, %p3570_p6 }
  0x34   :  { %p3573_p9 = pnand %p3572_p8, %p3566_p5 }
  0x36   :  { %3576 = shalt.err (!%p3573_p9)
}
  0x37   :  { %s3725_s12 = smov 64   ;;  %s3726_s25 = smov 4  }
  0x38   :  { %86 = dma.hbm_to_vmem [thread:$0]  %s4559_s5, 512, %s81_s15, [#allocation13], %s3725_s12, %s3725_s12, %s3726_s25  }
  0x39   :  { %s3577_s30 = scalar_lea.hbm %s4554_s0, 128 }
  0x3a   :  { %p3578_p10 = scmp.ne.s32.totalorder %s4554_s0, %s3577_s30  ;;  %p3581_p11 = scmp.lt.u32.totalorder %s3577_s30, %s4554_s0 }
  0x3c   :  { %p3583_p12 = pnand %p3581_p11, %p3578_p10 }
  0x3e   :  { %3586 = shalt.err (!%p3583_p12)
}
  0x3f   :  { %s3587_s14 = scalar_lea.vmem %s28_s17, 128  ;;  %p3592_p0 = scmp.lt.s32.totalorder %s28_s17, %s28_s17 }
  0x40   :  { %p3588_p13 = scmp.ne.s32.totalorder %s28_s17, %s3587_s14  ;;  %p3593_p1 = scmp.lt.s32.totalorder %s3587_s14, %s3587_s14 }
  0x42   :  { %p3594_p2 = por %p3593_p1, %p3592_p0 }
  0x44   :  { %p3595_p3 = pnand %p3594_p2, %p3588_p13 }
  0x46   :  { %3598 = shalt.err (!%p3595_p3)
}
  0x47   :  { %30 = dma.hbm_to_vmem [thread:$0]  %s4554_s0, 128, %s28_s17, [#allocation4]  }
  0x48   :  { %s3727_s16 = smov [#allocation8]   ;;  %s3728_s19 = smov [#allocation11]  }
  0x49   :  { %s46_s18 = sshll.u32 %s3727_s16, 4  ;;  %s68_s20 = sshll.u32 %s3728_s19, 4  ;;  %s47_s18 = int_to_ptr.vmem [resolvable:$true] %s46_s18  ;;  %s3841_s20 = int_to_ptr.vmem [resolvable:$true] %s68_s20 }
  0x4a   :  { %s3599_s23 = scalar_lea.hbm %s4556_s2, 128 }
  0x4b   :  { %p3600_p4 = scmp.ne.s32.totalorder %s4556_s2, %s3599_s23  ;;  %p3603_p5 = scmp.lt.u32.totalorder %s3599_s23, %s4556_s2 }
  0x4d   :  { %p3605_p6 = pnand %p3603_p5, %p3600_p4 }
  0x4f   :  { %3608 = shalt.err (!%p3605_p6)
}
  0x50   :  { %s3609_s0 = scalar_lea.vmem %s47_s18, 128  ;;  %p3614_p8 = scmp.lt.s32.totalorder %s47_s18, %s47_s18 }
  0x51   :  { %p3610_p7 = scmp.ne.s32.totalorder %s47_s18, %s3609_s0  ;;  %p3615_p9 = scmp.lt.s32.totalorder %s3609_s0, %s3609_s0 }
  0x53   :  { %p3616_p10 = por %p3615_p9, %p3614_p8 }
  0x55   :  { %p3617_p11 = pnand %p3616_p10, %p3610_p7 }
  0x57   :  { %3620 = shalt.err (!%p3617_p11)
}
  0x58   :  { %52 = dma.hbm_to_vmem [thread:$0]  %s4556_s2, 128, %s47_s18, [#allocation7], %s3725_s12, %s3725_s12, %s3726_s25  }
  0x59   :  { %s3621_s11 = scalar_lea.hbm %s4558_s4, 128 }
  0x5a   :  { %p3622_p12 = scmp.ne.s32.totalorder %s4558_s4, %s3621_s11  ;;  %p3625_p13 = scmp.lt.u32.totalorder %s3621_s11, %s4558_s4 }
  0x5c   :  { %p3627_p0 = pnand %p3625_p13, %p3622_p12 }
  0x5e   :  { %3630 = shalt.err (!%p3627_p0)
}
  0x5f   :  { %s3631_s5 = scalar_lea.vmem %s3841_s20, 128  ;;  %p3636_p2 = scmp.lt.s32.totalorder %s3841_s20, %s3841_s20 }
  0x60   :  { %p3632_p1 = scmp.ne.s32.totalorder %s3841_s20, %s3631_s5  ;;  %p3637_p3 = scmp.lt.s32.totalorder %s3631_s5, %s3631_s5 }
  0x62   :  { %p3638_p4 = por %p3637_p3, %p3636_p2 }
  0x64   :  { %p3639_p5 = pnand %p3638_p4, %p3632_p1 }
  0x66   :  { %3642 = shalt.err (!%p3639_p5)
}
  0x67   :  { %74 = dma.hbm_to_vmem [thread:$0]  %s4558_s4, 128, %s3841_s20, [#allocation10], %s3725_s12, %s3725_s12, %s3726_s25  }
  0x68   :  { %s3729_s16 = smov [#allocation14]   ;;  %s3730_s19 = smov [#allocation15]  }
  0x69   :  { %s93_s18 = sshll.u32 %s3729_s16, 4  ;;  %s102_s21 = sshll.u32 %s3730_s19, 4  ;;  %s94_s18 = int_to_ptr.vmem [resolvable:$true] %s93_s18  ;;  %s3878_s21 = int_to_ptr.vmem [resolvable:$true] %s102_s21 }
  0x6a   :  { %s3643_s24 = scalar_lea.hbm %s4560_s6, 32 }
  0x6b   :  { %p3644_p6 = scmp.ne.s32.totalorder %s4560_s6, %s3643_s24  ;;  %p3647_p7 = scmp.lt.u32.totalorder %s3643_s24, %s4560_s6 }
  0x6d   :  { %p3649_p8 = pnand %p3647_p7, %p3644_p6 }
  0x6f   :  { %3652 = shalt.err (!%p3649_p8)
}
  0x70   :  { %s3653_s4 = scalar_lea.vmem %s94_s18, 32  ;;  %p3658_p10 = scmp.lt.s32.totalorder %s94_s18, %s94_s18 }
  0x71   :  { %p3654_p9 = scmp.ne.s32.totalorder %s94_s18, %s3653_s4  ;;  %p3659_p11 = scmp.lt.s32.totalorder %s3653_s4, %s3653_s4 }
  0x73   :  { %p3660_p12 = por %p3659_p11, %p3658_p10 }
  0x75   :  { %p3661_p13 = pnand %p3660_p12, %p3654_p9 }
  0x77   :  { %3664 = shalt.err (!%p3661_p13)
}
  0x78   :  { %96 = dma.hbm_to_vmem [thread:$0]  %s4560_s6, 32, %s94_s18, [#allocation13]  }
  0x79   :  { %s3665_s30 = scalar_lea.hbm %s4561_s7, 512 }
  0x7a   :  { %p3666_p0 = scmp.ne.s32.totalorder %s4561_s7, %s3665_s30  ;;  %p3669_p1 = scmp.lt.u32.totalorder %s3665_s30, %s4561_s7 }
  0x7c   :  { %p3671_p2 = pnand %p3669_p1, %p3666_p0 }
  0x7e   :  { %3674 = shalt.err (!%p3671_p2)
}
  0x7f   :  { %s3675_s14 = scalar_lea.vmem %s3878_s21, 512  ;;  %p3680_p4 = scmp.lt.s32.totalorder %s3878_s21, %s3878_s21 }
  0x80   :  { %p3676_p3 = scmp.ne.s32.totalorder %s3878_s21, %s3675_s14  ;;  %p3681_p5 = scmp.lt.s32.totalorder %s3675_s14, %s3675_s14 }
  0x82   :  { %p3682_p6 = por %p3681_p5, %p3680_p4 }
  0x84   :  { %p3683_p7 = pnand %p3682_p6, %p3676_p3 }
  0x86   :  { %3686 = shalt.err (!%p3683_p7)
}
  0x87   :  { %108 = dma.hbm_to_vmem [thread:$0]  %s4561_s7, 512, %s3878_s21, [#allocation16], %s3725_s12, %s3725_s12, %s3726_s25  }
  0x88   :  { %3709 = dma.done.wait [#allocation4], 128  }
  0x89   :  { %3710 = vsyncadd [#allocation4], 4294967168 }
  0x8a   :  { %3711 = dma.done.wait [#allocation7], 144  }
  0x8b   :  { %3712 = vsyncadd [#allocation7], 4294967152 }
  0x8c   :  { %3713 = dma.done.wait [#allocation10], 144  }
  0x8d   :  { %3714 = vsyncadd [#allocation10], 4294967152 }
  0x8e   :  { %3715 = dma.done.wait [#allocation13], 544  }
  0x8f   :  { %3716 = vsyncadd [#allocation13], 4294966752 }
  0x90   :  { %3717 = dma.done.wait [#allocation16], 512  }
  0x91   :  { %3718 = vsyncadd [#allocation16], 4294966784  ;;  %v3731_v0 = vmov 0.0   ;;  %vm3732_vm0 = vmmov 0   ;;  %v3918_v1 = vld [vmem:[#allocation8] sm:$0xff]   ;;  %v3920_v2 = vld [vmem:[#allocation3] sm:$0xff]  ;;  %v4013_v49 = vstv %s4562_s8 }
  0x92   :  { %2960 = vmatprep.subr.bf16.mxu0 %v3731_v0  ;;  %2962 = vmatprep.mubr.msk.bf16.mxu0 %vm3732_vm0, %v3731_v0  ;;  %vm163_vm1 = vcmask 130048   ;;  %v165_v3 = vpack.c.bf16 %v3920_v2, %v3920_v2  ;;  %s3733_s7 = smov 16   ;;  %v3929_v4 = vld [vmem:[#allocation12] sm:$0xff]   ;;  %s3734_s25 = smov 48   ;;  %v3935_v5 = vld [vmem:[#allocation12 + $0x8] sm:$0xff]   ;;  %v3944_v6 = vld [vmem:[#allocation12 + $0x10] sm:$0xff]  }
  0x93   :  { %2966 = vmatprep.subr.bf16.mxu1 %v3731_v0  ;;  %2974 = vmatprep.mubr.msk.bf16.mxu1 %vm3732_vm0, %v3731_v0  ;;  %164 = vst.msk [vmem:[#allocation17] sm:$0xff] %vm163_vm1, %v3920_v2  ;;  %s3735_s2 = smov 32   ;;  %v3949_v7 = vld [vmem:[#allocation12 + $0x18] sm:$0xff]   ;;  %vm233_vm2 = vcmask 261120   ;;  %v3955_v11 = vld [vmem:[#allocation9] ss:$0 sm:$0xff] }
  0x94   :  { %2961 = vmatpush3.bf16.msra.mxu0 %v3918_v1  ;;  %223 = vrot.lane.b32.xlu0 %v3920_v2, %s3733_s7  ;;  %vm235_vm3 = vcmask 392192   ;;  %vm263_vm4 = vcmask 523264   ;;  %v3960_v21 = vld [vmem:[#allocation11] sm:$0xff]   ;;  %v3972_v23 = vld [vmem:[#allocation6] ss:$0 sm:$0xff]  ;;  %vm363_vm5 = vcmask 31744  }
  0x95   :  { %229 = vrot.lane.b32.xlu1 %v3920_v2, %s3734_s25  ;;  %2984 = vmatprep.subr.bf16.mxu0 %v3731_v0  ;;  %v151_v32 = vld [vmem:[#allocation14] sm:$0x3]  ;;  %vm373_vm6 = vcmask 1041408   ;;  %v3980_v37 = vld [vmem:[#allocation15] sm:$0xff]   ;;  %v3984_v39 = vld [vmem:[#allocation15 + $0x8] sm:$0xff]   ;;  %vm494_vm7 = vcmask 261248  }
  0x96   :  { %2967 = vmatpush3.bf16.msra.mxu1 %v3929_v4  ;;  %v3976_v33 = vsel %vm373_vm6, %v151_v32, 0  ;;  %v3990_v40 = vld [vmem:[#allocation15 + $0x10] sm:$0xff]   ;;  %v3995_v41 = vld [vmem:[#allocation15 + $0x18] sm:$0xff]   ;;  %vm740_vm8 = vcmask 392448   ;;  %vm986_vm9 = vcmask 523648   ;;  %vm161_vm10 = vcmask 1047936  }
  0x97   :  { %2963 = vmatmul.mubr.msk.bf16.vlgmr.msra.gmra.mrb[0].mxu0 %vm163_vm1, %v165_v3  ;;  %2968 = vmatprep.subr.bf16.mxu1 %v3731_v0  ;;  %162 = vst.msk [vmem:[#allocation17 + $0x8] sm:$0xff] %vm161_vm10, %v3731_v0  ;;  %s3736_s8 = smov 80   ;;  %s3737_s18 = smov 96   ;;  %vm1232_vm11 = vcmask 654848   ;;  %vm1481_vm12 = vcmask 786048   ;;  %vm1730_vm13 = vcmask 917248  }
  0x98   :  { %226 = vrot.lane.b32.xlu0 %v3920_v2, %s3735_s2  ;;  %2986 = vmatprep.mubr.msk.bf16.mxu0 %vm3732_vm0, %v3731_v0  ;;  %s3738_s19 = smov 112   ;;  %vm1979_vm14 = vcmask 1048448  }
  0x99   :  { %2985 = vmatpush3.bf16.msra.mxu0 %v3976_v33 }
  0x9a   :  { %2969 = vmatpush3.bf16.msra.mxu1 %v3935_v5  ;;  %2990 = vmatprep.subr.bf16.mxu0 %v3731_v0 }
  0x9b   :  { %2970 = vmatprep.subr.bf16.mxu1 %v3731_v0 }
  0x9e   :  { %2971 = vmatpush3.bf16.msra.mxu1 %v3944_v6 }
  0x9f   :  { %2972 = vmatprep.subr.bf16.mxu1 %v3731_v0 }
  0xa2   :  { %2973 = vmatpush3.bf16.msra.mxu1 %v3949_v7 }
  0xa3   :  { %2978 = vmatprep.subr.bf16.mxu1 %v3731_v0 }
 0x106   :  { %v224_v8 = vpop.permute.xlu0 %223 }
 0x107   :  { %v232_v9 = vsel %vm163_vm1, %v3920_v2, %v224_v8  ;;  %v230_v13 = vpop.permute.xlu1 %229 }
 0x10a   :  { %v227_v10 = vpop.permute.xlu0 %226 }
 0x10b   :  { %v234_v12 = vsel %vm233_vm2, %v232_v9, %v227_v10 }
 0x10c   :  { %v236_v17 = vsel %vm235_vm3, %v234_v12, %v230_v13 }
 0x16a   :  { %v209_v14 = vpop.f32.mrb[0].mxu0 }
 0x16b   :  { %v221_v15 = vsub.f32 %v209_v14, %v3955_v11  ;;  %v2964_v16 = vpop.f32.mrb[1].mxu0 }
 0x16c   :  { %v212_v18 = vpop.f32.mrb[2].mxu0 }
 0x16d   :  { %v237_v19 = vmul.f32 %v236_v17, %v221_v15  ;;  %v2965_v20 = vpop.f32.mrb[3].mxu0 }
 0x16f   :  { %v238_v22 = vpack.c.bf16 %v237_v19, %v237_v19 }
 0x171   :  { %2975 = vmatmul.mubr.msk.bf16.vlgmr.msra.gmra.mrb[0].mxu1 %vm263_vm4, %v238_v22 }
 0x172   :  { %2979 = vmatpush3.bf16.msra.mxu1 %v3960_v21  ;;  %2980 = vmatprep.mubr.msk.bf16.mxu1 %vm3732_vm0, %v3731_v0 }
 0x173   :  { %3002 = vmatprep.subr.bf16.mxu1 %v3731_v0 }
 0x17d   :  { %2981 = vmatmul.mubr.msk.bf16.vlgmr.msra.gmra.mrb[0].mxu1 %vm163_vm1, %v165_v3 }
 0x17e   :  { %3003 = vmatpush3.bf16.msra.mxu1 %v3918_v1  ;;  %3004 = vmatprep.mubr.msk.bf16.mxu1 %vm3732_vm0, %v3731_v0 }
 0x17f   :  { %3026 = vmatprep.subr.bf16.mxu1 %v3731_v0 }
 0x250   :  { %v354_v24 = vpop.f32.mrb[0].mxu1 }
 0x251   :  { %v3380_v25 = vadd.f32 %v3972_v23, %v354_v24  ;;  %v2982_v26 = vpop.f32.mrb[1].mxu1 }
 0x252   :  { %v357_v27 = vpop.f32.mrb[2].mxu1 }
 0x253   :  { %v361_v28 = vmul.f32 1.442695, %v3380_v25  ;;  %v2983_v29 = vpop.f32.mrb[3].mxu1 }
 0x255   :  { %3459 = vpow2.f32 %v361_v28 }
 0x25f   :  { %v3460_v30 = vpop.eup %3459 }
 0x260   :  { %v364_v31 = vsel %vm363_vm5, %v3460_v30, 0.0 }
 0x261   :  { %365 = vadd.xlane.f32.xlu1 %v364_v31 }
 0x2ee   :  { %v366_v34 = vpop.xlane.xlu1 %365 }
 0x2ef   :  { %3461 = vrcp.f32 %v366_v34 }
 0x2f9   :  { %v3462_v35 = vpop.eup %3461 }
 0x2fa   :  { %v368_v36 = vmul.f32 %v3462_v35, %v3460_v30 }
 0x2fc   :  { %v369_v38 = vpack.c.bf16 %v368_v36, %v368_v36 }
 0x2fe   :  { %2987 = vmatmul.mubr.msk.bf16.vlgmr.msra.gmra.mrb[4].mxu0 %vm363_vm5, %v369_v38 }
 0x2ff   :  { %2991 = vmatpush3.bf16.msra.mxu0 %v3980_v37  ;;  %2998 = vmatprep.mubr.msk.bf16.mxu0 %vm3732_vm0, %v3731_v0 }
 0x300   :  { %2992 = vmatprep.subr.bf16.mxu0 %v3731_v0 }
 0x303   :  { %2993 = vmatpush3.bf16.msra.mxu0 %v3984_v39 }
 0x304   :  { %2994 = vmatprep.subr.bf16.mxu0 %v3731_v0 }
 0x307   :  { %2995 = vmatpush3.bf16.msra.mxu0 %v3990_v40 }
 0x308   :  { %2996 = vmatprep.subr.bf16.mxu0 %v3731_v0 }
 0x30b   :  { %2997 = vmatpush3.bf16.msra.mxu0 %v3995_v41 }
 0x30c   :  { %3008 = vmatprep.subr.bf16.mxu0 %v3731_v0 }
 0x3d1   :  { %v411_v42 = vpop.f32.mrb[4].mxu0 }
 0x3d2   :  { %v417_v43 = vmul.f32 %v411_v42, %v221_v15  ;;  %v2988_v44 = vpop.f32.mrb[5].mxu0 }
 0x3d3   :  { %v414_v45 = vpop.f32.mrb[6].mxu0 }
 0x3d4   :  { %v418_v46 = vpack.c.bf16 %v417_v43, %v417_v43  ;;  %v2989_v47 = vpop.f32.mrb[7].mxu0 }
 0x3d6   :  { %2999 = vmatmul.mubr.msk.bf16.vlgmr.msra.gmra.mrb[8].mxu0 %vm263_vm4, %v418_v46 }
 0x3d7   :  { %3009 = vmatpush3.bf16.msra.mxu0 %v3929_v4  ;;  %3016 = vmatprep.mubr.msk.bf16.mxu0 %vm3732_vm0, %v3731_v0 }
 0x3d8   :  { %3010 = vmatprep.subr.bf16.mxu0 %v3731_v0 }
 0x3db   :  { %3011 = vmatpush3.bf16.msra.mxu0 %v3935_v5 }
 0x3dc   :  { %3012 = vmatprep.subr.bf16.mxu0 %v3731_v0 }
 0x3df   :  { %3013 = vmatpush3.bf16.msra.mxu0 %v3944_v6 }
 0x3e0   :  { %3014 = vmatprep.subr.bf16.mxu0 %v3731_v0 }
 0x3e3   :  { %3015 = vmatpush3.bf16.msra.mxu0 %v3949_v7 }
 0x3e4   :  { %3020 = vmatprep.subr.bf16.mxu0 %v3731_v0 }
 0x4a9   :  { %v480_v48 = vpop.f32.mrb[8].mxu0 }
 0x4aa   :  { %v486_v50 = vsub.f32 0.0, %v480_v48  ;;  %v3000_v51 = vpop.f32.mrb[9].mxu0 }
 0x4ab   :  { %v483_v52 = vpop.f32.mrb[10].mxu0 }
 0x4ac   :  { %v488_v53 = vmul.f32 %v4013_v49, %v486_v50  ;;  %v3001_v54 = vpop.f32.mrb[11].mxu0 }
 0x4ae   :  { %v4017_v55 = vadd.f32 %v488_v53, %v3920_v2 }
 0x4b0   :  { %491 = vrot.lane.b32.xlu0 %v4017_v55, %s3733_s7  ;;  %v496_v56 = vpack.c.bf16 %v4017_v55, %v4017_v55 }
 0x4b2   :  { %3005 = vmatmul.mubr.msk.bf16.vlgmr.msra.gmra.mrb[4].mxu1 %vm163_vm1, %v496_v56 }
 0x4b3   :  { %3027 = vmatpush3.bf16.msra.mxu1 %v3976_v33  ;;  %3028 = vmatprep.mubr.msk.bf16.mxu1 %vm3732_vm0, %v3731_v0 }
 0x4b4   :  { %541 = vrot.lane.b32.xlu0 %v4017_v55, %s3735_s2  ;;  %3032 = vmatprep.subr.bf16.mxu1 %v3731_v0 }
 0x4b8   :  { %544 = vrot.lane.b32.xlu0 %v4017_v55, %s3734_s25 }
 0x522   :  { %v492_v57 = vpop.permute.xlu0 %491 }
 0x523   :  { %495 = vst.msk [vmem:[#allocation17] sm:$0xff] %vm494_vm7, %v492_v57  ;;  %v547_v60 = vsel %vm163_vm1, %v4017_v55, %v492_v57 }
 0x526   :  { %v542_v58 = vpop.permute.xlu0 %541 }
 0x527   :  { %v548_v62 = vsel %vm233_vm2, %v547_v60, %v542_v58 }
 0x52a   :  { %v545_v59 = vpop.permute.xlu0 %544 }
 0x52b   :  { %v549_v3 = vsel %vm235_vm3, %v548_v62, %v545_v59 }
 0x585   :  { %v534_v61 = vpop.f32.mrb[4].mxu1 }
 0x586   :  { %v540_v63 = vsub.f32 %v534_v61, %v3955_v11  ;;  %v3006_v2 = vpop.f32.mrb[5].mxu1 }
 0x587   :  { %v537_v8 = vpop.f32.mrb[6].mxu1 }
 0x588   :  { %v550_v9 = vmul.f32 %v549_v3, %v540_v63  ;;  %v3007_v10 = vpop.f32.mrb[7].mxu1 }
 0x58a   :  { %v551_v12 = vpack.c.bf16 %v550_v9, %v550_v9 }
 0x58c   :  { %3017 = vmatmul.mubr.msk.bf16.vlgmr.msra.gmra.mrb[12].mxu0 %vm263_vm4, %v551_v12 }
 0x58d   :  { %3021 = vmatpush3.bf16.msra.mxu0 %v3960_v21  ;;  %3022 = vmatprep.mubr.msk.bf16.mxu0 %vm3732_vm0, %v3731_v0 }
 0x58e   :  { %3044 = vmatprep.subr.bf16.mxu0 %v3731_v0 }
 0x598   :  { %3023 = vmatmul.mubr.msk.bf16.vlgmr.msra.gmra.mrb[12].mxu0 %vm163_vm1, %v496_v56 }
 0x599   :  { %3045 = vmatpush3.bf16.msra.mxu0 %v3918_v1  ;;  %3046 = vmatprep.mubr.msk.bf16.mxu0 %vm3732_vm0, %v3731_v0 }
 0x59a   :  { %3068 = vmatprep.subr.bf16.mxu0 %v3731_v0 }
 0x66b   :  { %v630_v13 = vpop.f32.mrb[12].mxu0 }
 0x66c   :  { %v3381_v14 = vadd.f32 %v3972_v23, %v630_v13  ;;  %v3024_v15 = vpop.f32.mrb[13].mxu0 }
 0x66d   :  { %v633_v16 = vpop.f32.mrb[14].mxu0 }
 0x66e   :  { %v637_v17 = vmul.f32 1.442695, %v3381_v14  ;;  %v3025_v18 = vpop.f32.mrb[15].mxu0 }
 0x670   :  { %3463 = vpow2.f32 %v637_v17 }
 0x67a   :  { %v3464_v19 = vpop.eup %3463 }
 0x67b   :  { %v639_v20 = vsel %vm363_vm5, %v3464_v19, 0.0 }
 0x67c   :  { %640 = vadd.xlane.f32.xlu0 %v639_v20 }
 0x709   :  { %v641_v22 = vpop.xlane.xlu0 %640 }
 0x70a   :  { %3465 = vrcp.f32 %v641_v22 }
 0x714   :  { %v3466_v24 = vpop.eup %3465 }
 0x715   :  { %v643_v25 = vmul.f32 %v3466_v24, %v3464_v19 }
 0x717   :  { %v644_v26 = vpack.c.bf16 %v643_v25, %v643_v25 }
 0x719   :  { %3029 = vmatmul.mubr.msk.bf16.vlgmr.msra.gmra.mrb[8].mxu1 %vm363_vm5, %v644_v26 }
 0x71a   :  { %3033 = vmatpush3.bf16.msra.mxu1 %v3980_v37  ;;  %3040 = vmatprep.mubr.msk.bf16.mxu1 %vm3732_vm0, %v3731_v0 }
 0x71b   :  { %3034 = vmatprep.subr.bf16.mxu1 %v3731_v0 }
 0x71e   :  { %3035 = vmatpush3.bf16.msra.mxu1 %v3984_v39 }
 0x71f   :  { %3036 = vmatprep.subr.bf16.mxu1 %v3731_v0 }
 0x722   :  { %3037 = vmatpush3.bf16.msra.mxu1 %v3990_v40 }
 0x723   :  { %3038 = vmatprep.subr.bf16.mxu1 %v3731_v0 }
 0x726   :  { %3039 = vmatpush3.bf16.msra.mxu1 %v3995_v41 }
 0x727   :  { %3050 = vmatprep.subr.bf16.mxu1 %v3731_v0 }
 0x7ec   :  { %v682_v27 = vpop.f32.mrb[8].mxu1 }
 0x7ed   :  { %v688_v28 = vmul.f32 %v682_v27, %v540_v63  ;;  %v3030_v29 = vpop.f32.mrb[9].mxu1 }
 0x7ee   :  { %v685_v30 = vpop.f32.mrb[10].mxu1 }
 0x7ef   :  { %v689_v31 = vpack.c.bf16 %v688_v28, %v688_v28  ;;  %v3031_v32 = vpop.f32.mrb[11].mxu1 }
 0x7f1   :  { %3041 = vmatmul.mubr.msk.bf16.vlgmr.msra.gmra.mrb[12].mxu1 %vm263_vm4, %v689_v31 }
 0x7f2   :  { %3051 = vmatpush3.bf16.msra.mxu1 %v3929_v4  ;;  %3058 = vmatprep.mubr.msk.bf16.mxu1 %vm3732_vm0, %v3731_v0 }
 0x7f3   :  { %3052 = vmatprep.subr.bf16.mxu1 %v3731_v0 }
 0x7f6   :  { %3053 = vmatpush3.bf16.msra.mxu1 %v3935_v5 }
 0x7f7   :  { %3054 = vmatprep.subr.bf16.mxu1 %v3731_v0 }
 0x7fa   :  { %3055 = vmatpush3.bf16.msra.mxu1 %v3944_v6 }
 0x7fb   :  { %3056 = vmatprep.subr.bf16.mxu1 %v3731_v0 }
 0x7fe   :  { %3057 = vmatpush3.bf16.msra.mxu1 %v3949_v7 }
 0x7ff   :  { %3062 = vmatprep.subr.bf16.mxu1 %v3731_v0 }
 0x8c4   :  { %v727_v34 = vpop.f32.mrb[12].mxu1 }
 0x8c5   :  { %v733_v35 = vsub.f32 0.0, %v727_v34  ;;  %v3042_v36 = vpop.f32.mrb[13].mxu1 }
 0x8c6   :  { %v730_v38 = vpop.f32.mrb[14].mxu1 }
 0x8c7   :  { %v734_v42 = vmul.f32 %v733_v35, %v4013_v49  ;;  %v3043_v43 = vpop.f32.mrb[15].mxu1 }
 0x8c9   :  { %v4074_v44 = vadd.f32 %v734_v42, %v4017_v55 }
 0x8cb   :  { %737 = vrot.lane.b32.xlu0 %v4074_v44, %s3735_s2  ;;  %787 = vrot.lane.b32.xlu1 %v4074_v44, %s3733_s7  ;;  %v742_v45 = vpack.c.bf16 %v4074_v44, %v4074_v44 }
 0x8cd   :  { %3047 = vmatmul.mubr.msk.bf16.vlgmr.msra.gmra.mrb[16].mxu0 %vm163_vm1, %v742_v45 }
 0x8ce   :  { %3069 = vmatpush3.bf16.msra.mxu0 %v3976_v33  ;;  %3070 = vmatprep.mubr.msk.bf16.mxu0 %vm3732_vm0, %v3731_v0 }
 0x8cf   :  { %790 = vrot.lane.b32.xlu1 %v4074_v44, %s3734_s25  ;;  %3074 = vmatprep.subr.bf16.mxu0 %v3731_v0 }
 0x93d   :  { %v738_v46 = vpop.permute.xlu0 %737  ;;  %v788_v47 = vpop.permute.xlu1 %787 }
 0x93e   :  { %741 = vst.msk [vmem:[#allocation17] sm:$0xff] %vm740_vm8, %v738_v46  ;;  %v793_v48 = vsel %vm163_vm1, %v4074_v44, %v788_v47 }
 0x93f   :  { %v794_v52 = vsel %vm233_vm2, %v793_v48, %v738_v46 }
 0x941   :  { %v791_v50 = vpop.permute.xlu1 %790 }
 0x942   :  { %v795_v55 = vsel %vm235_vm3, %v794_v52, %v791_v50 }
 0x9a0   :  { %v780_v51 = vpop.f32.mrb[16].mxu0 }
 0x9a1   :  { %v786_v53 = vsub.f32 %v780_v51, %v3955_v11  ;;  %v3048_v54 = vpop.f32.mrb[17].mxu0 }
 0x9a2   :  { %v783_v56 = vpop.f32.mrb[18].mxu0 }
 0x9a3   :  { %v796_v57 = vmul.f32 %v795_v55, %v786_v53  ;;  %v3049_v58 = vpop.f32.mrb[19].mxu0 }
 0x9a5   :  { %v797_v59 = vpack.c.bf16 %v796_v57, %v796_v57 }
 0x9a7   :  { %3059 = vmatmul.mubr.msk.bf16.vlgmr.msra.gmra.mrb[16].mxu1 %vm263_vm4, %v797_v59 }
 0x9a8   :  { %3063 = vmatpush3.bf16.msra.mxu1 %v3960_v21  ;;  %3064 = vmatprep.mubr.msk.bf16.mxu1 %vm3732_vm0, %v3731_v0 }
 0x9a9   :  { %3086 = vmatprep.subr.bf16.mxu1 %v3731_v0 }
 0x9b3   :  { %3065 = vmatmul.mubr.msk.bf16.vlgmr.msra.gmra.mrb[16].mxu1 %vm163_vm1, %v742_v45 }
 0x9b4   :  { %3087 = vmatpush3.bf16.msra.mxu1 %v3918_v1  ;;  %3088 = vmatprep.mubr.msk.bf16.mxu1 %vm3732_vm0, %v3731_v0 }
 0x9b5   :  { %3110 = vmatprep.subr.bf16.mxu1 %v3731_v0 }
 0xa86   :  { %v876_v60 = vpop.f32.mrb[16].mxu1 }
 0xa87   :  { %v3382_v61 = vadd.f32 %v3972_v23, %v876_v60  ;;  %v3066_v62 = vpop.f32.mrb[17].mxu1 }
 0xa88   :  { %v879_v63 = vpop.f32.mrb[18].mxu1 }
 0xa89   :  { %v883_v2 = vmul.f32 1.442695, %v3382_v61  ;;  %v3067_v3 = vpop.f32.mrb[19].mxu1 }
 0xa8b   :  { %3467 = vpow2.f32 %v883_v2 }
 0xa95   :  { %v3468_v8 = vpop.eup %3467 }
 0xa96   :  { %v885_v9 = vsel %vm363_vm5, %v3468_v8, 0.0 }
 0xa97   :  { %886 = vadd.xlane.f32.xlu1 %v885_v9 }
 0xb24   :  { %v887_v10 = vpop.xlane.xlu1 %886 }
 0xb25   :  { %3469 = vrcp.f32 %v887_v10 }
 0xb2f   :  { %v3470_v12 = vpop.eup %3469 }
 0xb30   :  { %v889_v13 = vmul.f32 %v3470_v12, %v3468_v8 }
 0xb32   :  { %v890_v14 = vpack.c.bf16 %v889_v13, %v889_v13 }
 0xb34   :  { %3071 = vmatmul.mubr.msk.bf16.vlgmr.msra.gmra.mrb[20].mxu0 %vm363_vm5, %v890_v14 }
 0xb35   :  { %3075 = vmatpush3.bf16.msra.mxu0 %v3980_v37  ;;  %3082 = vmatprep.mubr.msk.bf16.mxu0 %vm3732_vm0, %v3731_v0 }
 0xb36   :  { %3076 = vmatprep.subr.bf16.mxu0 %v3731_v0 }
 0xb39   :  { %3077 = vmatpush3.bf16.msra.mxu0 %v3984_v39 }
 0xb3a   :  { %3078 = vmatprep.subr.bf16.mxu0 %v3731_v0 }
 0xb3d   :  { %3079 = vmatpush3.bf16.msra.mxu0 %v3990_v40 }
 0xb3e   :  { %3080 = vmatprep.subr.bf16.mxu0 %v3731_v0 }
 0xb41   :  { %3081 = vmatpush3.bf16.msra.mxu0 %v3995_v41 }
 0xb42   :  { %3092 = vmatprep.subr.bf16.mxu0 %v3731_v0 }
 0xc07   :  { %v928_v15 = vpop.f32.mrb[20].mxu0 }
 0xc08   :  { %v934_v16 = vmul.f32 %v928_v15, %v786_v53  ;;  %v3072_v17 = vpop.f32.mrb[21].mxu0 }
 0xc09   :  { %v931_v18 = vpop.f32.mrb[22].mxu0 }
 0xc0a   :  { %v935_v19 = vpack.c.bf16 %v934_v16, %v934_v16  ;;  %v3073_v20 = vpop.f32.mrb[23].mxu0 }
 0xc0c   :  { %3083 = vmatmul.mubr.msk.bf16.vlgmr.msra.gmra.mrb[24].mxu0 %vm263_vm4, %v935_v19 }
 0xc0d   :  { %3093 = vmatpush3.bf16.msra.mxu0 %v3929_v4  ;;  %3100 = vmatprep.mubr.msk.bf16.mxu0 %vm3732_vm0, %v3731_v0 }
 0xc0e   :  { %3094 = vmatprep.subr.bf16.mxu0 %v3731_v0 }
 0xc11   :  { %3095 = vmatpush3.bf16.msra.mxu0 %v3935_v5 }
 0xc12   :  { %3096 = vmatprep.subr.bf16.mxu0 %v3731_v0 }
 0xc15   :  { %3097 = vmatpush3.bf16.msra.mxu0 %v3944_v6 }
 0xc16   :  { %3098 = vmatprep.subr.bf16.mxu0 %v3731_v0 }
 0xc19   :  { %3099 = vmatpush3.bf16.msra.mxu0 %v3949_v7 }
 0xc1a   :  { %3104 = vmatprep.subr.bf16.mxu0 %v3731_v0 }
 0xcdf   :  { %v973_v22 = vpop.f32.mrb[24].mxu0 }
 0xce0   :  { %v979_v24 = vsub.f32 0.0, %v973_v22  ;;  %v3084_v25 = vpop.f32.mrb[25].mxu0 }
 0xce1   :  { %v976_v26 = vpop.f32.mrb[26].mxu0 }
 0xce2   :  { %v980_v27 = vmul.f32 %v979_v24, %v4013_v49  ;;  %v3085_v28 = vpop.f32.mrb[27].mxu0 }
 0xce4   :  { %v4131_v29 = vadd.f32 %v980_v27, %v4074_v44 }
 0xce6   :  { %1033 = vrot.lane.b32.xlu0 %v4131_v29, %s3733_s7  ;;  %v988_v30 = vpack.c.bf16 %v4131_v29, %v4131_v29 }
 0xce8   :  { %3089 = vmatmul.mubr.msk.bf16.vlgmr.msra.gmra.mrb[20].mxu1 %vm163_vm1, %v988_v30 }
 0xce9   :  { %3111 = vmatpush3.bf16.msra.mxu1 %v3976_v33  ;;  %3112 = vmatprep.mubr.msk.bf16.mxu1 %vm3732_vm0, %v3731_v0 }
 0xcea   :  { %1036 = vrot.lane.b32.xlu0 %v4131_v29, %s3735_s2  ;;  %3116 = vmatprep.subr.bf16.mxu1 %v3731_v0 }
 0xcee   :  { %983 = vrot.lane.b32.xlu0 %v4131_v29, %s3734_s25 }
 0xd58   :  { %v1034_v31 = vpop.permute.xlu0 %1033 }
 0xd59   :  { %v1039_v32 = vsel %vm163_vm1, %v4131_v29, %v1034_v31 }
 0xd5c   :  { %v1037_v34 = vpop.permute.xlu0 %1036 }
 0xd5d   :  { %v1040_v35 = vsel %vm233_vm2, %v1039_v32, %v1037_v34 }
 0xd60   :  { %v984_v36 = vpop.permute.xlu0 %983 }
 0xd61   :  { %987 = vst.msk [vmem:[#allocation17] sm:$0xff] %vm986_vm9, %v984_v36  ;;  %v1041_v44 = vsel %vm235_vm3, %v1040_v35, %v984_v36 }
 0xdbb   :  { %v1026_v38 = vpop.f32.mrb[20].mxu1 }
 0xdbc   :  { %v1032_v42 = vsub.f32 %v1026_v38, %v3955_v11  ;;  %v3090_v43 = vpop.f32.mrb[21].mxu1 }
 0xdbd   :  { %v1029_v45 = vpop.f32.mrb[22].mxu1 }
 0xdbe   :  { %v1042_v46 = vmul.f32 %v1041_v44, %v1032_v42  ;;  %v3091_v47 = vpop.f32.mrb[23].mxu1 }
 0xdc0   :  { %v1043_v48 = vpack.c.bf16 %v1042_v46, %v1042_v46 }
 0xdc2   :  { %3101 = vmatmul.mubr.msk.bf16.vlgmr.msra.gmra.mrb[28].mxu0 %vm263_vm4, %v1043_v48 }
 0xdc3   :  { %3105 = vmatpush3.bf16.msra.mxu0 %v3960_v21  ;;  %3106 = vmatprep.mubr.msk.bf16.mxu0 %vm3732_vm0, %v3731_v0 }
 0xdc4   :  { %3128 = vmatprep.subr.bf16.mxu0 %v3731_v0 }
 0xdce   :  { %3107 = vmatmul.mubr.msk.bf16.vlgmr.msra.gmra.mrb[28].mxu0 %vm163_vm1, %v988_v30 }
 0xdcf   :  { %3129 = vmatpush3.bf16.msra.mxu0 %v3918_v1  ;;  %3130 = vmatprep.mubr.msk.bf16.mxu0 %vm3732_vm0, %v3731_v0 }
 0xdd0   :  { %3152 = vmatprep.subr.bf16.mxu0 %v3731_v0 }
 0xea1   :  { %v1122_v50 = vpop.f32.mrb[28].mxu0 }
 0xea2   :  { %v3383_v51 = vadd.f32 %v3972_v23, %v1122_v50  ;;  %v3108_v52 = vpop.f32.mrb[29].mxu0 }
 0xea3   :  { %v1125_v53 = vpop.f32.mrb[30].mxu0 }
 0xea4   :  { %v1129_v54 = vmul.f32 1.442695, %v3383_v51  ;;  %v3109_v55 = vpop.f32.mrb[31].mxu0 }
 0xea6   :  { %3471 = vpow2.f32 %v1129_v54 }
 0xeb0   :  { %v3472_v56 = vpop.eup %3471 }
 0xeb1   :  { %v1131_v57 = vsel %vm363_vm5, %v3472_v56, 0.0 }
 0xeb2   :  { %1132 = vadd.xlane.f32.xlu0 %v1131_v57 }
 0xf3f   :  { %v1133_v58 = vpop.xlane.xlu0 %1132 }
 0xf40   :  { %3473 = vrcp.f32 %v1133_v58 }
 0xf4a   :  { %v3474_v59 = vpop.eup %3473 }
 0xf4b   :  { %v1135_v60 = vmul.f32 %v3474_v59, %v3472_v56 }
 0xf4d   :  { %v1136_v61 = vpack.c.bf16 %v1135_v60, %v1135_v60 }
 0xf4f   :  { %3113 = vmatmul.mubr.msk.bf16.vlgmr.msra.gmra.mrb[24].mxu1 %vm363_vm5, %v1136_v61 }
 0xf50   :  { %3117 = vmatpush3.bf16.msra.mxu1 %v3980_v37  ;;  %3124 = vmatprep.mubr.msk.bf16.mxu1 %vm3732_vm0, %v3731_v0 }
 0xf51   :  { %3118 = vmatprep.subr.bf16.mxu1 %v3731_v0 }
 0xf54   :  { %3119 = vmatpush3.bf16.msra.mxu1 %v3984_v39 }
 0xf55   :  { %3120 = vmatprep.subr.bf16.mxu1 %v3731_v0 }
 0xf58   :  { %3121 = vmatpush3.bf16.msra.mxu1 %v3990_v40 }
 0xf59   :  { %3122 = vmatprep.subr.bf16.mxu1 %v3731_v0 }
 0xf5c   :  { %3123 = vmatpush3.bf16.msra.mxu1 %v3995_v41 }
 0xf5d   :  { %3134 = vmatprep.subr.bf16.mxu1 %v3731_v0 }
0x1022   :  { %v1174_v62 = vpop.f32.mrb[24].mxu1 }
0x1023   :  { %v1180_v63 = vmul.f32 %v1174_v62, %v1032_v42  ;;  %v3114_v2 = vpop.f32.mrb[25].mxu1 }
0x1024   :  { %v1177_v3 = vpop.f32.mrb[26].mxu1 }
0x1025   :  { %v1181_v8 = vpack.c.bf16 %v1180_v63, %v1180_v63  ;;  %v3115_v9 = vpop.f32.mrb[27].mxu1 }
0x1027   :  { %3125 = vmatmul.mubr.msk.bf16.vlgmr.msra.gmra.mrb[28].mxu1 %vm263_vm4, %v1181_v8 }
0x1028   :  { %3135 = vmatpush3.bf16.msra.mxu1 %v3929_v4  ;;  %3142 = vmatprep.mubr.msk.bf16.mxu1 %vm3732_vm0, %v3731_v0 }
0x1029   :  { %3136 = vmatprep.subr.bf16.mxu1 %v3731_v0 }
0x102c   :  { %3137 = vmatpush3.bf16.msra.mxu1 %v3935_v5 }
0x102d   :  { %3138 = vmatprep.subr.bf16.mxu1 %v3731_v0 }
0x1030   :  { %3139 = vmatpush3.bf16.msra.mxu1 %v3944_v6 }
0x1031   :  { %3140 = vmatprep.subr.bf16.mxu1 %v3731_v0 }
0x1034   :  { %3141 = vmatpush3.bf16.msra.mxu1 %v3949_v7 }
0x1035   :  { %3146 = vmatprep.subr.bf16.mxu1 %v3731_v0 }
0x10fa   :  { %v1219_v10 = vpop.f32.mrb[28].mxu1 }
0x10fb   :  { %v1225_v12 = vsub.f32 0.0, %v1219_v10  ;;  %v3126_v13 = vpop.f32.mrb[29].mxu1 }
0x10fc   :  { %v1222_v14 = vpop.f32.mrb[30].mxu1 }
0x10fd   :  { %v1226_v15 = vmul.f32 %v1225_v12, %v4013_v49  ;;  %v3127_v16 = vpop.f32.mrb[31].mxu1 }
0x10ff   :  { %v4187_v17 = vadd.f32 %v1226_v15, %v4131_v29 }
0x1101   :  { %1285 = vrot.lane.b32.xlu0 %v4187_v17, %s3734_s25  ;;  %1279 = vrot.lane.b32.xlu1 %v4187_v17, %s3733_s7  ;;  %v1234_v18 = vpack.c.bf16 %v4187_v17, %v4187_v17 }
0x1103   :  { %3131 = vmatmul.mubr.msk.bf16.vlgmr.msra.gmra.mrb[32].mxu0 %vm163_vm1, %v1234_v18 }
0x1104   :  { %3153 = vmatpush3.bf16.msra.mxu0 %v3976_v33  ;;  %3154 = vmatprep.mubr.msk.bf16.mxu0 %vm3732_vm0, %v3731_v0 }
0x1105   :  { %1282 = vrot.lane.b32.xlu1 %v4187_v17, %s3735_s2  ;;  %3158 = vmatprep.subr.bf16.mxu0 %v3731_v0 }
0x1173   :  { %v1280_v19 = vpop.permute.xlu1 %1279  ;;  %v1286_v26 = vpop.permute.xlu0 %1285 }
0x1174   :  { %v1288_v22 = vsel %vm163_vm1, %v4187_v17, %v1280_v19 }
0x1177   :  { %v1283_v20 = vpop.permute.xlu1 %1282 }
0x1178   :  { %v1289_v24 = vsel %vm233_vm2, %v1288_v22, %v1283_v20 }
0x1179   :  { %v1290_v29 = vsel %vm235_vm3, %v1289_v24, %v1286_v26 }
0x11d6   :  { %v1272_v25 = vpop.f32.mrb[32].mxu0 }
0x11d7   :  { %v1278_v27 = vsub.f32 %v1272_v25, %v3955_v11  ;;  %v3132_v28 = vpop.f32.mrb[33].mxu0 }
0x11d8   :  { %v1275_v30 = vpop.f32.mrb[34].mxu0 }
0x11d9   :  { %v1291_v31 = vmul.f32 %v1290_v29, %v1278_v27  ;;  %v3133_v32 = vpop.f32.mrb[35].mxu0 }
0x11db   :  { %v1292_v34 = vpack.c.bf16 %v1291_v31, %v1291_v31 }
0x11dd   :  { %3143 = vmatmul.mubr.msk.bf16.vlgmr.msra.gmra.mrb[32].mxu1 %vm263_vm4, %v1292_v34 }
0x11de   :  { %3147 = vmatpush3.bf16.msra.mxu1 %v3960_v21  ;;  %3148 = vmatprep.mubr.msk.bf16.mxu1 %vm3732_vm0, %v3731_v0 }
0x11df   :  { %3170 = vmatprep.subr.bf16.mxu1 %v3731_v0 }
0x11e9   :  { %3149 = vmatmul.mubr.msk.bf16.vlgmr.msra.gmra.mrb[32].mxu1 %vm163_vm1, %v1234_v18 }
0x11ea   :  { %3171 = vmatpush3.bf16.msra.mxu1 %v3918_v1  ;;  %3172 = vmatprep.mubr.msk.bf16.mxu1 %vm3732_vm0, %v3731_v0 }
0x11eb   :  { %3194 = vmatprep.subr.bf16.mxu1 %v3731_v0 }
0x12bc   :  { %v1371_v35 = vpop.f32.mrb[32].mxu1 }
0x12bd   :  { %v3384_v36 = vadd.f32 %v3972_v23, %v1371_v35  ;;  %v3150_v38 = vpop.f32.mrb[33].mxu1 }
0x12be   :  { %v1374_v42 = vpop.f32.mrb[34].mxu1 }
0x12bf   :  { %v1378_v43 = vmul.f32 1.442695, %v3384_v36  ;;  %v3151_v44 = vpop.f32.mrb[35].mxu1 }
0x12c1   :  { %3475 = vpow2.f32 %v1378_v43 }
0x12cb   :  { %v3476_v45 = vpop.eup %3475 }
0x12cc   :  { %v1380_v46 = vsel %vm363_vm5, %v3476_v45, 0.0 }
0x12cd   :  { %1381 = vadd.xlane.f32.xlu1 %v1380_v46 }
0x135a   :  { %v1382_v47 = vpop.xlane.xlu1 %1381 }
0x135b   :  { %3477 = vrcp.f32 %v1382_v47 }
0x1365   :  { %v3478_v48 = vpop.eup %3477 }
0x1366   :  { %v1384_v50 = vmul.f32 %v3478_v48, %v3476_v45 }
0x1368   :  { %v1385_v51 = vpack.c.bf16 %v1384_v50, %v1384_v50 }
0x136a   :  { %3155 = vmatmul.mubr.msk.bf16.vlgmr.msra.gmra.mrb[36].mxu0 %vm363_vm5, %v1385_v51 }
0x136b   :  { %3159 = vmatpush3.bf16.msra.mxu0 %v3980_v37  ;;  %3166 = vmatprep.mubr.msk.bf16.mxu0 %vm3732_vm0, %v3731_v0 }
0x136c   :  { %3160 = vmatprep.subr.bf16.mxu0 %v3731_v0 }
0x136f   :  { %3161 = vmatpush3.bf16.msra.mxu0 %v3984_v39 }
0x1370   :  { %3162 = vmatprep.subr.bf16.mxu0 %v3731_v0 }
0x1373   :  { %3163 = vmatpush3.bf16.msra.mxu0 %v3990_v40 }
0x1374   :  { %3164 = vmatprep.subr.bf16.mxu0 %v3731_v0 }
0x1377   :  { %3165 = vmatpush3.bf16.msra.mxu0 %v3995_v41 }
0x1378   :  { %3176 = vmatprep.subr.bf16.mxu0 %v3731_v0 }
0x143d   :  { %v1423_v52 = vpop.f32.mrb[36].mxu0 }
0x143e   :  { %v1429_v53 = vmul.f32 %v1423_v52, %v1278_v27  ;;  %v3156_v54 = vpop.f32.mrb[37].mxu0 }
0x143f   :  { %v1426_v55 = vpop.f32.mrb[38].mxu0 }
0x1440   :  { %v1430_v56 = vpack.c.bf16 %v1429_v53, %v1429_v53  ;;  %v3157_v57 = vpop.f32.mrb[39].mxu0 }
0x1442   :  { %3167 = vmatmul.mubr.msk.bf16.vlgmr.msra.gmra.mrb[40].mxu0 %vm263_vm4, %v1430_v56 }
0x1443   :  { %3177 = vmatpush3.bf16.msra.mxu0 %v3929_v4  ;;  %3184 = vmatprep.mubr.msk.bf16.mxu0 %vm3732_vm0, %v3731_v0 }
0x1444   :  { %3178 = vmatprep.subr.bf16.mxu0 %v3731_v0 }
0x1447   :  { %3179 = vmatpush3.bf16.msra.mxu0 %v3935_v5 }
0x1448   :  { %3180 = vmatprep.subr.bf16.mxu0 %v3731_v0 }
0x144b   :  { %3181 = vmatpush3.bf16.msra.mxu0 %v3944_v6 }
0x144c   :  { %3182 = vmatprep.subr.bf16.mxu0 %v3731_v0 }
0x144f   :  { %3183 = vmatpush3.bf16.msra.mxu0 %v3949_v7 }
0x1450   :  { %3188 = vmatprep.subr.bf16.mxu0 %v3731_v0 }
0x1515   :  { %v1468_v58 = vpop.f32.mrb[40].mxu0 }
0x1516   :  { %v1474_v59 = vsub.f32 0.0, %v1468_v58  ;;  %v3168_v60 = vpop.f32.mrb[41].mxu0 }
0x1517   :  { %v1471_v61 = vpop.f32.mrb[42].mxu0 }
0x1518   :  { %v1475_v62 = vmul.f32 %v1474_v59, %v4013_v49  ;;  %v3169_v63 = vpop.f32.mrb[43].mxu0 }
0x151a   :  { %v4243_v2 = vadd.f32 %v1475_v62, %v4187_v17 }
0x151c   :  { %1528 = vrot.lane.b32.xlu0 %v4243_v2, %s3733_s7  ;;  %v1483_v3 = vpack.c.bf16 %v4243_v2, %v4243_v2 }
0x151e   :  { %3173 = vmatmul.mubr.msk.bf16.vlgmr.msra.gmra.mrb[36].mxu1 %vm163_vm1, %v1483_v3 }
0x151f   :  { %3195 = vmatpush3.bf16.msra.mxu1 %v3976_v33  ;;  %3196 = vmatprep.mubr.msk.bf16.mxu1 %vm3732_vm0, %v3731_v0 }
0x1520   :  { %1531 = vrot.lane.b32.xlu0 %v4243_v2, %s3735_s2  ;;  %3200 = vmatprep.subr.bf16.mxu1 %v3731_v0 }
0x1524   :  { %1534 = vrot.lane.b32.xlu0 %v4243_v2, %s3734_s25 }
0x158e   :  { %v1529_v8 = vpop.permute.xlu0 %1528 }
0x158f   :  { %v1537_v12 = vsel %vm163_vm1, %v4243_v2, %v1529_v8  ;;  %v4325_v8 = vld [vmem:[#allocation8] sm:$0xff]  }
0x1592   :  { %v1532_v9 = vpop.permute.xlu0 %1531 }
0x1593   :  { %v1538_v14 = vsel %vm233_vm2, %v1537_v12, %v1532_v9 }
0x1596   :  { %v1535_v10 = vpop.permute.xlu0 %1534 }
0x1597   :  { %v1539_v18 = vsel %vm235_vm3, %v1538_v14, %v1535_v10 }
0x15f1   :  { %v1521_v13 = vpop.f32.mrb[36].mxu1 }
0x15f2   :  { %v1527_v15 = vsub.f32 %v1521_v13, %v3955_v11  ;;  %v3174_v16 = vpop.f32.mrb[37].mxu1 }
0x15f3   :  { %v1524_v19 = vpop.f32.mrb[38].mxu1 }
0x15f4   :  { %v1540_v20 = vmul.f32 %v1539_v18, %v1527_v15  ;;  %v3175_v22 = vpop.f32.mrb[39].mxu1 }
0x15f6   :  { %v1541_v24 = vpack.c.bf16 %v1540_v20, %v1540_v20 }
0x15f8   :  { %3185 = vmatmul.mubr.msk.bf16.vlgmr.msra.gmra.mrb[44].mxu0 %vm263_vm4, %v1541_v24 }
0x15f9   :  { %3189 = vmatpush3.bf16.msra.mxu0 %v3960_v21  ;;  %3190 = vmatprep.mubr.msk.bf16.mxu0 %vm3732_vm0, %v3731_v0 }
0x15fa   :  { %3212 = vmatprep.subr.bf16.mxu0 %v3731_v0 }
0x1604   :  { %3191 = vmatmul.mubr.msk.bf16.vlgmr.msra.gmra.mrb[44].mxu0 %vm163_vm1, %v1483_v3 }
0x1605   :  { %3213 = vmatpush3.bf16.msra.mxu0 %v3918_v1  ;;  %3214 = vmatprep.mubr.msk.bf16.mxu0 %vm3732_vm0, %v3731_v0 }
0x1606   :  { %3236 = vmatprep.subr.bf16.mxu0 %v3731_v0 }
0x16d7   :  { %v1620_v25 = vpop.f32.mrb[44].mxu0 }
0x16d8   :  { %v3385_v26 = vadd.f32 %v3972_v23, %v1620_v25  ;;  %v3192_v27 = vpop.f32.mrb[45].mxu0 }
0x16d9   :  { %v1623_v28 = vpop.f32.mrb[46].mxu0  ;;  %v4345_v27 = vld [vmem:[#allocation12] sm:$0xff]  }
0x16da   :  { %v1627_v29 = vmul.f32 1.442695, %v3385_v26  ;;  %v3193_v30 = vpop.f32.mrb[47].mxu0 }
0x16dc   :  { %3479 = vpow2.f32 %v1627_v29 }
0x16e6   :  { %v3480_v31 = vpop.eup %3479 }
0x16e7   :  { %v1629_v32 = vsel %vm363_vm5, %v3480_v31, 0.0 }
0x16e8   :  { %1630 = vadd.xlane.f32.xlu0 %v1629_v32 }
0x1775   :  { %v1631_v34 = vpop.xlane.xlu0 %1630 }
0x1776   :  { %3481 = vrcp.f32 %v1631_v34 }
0x1780   :  { %v3482_v1 = vpop.eup %3481 }
0x1781   :  { %v1633_v35 = vmul.f32 %v3482_v1, %v3480_v31 }
0x1783   :  { %v1634_v36 = vpack.c.bf16 %v1633_v35, %v1633_v35 }
0x1785   :  { %3197 = vmatmul.mubr.msk.bf16.vlgmr.msra.gmra.mrb[40].mxu1 %vm363_vm5, %v1634_v36 }
0x1786   :  { %3201 = vmatpush3.bf16.msra.mxu1 %v3980_v37  ;;  %3208 = vmatprep.mubr.msk.bf16.mxu1 %vm3732_vm0, %v3731_v0 }
0x1787   :  { %3202 = vmatprep.subr.bf16.mxu1 %v3731_v0 }
0x178a   :  { %3203 = vmatpush3.bf16.msra.mxu1 %v3984_v39 }
0x178b   :  { %3204 = vmatprep.subr.bf16.mxu1 %v3731_v0 }
0x178e   :  { %3205 = vmatpush3.bf16.msra.mxu1 %v3990_v40 }
0x178f   :  { %3206 = vmatprep.subr.bf16.mxu1 %v3731_v0 }
0x1792   :  { %3207 = vmatpush3.bf16.msra.mxu1 %v3995_v41 }
0x1793   :  { %3218 = vmatprep.subr.bf16.mxu1 %v3731_v0 }
0x1858   :  { %v1672_v38 = vpop.f32.mrb[40].mxu1 }
0x1859   :  { %v1678_v42 = vmul.f32 %v1672_v38, %v1527_v15  ;;  %v3198_v43 = vpop.f32.mrb[41].mxu1 }
0x185a   :  { %v1675_v44 = vpop.f32.mrb[42].mxu1 }
0x185b   :  { %v1679_v45 = vpack.c.bf16 %v1678_v42, %v1678_v42  ;;  %v3199_v46 = vpop.f32.mrb[43].mxu1 }
0x185c   :  { %v4383_v46 = vld [vmem:[#allocation9] ss:$0 sm:$0xff] }
0x185d   :  { %3209 = vmatmul.mubr.msk.bf16.vlgmr.msra.gmra.mrb[44].mxu1 %vm263_vm4, %v1679_v45 }
0x185e   :  { %3219 = vmatpush3.bf16.msra.mxu1 %v3929_v4  ;;  %3226 = vmatprep.mubr.msk.bf16.mxu1 %vm3732_vm0, %v3731_v0 }
0x185f   :  { %3220 = vmatprep.subr.bf16.mxu1 %v3731_v0 }
0x1862   :  { %3221 = vmatpush3.bf16.msra.mxu1 %v3935_v5 }
0x1863   :  { %3222 = vmatprep.subr.bf16.mxu1 %v3731_v0 }
0x1866   :  { %3223 = vmatpush3.bf16.msra.mxu1 %v3944_v6 }
0x1867   :  { %3224 = vmatprep.subr.bf16.mxu1 %v3731_v0 }
0x186a   :  { %3225 = vmatpush3.bf16.msra.mxu1 %v3949_v7 }
0x186b   :  { %3230 = vmatprep.subr.bf16.mxu1 %v3731_v0 }
0x1930   :  { %v1717_v47 = vpop.f32.mrb[44].mxu1 }
0x1931   :  { %v1723_v48 = vsub.f32 0.0, %v1717_v47  ;;  %v3210_v4 = vpop.f32.mrb[45].mxu1 }
0x1932   :  { %v1720_v50 = vpop.f32.mrb[46].mxu1 }
0x1933   :  { %v1724_v51 = vmul.f32 %v1723_v48, %v4013_v49  ;;  %v3211_v52 = vpop.f32.mrb[47].mxu1 }
0x1935   :  { %v4299_v53 = vadd.f32 %v1724_v51, %v4243_v2 }
0x1937   :  { %1777 = vrot.lane.b32.xlu1 %v4299_v53, %s3733_s7  ;;  %v1732_v5 = vpack.c.bf16 %v4299_v53, %v4299_v53 }
0x1939   :  { %3215 = vmatmul.mubr.msk.bf16.vlgmr.msra.gmra.mrb[48].mxu0 %vm163_vm1, %v1732_v5 }
0x193a   :  { %3237 = vmatpush3.bf16.msra.mxu0 %v3976_v33  ;;  %3238 = vmatprep.mubr.msk.bf16.mxu0 %vm3732_vm0, %v3731_v0 }
0x193b   :  { %1780 = vrot.lane.b32.xlu1 %v4299_v53, %s3735_s2  ;;  %3242 = vmatprep.subr.bf16.mxu0 %v3731_v0 }
0x193f   :  { %1783 = vrot.lane.b32.xlu1 %v4299_v53, %s3734_s25 }
0x19a9   :  { %v1778_v6 = vpop.permute.xlu1 %1777 }
0x19aa   :  { %v1786_v55 = vsel %vm163_vm1, %v4299_v53, %v1778_v6  ;;  %v4388_v6 = vld [vmem:[#allocation11] sm:$0xff]  }
0x19ad   :  { %v1781_v7 = vpop.permute.xlu1 %1780 }
0x19ae   :  { %v1787_v57 = vsel %vm233_vm2, %v1786_v55, %v1781_v7 }
0x19b1   :  { %v1784_v54 = vpop.permute.xlu1 %1783 }
0x19b2   :  { %v1788_v60 = vsel %vm235_vm3, %v1787_v57, %v1784_v54  ;;  %v4399_v54 = vld [vmem:[#allocation6] ss:$0 sm:$0xff] }
0x1a0c   :  { %v1770_v56 = vpop.f32.mrb[48].mxu0 }
0x1a0d   :  { %v1776_v58 = vsub.f32 %v1770_v56, %v3955_v11  ;;  %v3216_v59 = vpop.f32.mrb[49].mxu0 }
0x1a0e   :  { %v1773_v61 = vpop.f32.mrb[50].mxu0 }
0x1a0f   :  { %v1789_v62 = vmul.f32 %v1788_v60, %v1776_v58  ;;  %v3217_v63 = vpop.f32.mrb[51].mxu0 }
0x1a11   :  { %v1790_v3 = vpack.c.bf16 %v1789_v62, %v1789_v62 }
0x1a13   :  { %3227 = vmatmul.mubr.msk.bf16.vlgmr.msra.gmra.mrb[48].mxu1 %vm263_vm4, %v1790_v3 }
0x1a14   :  { %3231 = vmatpush3.bf16.msra.mxu1 %v3960_v21  ;;  %3232 = vmatprep.mubr.msk.bf16.mxu1 %vm3732_vm0, %v3731_v0 }
0x1a15   :  { %3254 = vmatprep.subr.bf16.mxu1 %v3731_v0 }
0x1a1f   :  { %3233 = vmatmul.mubr.msk.bf16.vlgmr.msra.gmra.mrb[48].mxu1 %vm163_vm1, %v1732_v5 }
0x1a20   :  { %3255 = vmatpush3.bf16.msra.mxu1 %v4325_v8  ;;  %3256 = vmatprep.mubr.msk.bf16.mxu1 %vm3732_vm0, %v3731_v0 }
0x1a21   :  { %3278 = vmatprep.subr.bf16.mxu1 %v3731_v0 }
0x1af2   :  { %v1869_v11 = vpop.f32.mrb[48].mxu1 }
0x1af3   :  { %v3386_v9 = vadd.f32 %v3972_v23, %v1869_v11  ;;  %v3234_v21 = vpop.f32.mrb[49].mxu1 }
0x1af4   :  { %v1872_v10 = vpop.f32.mrb[50].mxu1  ;;  %v4410_v21 = vld [vmem:[#allocation15 + $0x8] sm:$0xff]  }
0x1af5   :  { %v1876_v12 = vmul.f32 1.442695, %v3386_v9  ;;  %v3235_v13 = vpop.f32.mrb[51].mxu1  ;;  %v4404_v9 = vld [vmem:[#allocation15] sm:$0xff]   ;;  %v4414_v10 = vld [vmem:[#allocation15 + $0x10] sm:$0xff]  }
0x1af7   :  { %3483 = vpow2.f32 %v1876_v12  ;;  %v4418_v12 = vld [vmem:[#allocation15 + $0x18] sm:$0xff]  }
0x1b01   :  { %v3484_v14 = vpop.eup %3483 }
0x1b02   :  { %v1878_v15 = vsel %vm363_vm5, %v3484_v14, 0.0 }
0x1b03   :  { %1879 = vadd.xlane.f32.xlu1 %v1878_v15 }
0x1b90   :  { %v1880_v16 = vpop.xlane.xlu1 %1879 }
0x1b91   :  { %3485 = vrcp.f32 %v1880_v16 }
0x1b9b   :  { %v3486_v18 = vpop.eup %3485 }
0x1b9c   :  { %v1882_v19 = vmul.f32 %v3486_v18, %v3484_v14 }
0x1b9e   :  { %v1883_v20 = vpack.c.bf16 %v1882_v19, %v1882_v19 }
0x1ba0   :  { %3239 = vmatmul.mubr.msk.bf16.vlgmr.msra.gmra.mrb[52].mxu0 %vm363_vm5, %v1883_v20 }
0x1ba1   :  { %3243 = vmatpush3.bf16.msra.mxu0 %v3980_v37  ;;  %3250 = vmatprep.mubr.msk.bf16.mxu0 %vm3732_vm0, %v3731_v0 }
0x1ba2   :  { %3244 = vmatprep.subr.bf16.mxu0 %v3731_v0 }
0x1ba5   :  { %3245 = vmatpush3.bf16.msra.mxu0 %v3984_v39  ;;  %v4351_v39 = vld [vmem:[#allocation12 + $0x8] sm:$0xff]  }
0x1ba6   :  { %3246 = vmatprep.subr.bf16.mxu0 %v3731_v0 }
0x1ba9   :  { %3247 = vmatpush3.bf16.msra.mxu0 %v3990_v40  ;;  %v4355_v40 = vld [vmem:[#allocation12 + $0x10] sm:$0xff]  }
0x1baa   :  { %3248 = vmatprep.subr.bf16.mxu0 %v3731_v0 }
0x1bad   :  { %3249 = vmatpush3.bf16.msra.mxu0 %v3995_v41  ;;  %v4359_v41 = vld [vmem:[#allocation12 + $0x18] sm:$0xff]  }
0x1bae   :  { %3260 = vmatprep.subr.bf16.mxu0 %v3731_v0 }
0x1c73   :  { %v1921_v23 = vpop.f32.mrb[52].mxu0 }
0x1c74   :  { %v1927_v22 = vmul.f32 %v1921_v23, %v1776_v58  ;;  %v3240_v37 = vpop.f32.mrb[53].mxu0 }
0x1c75   :  { %v1924_v24 = vpop.f32.mrb[54].mxu0 }
0x1c76   :  { %v1928_v25 = vpack.c.bf16 %v1927_v22, %v1927_v22  ;;  %v3241_v26 = vpop.f32.mrb[55].mxu0 }
0x1c78   :  { %3251 = vmatmul.mubr.msk.bf16.vlgmr.msra.gmra.mrb[56].mxu0 %vm263_vm4, %v1928_v25 }
0x1c79   :  { %3261 = vmatpush3.bf16.msra.mxu0 %v4345_v27  ;;  %3268 = vmatprep.mubr.msk.bf16.mxu0 %vm3732_vm0, %v3731_v0 }
0x1c7a   :  { %3262 = vmatprep.subr.bf16.mxu0 %v3731_v0 }
0x1c7d   :  { %3263 = vmatpush3.bf16.msra.mxu0 %v4351_v39 }
0x1c7e   :  { %3264 = vmatprep.subr.bf16.mxu0 %v3731_v0 }
0x1c81   :  { %3265 = vmatpush3.bf16.msra.mxu0 %v4355_v40 }
0x1c82   :  { %3266 = vmatprep.subr.bf16.mxu0 %v3731_v0 }
0x1c85   :  { %3267 = vmatpush3.bf16.msra.mxu0 %v4359_v41 }
0x1c86   :  { %3272 = vmatprep.subr.bf16.mxu0 %v3731_v0 }
0x1d4b   :  { %v1966_v28 = vpop.f32.mrb[56].mxu0 }
0x1d4c   :  { %v1972_v29 = vsub.f32 0.0, %v1966_v28  ;;  %v3252_v30 = vpop.f32.mrb[57].mxu0 }
0x1d4d   :  { %v1969_v31 = vpop.f32.mrb[58].mxu0 }
0x1d4e   :  { %v1973_v32 = vmul.f32 %v1972_v29, %v4013_v49  ;;  %v3253_v34 = vpop.f32.mrb[59].mxu0 }
0x1d50   :  { %v4365_v1 = vadd.f32 %v1973_v32, %v4299_v53 }
0x1d52   :  { %2026 = vrot.lane.b32.xlu0 %v4365_v1, %s3733_s7  ;;  %v1981_v35 = vpack.c.bf16 %v4365_v1, %v4365_v1 }
0x1d54   :  { %3257 = vmatmul.mubr.msk.bf16.vlgmr.msra.gmra.mrb[52].mxu1 %vm163_vm1, %v1981_v35 }
0x1d55   :  { %3279 = vmatpush3.bf16.msra.mxu1 %v3976_v33  ;;  %3280 = vmatprep.mubr.msk.bf16.mxu1 %vm3732_vm0, %v3731_v0 }
0x1d56   :  { %2029 = vrot.lane.b32.xlu0 %v4365_v1, %s3735_s2  ;;  %3284 = vmatprep.subr.bf16.mxu1 %v3731_v0 }
0x1d5a   :  { %2032 = vrot.lane.b32.xlu0 %v4365_v1, %s3734_s25 }
0x1dc4   :  { %v2027_v36 = vpop.permute.xlu0 %2026 }
0x1dc5   :  { %v2035_v43 = vsel %vm163_vm1, %v4365_v1, %v2027_v36 }
0x1dc8   :  { %v2030_v38 = vpop.permute.xlu0 %2029 }
0x1dc9   :  { %v2036_v45 = vsel %vm233_vm2, %v2035_v43, %v2030_v38 }
0x1dcc   :  { %v2033_v42 = vpop.permute.xlu0 %2032 }
0x1dcd   :  { %v2037_v4 = vsel %vm235_vm3, %v2036_v45, %v2033_v42 }
0x1e27   :  { %v2019_v44 = vpop.f32.mrb[52].mxu1 }
0x1e28   :  { %v2025_v47 = vsub.f32 %v2019_v44, %v4383_v46  ;;  %v3258_v48 = vpop.f32.mrb[53].mxu1 }
0x1e29   :  { %v2022_v50 = vpop.f32.mrb[54].mxu1 }
0x1e2a   :  { %v2038_v51 = vmul.f32 %v2037_v4, %v2025_v47  ;;  %v3259_v52 = vpop.f32.mrb[55].mxu1 }
0x1e2c   :  { %v2039_v5 = vpack.c.bf16 %v2038_v51, %v2038_v51 }
0x1e2e   :  { %3269 = vmatmul.mubr.msk.bf16.vlgmr.msra.gmra.mrb[60].mxu0 %vm263_vm4, %v2039_v5 }
0x1e2f   :  { %3273 = vmatpush3.bf16.msra.mxu0 %v4388_v6  ;;  %3274 = vmatprep.mubr.msk.bf16.mxu0 %vm3732_vm0, %v3731_v0 }
0x1e30   :  { %3296 = vmatprep.subr.bf16.mxu0 %v3731_v0 }
0x1e3a   :  { %3275 = vmatmul.mubr.msk.bf16.vlgmr.msra.gmra.mrb[60].mxu0 %vm163_vm1, %v1981_v35 }
0x1e3b   :  { %3297 = vmatpush3.bf16.msra.mxu0 %v4325_v8  ;;  %3298 = vmatprep.mubr.msk.bf16.mxu0 %vm3732_vm0, %v3731_v0 }
0x1e3c   :  { %3320 = vmatprep.subr.bf16.mxu0 %v3731_v0 }
0x1f0d   :  { %v2118_v7 = vpop.f32.mrb[60].mxu0 }
0x1f0e   :  { %v3387_v55 = vadd.f32 %v4399_v54, %v2118_v7  ;;  %v3276_v56 = vpop.f32.mrb[61].mxu0 }
0x1f0f   :  { %v2121_v57 = vpop.f32.mrb[62].mxu0 }
0x1f10   :  { %v2125_v58 = vmul.f32 1.442695, %v3387_v55  ;;  %v3277_v59 = vpop.f32.mrb[63].mxu0 }
0x1f12   :  { %3487 = vpow2.f32 %v2125_v58 }
0x1f1c   :  { %v3488_v60 = vpop.eup %3487 }
0x1f1d   :  { %v2127_v61 = vsel %vm363_vm5, %v3488_v60, 0.0 }
0x1f1e   :  { %2128 = vadd.xlane.f32.xlu0 %v2127_v61 }
0x1fab   :  { %v2129_v62 = vpop.xlane.xlu0 %2128 }
0x1fac   :  { %3489 = vrcp.f32 %v2129_v62 }
0x1fb6   :  { %v3490_v63 = vpop.eup %3489 }
0x1fb7   :  { %v2131_v3 = vmul.f32 %v3490_v63, %v3488_v60 }
0x1fb9   :  { %v2132_v11 = vpack.c.bf16 %v2131_v3, %v2131_v3 }
0x1fbb   :  { %3281 = vmatmul.mubr.msk.bf16.vlgmr.msra.gmra.mrb[56].mxu1 %vm363_vm5, %v2132_v11 }
0x1fbc   :  { %3285 = vmatpush3.bf16.msra.mxu1 %v4404_v9  ;;  %3292 = vmatprep.mubr.msk.bf16.mxu1 %vm3732_vm0, %v3731_v0 }
0x1fbd   :  { %3286 = vmatprep.subr.bf16.mxu1 %v3731_v0 }
0x1fc0   :  { %3287 = vmatpush3.bf16.msra.mxu1 %v4410_v21 }
0x1fc1   :  { %3288 = vmatprep.subr.bf16.mxu1 %v3731_v0 }
0x1fc4   :  { %3289 = vmatpush3.bf16.msra.mxu1 %v4414_v10 }
0x1fc5   :  { %3290 = vmatprep.subr.bf16.mxu1 %v3731_v0 }
0x1fc8   :  { %3291 = vmatpush3.bf16.msra.mxu1 %v4418_v12 }
0x1fc9   :  { %3302 = vmatprep.subr.bf16.mxu1 %v3731_v0 }
0x208e   :  { %v2170_v13 = vpop.f32.mrb[56].mxu1 }
0x208f   :  { %v2176_v14 = vmul.f32 %v2170_v13, %v2025_v47  ;;  %v3282_v15 = vpop.f32.mrb[57].mxu1 }
0x2090   :  { %v2173_v16 = vpop.f32.mrb[58].mxu1 }
0x2091   :  { %v2177_v18 = vpack.c.bf16 %v2176_v14, %v2176_v14  ;;  %v3283_v19 = vpop.f32.mrb[59].mxu1 }
0x2093   :  { %3293 = vmatmul.mubr.msk.bf16.vlgmr.msra.gmra.mrb[60].mxu1 %vm263_vm4, %v2177_v18 }
0x2094   :  { %3303 = vmatpush3.bf16.msra.mxu1 %v4345_v27  ;;  %3310 = vmatprep.mubr.msk.bf16.mxu1 %vm3732_vm0, %v3731_v0 }
0x2095   :  { %3304 = vmatprep.subr.bf16.mxu1 %v3731_v0 }
0x2098   :  { %3305 = vmatpush3.bf16.msra.mxu1 %v4351_v39 }
0x2099   :  { %3306 = vmatprep.subr.bf16.mxu1 %v3731_v0 }
0x209c   :  { %3307 = vmatpush3.bf16.msra.mxu1 %v4355_v40 }
0x209d   :  { %3308 = vmatprep.subr.bf16.mxu1 %v3731_v0 }
0x20a0   :  { %3309 = vmatpush3.bf16.msra.mxu1 %v4359_v41 }
0x20a1   :  { %3314 = vmatprep.subr.bf16.mxu1 %v3731_v0 }
0x2166   :  { %v2215_v20 = vpop.f32.mrb[60].mxu1 }
0x2167   :  { %v2221_v23 = vsub.f32 0.0, %v2215_v20  ;;  %v3294_v22 = vpop.f32.mrb[61].mxu1 }
0x2168   :  { %v2218_v37 = vpop.f32.mrb[62].mxu1 }
0x2169   :  { %v2222_v24 = vmul.f32 %v2221_v23, %v4013_v49  ;;  %v3295_v25 = vpop.f32.mrb[63].mxu1 }
0x216b   :  { %v4436_v26 = vadd.f32 %v2222_v24, %v4365_v1 }
0x216d   :  { %2271 = vrot.lane.b32.xlu1 %v4436_v26, %s3733_s7  ;;  %v2225_v28 = vpack.c.bf16 %v4436_v26, %v4436_v26  ;;  %2224 = vst.msk [vmem:[#allocation17 + $0x8] sm:$0xff] %vm163_vm1, %v4436_v26 }
0x216f   :  { %3299 = vmatmul.mubr.msk.bf16.vlgmr.msra.gmra.mrb[64].mxu0 %vm163_vm1, %v2225_v28 }
0x2170   :  { %3321 = vmatpush3.bf16.msra.mxu0 %v3976_v33  ;;  %3322 = vmatprep.mubr.msk.bf16.mxu0 %vm3732_vm0, %v3731_v0 }
0x2171   :  { %2274 = vrot.lane.b32.xlu1 %v4436_v26, %s3735_s2  ;;  %3326 = vmatprep.subr.bf16.mxu0 %v3731_v0 }
0x2175   :  { %2277 = vrot.lane.b32.xlu1 %v4436_v26, %s3734_s25 }
0x21df   :  { %v2272_v29 = vpop.permute.xlu1 %2271 }
0x21e0   :  { %v2280_v32 = vsel %vm163_vm1, %v4436_v26, %v2272_v29 }
0x21e3   :  { %v2275_v30 = vpop.permute.xlu1 %2274 }
0x21e4   :  { %v2281_v35 = vsel %vm233_vm2, %v2280_v32, %v2275_v30 }
0x21e7   :  { %v2278_v31 = vpop.permute.xlu1 %2277 }
0x21e8   :  { %v2282_v42 = vsel %vm235_vm3, %v2281_v35, %v2278_v31 }
0x2242   :  { %v2263_v34 = vpop.f32.mrb[64].mxu0 }
0x2243   :  { %v2269_v36 = vsub.f32 %v2263_v34, %v4383_v46  ;;  %v3300_v38 = vpop.f32.mrb[65].mxu0 }
0x2244   :  { %v2266_v43 = vpop.f32.mrb[66].mxu0 }
0x2245   :  { %v2283_v44 = vmul.f32 %v2282_v42, %v2269_v36  ;;  %v3301_v45 = vpop.f32.mrb[67].mxu0 }
0x2247   :  { %v2284_v47 = vpack.c.bf16 %v2283_v44, %v2283_v44 }
0x2249   :  { %3311 = vmatmul.mubr.msk.bf16.vlgmr.msra.gmra.mrb[64].mxu1 %vm263_vm4, %v2284_v47 }
0x224a   :  { %3315 = vmatpush3.bf16.msra.mxu1 %v4388_v6  ;;  %3316 = vmatprep.mubr.msk.bf16.mxu1 %vm3732_vm0, %v3731_v0 }
0x224b   :  { %3338 = vmatprep.subr.bf16.mxu1 %v3731_v0 }
0x2255   :  { %3317 = vmatmul.mubr.msk.bf16.vlgmr.msra.gmra.mrb[64].mxu1 %vm163_vm1, %v2225_v28 }
0x2256   :  { %3339 = vmatpush3.bf16.msra.mxu1 %v4325_v8  ;;  %3340 = vmatprep.mubr.msk.bf16.mxu1 %vm3732_vm0, %v3731_v0 }
0x2257   :  { %3362 = vmatprep.subr.bf16.mxu1 %v3731_v0 }
0x2328   :  { %v2363_v48 = vpop.f32.mrb[64].mxu1 }
0x2329   :  { %v3388_v4 = vadd.f32 %v4399_v54, %v2363_v48  ;;  %v3318_v50 = vpop.f32.mrb[65].mxu1 }
0x232a   :  { %v2366_v51 = vpop.f32.mrb[66].mxu1 }
0x232b   :  { %v2370_v52 = vmul.f32 1.442695, %v3388_v4  ;;  %v3319_v5 = vpop.f32.mrb[67].mxu1 }
0x232d   :  { %3491 = vpow2.f32 %v2370_v52 }
0x2337   :  { %v3492_v7 = vpop.eup %3491 }
0x2338   :  { %v2372_v55 = vsel %vm363_vm5, %v3492_v7, 0.0 }
0x2339   :  { %2373 = vadd.xlane.f32.xlu1 %v2372_v55 }
0x234a   :  { %1229 = vrot.lane.b32.xlu1 %v4187_v17, %s3725_s12  ;;  %s3739_s12 = smov [#allocation17]  }
0x234b   :  { %s2725_s21 = sshll.u32 %s3739_s12, 4  ;;  %s2726_s21 = int_to_ptr.vmem [resolvable:$true] %s2725_s21 }
0x234c   :  { %s3687_s22 = scalar_lea.vmem %s2726_s21, 256  ;;  %p3692_p9 = scmp.lt.s32.totalorder %s2726_s21, %s2726_s21 }
0x234d   :  { %p3688_p8 = scmp.ne.s32.totalorder %s2726_s21, %s3687_s22  ;;  %p3693_p10 = scmp.lt.s32.totalorder %s3687_s22, %s3687_s22 }
0x234e   :  { %1478 = vrot.lane.b32.xlu1 %v4243_v2, %s3736_s8 }
0x234f   :  { %p3694_p11 = por %p3693_p10, %p3692_p9 }
0x2351   :  { %p3695_p12 = pnand %p3694_p11, %p3688_p8 }
0x2352   :  { %1727 = vrot.lane.b32.xlu1 %v4299_v53, %s3737_s18 }
0x2356   :  { %1976 = vrot.lane.b32.xlu1 %v4365_v1, %s3738_s19 }
0x23c6   :  { %v2374_v8 = vpop.xlane.xlu1 %2373 }
0x23c7   :  { %3493 = vrcp.f32 %v2374_v8 }
0x23ca   :  { %v1230_v56 = vpop.permute.xlu1 %1229 }
0x23cb   :  { %1233 = vst.msk [vmem:[#allocation17] sm:$0xff] %vm1232_vm11, %v1230_v56 }
0x23ce   :  { %v1479_v57 = vpop.permute.xlu1 %1478 }
0x23cf   :  { %1482 = vst.msk [vmem:[#allocation17] sm:$0xff] %vm1481_vm12, %v1479_v57 }
0x23d1   :  { %v3494_v58 = vpop.eup %3493 }
0x23d2   :  { %v2376_v17 = vmul.f32 %v3494_v58, %v3492_v7  ;;  %v1728_v59 = vpop.permute.xlu1 %1727 }
0x23d3   :  { %1731 = vst.msk [vmem:[#allocation17] sm:$0xff] %vm1730_vm13, %v1728_v59 }
0x23d4   :  { %v2377_v2 = vpack.c.bf16 %v2376_v17, %v2376_v17 }
0x23d6   :  { %3323 = vmatmul.mubr.msk.bf16.vlgmr.msra.gmra.mrb[68].mxu0 %vm363_vm5, %v2377_v2  ;;  %v1977_v53 = vpop.permute.xlu1 %1976 }
0x23d7   :  { %3327 = vmatpush3.bf16.msra.mxu0 %v4404_v9  ;;  %3334 = vmatprep.mubr.msk.bf16.mxu0 %vm3732_vm0, %v3731_v0  ;;  %1980 = vst.msk [vmem:[#allocation17] sm:$0xff] %vm1979_vm14, %v1977_v53 }
0x23d8   :  { %3328 = vmatprep.subr.bf16.mxu0 %v3731_v0 }
0x23db   :  { %3329 = vmatpush3.bf16.msra.mxu0 %v4410_v21 }
0x23dc   :  { %3330 = vmatprep.subr.bf16.mxu0 %v3731_v0 }
0x23df   :  { %3331 = vmatpush3.bf16.msra.mxu0 %v4414_v10 }
0x23e0   :  { %3332 = vmatprep.subr.bf16.mxu0 %v3731_v0 }
0x23e3   :  { %3333 = vmatpush3.bf16.msra.mxu0 %v4418_v12 }
0x23e4   :  { %3344 = vmatprep.subr.bf16.mxu0 %v3731_v0 }
0x24a9   :  { %v2415_v1 = vpop.f32.mrb[68].mxu0 }
0x24aa   :  { %v2421_v60 = vmul.f32 %v2415_v1, %v2269_v36  ;;  %v3324_v61 = vpop.f32.mrb[69].mxu0 }
0x24ab   :  { %v2418_v62 = vpop.f32.mrb[70].mxu0 }
0x24ac   :  { %v2422_v63 = vpack.c.bf16 %v2421_v60, %v2421_v60  ;;  %v3325_v3 = vpop.f32.mrb[71].mxu0 }
0x24ae   :  { %3335 = vmatmul.mubr.msk.bf16.vlgmr.msra.gmra.mrb[72].mxu0 %vm263_vm4, %v2422_v63 }
0x24af   :  { %3345 = vmatpush3.bf16.msra.mxu0 %v4345_v27  ;;  %3352 = vmatprep.mubr.msk.bf16.mxu0 %vm3732_vm0, %v3731_v0 }
0x24b0   :  { %3346 = vmatprep.subr.bf16.mxu0 %v3731_v0 }
0x24b3   :  { %3347 = vmatpush3.bf16.msra.mxu0 %v4351_v39 }
0x24b4   :  { %3348 = vmatprep.subr.bf16.mxu0 %v3731_v0 }
0x24b7   :  { %3349 = vmatpush3.bf16.msra.mxu0 %v4355_v40 }
0x24b8   :  { %3350 = vmatprep.subr.bf16.mxu0 %v3731_v0 }
0x24bb   :  { %3351 = vmatpush3.bf16.msra.mxu0 %v4359_v41 }
0x24bc   :  { %3356 = vmatprep.subr.bf16.mxu0 %v3731_v0 }
0x2581   :  { %v2460_v11 = vpop.f32.mrb[72].mxu0 }
0x2582   :  { %v2466_v13 = vsub.f32 0.0, %v2460_v11  ;;  %v3336_v27 = vpop.f32.mrb[73].mxu0 }
0x2583   :  { %v2463_v14 = vpop.f32.mrb[74].mxu0 }
0x2584   :  { %v2467_v15 = vmul.f32 %v2466_v13, %v4013_v49  ;;  %v3337_v16 = vpop.f32.mrb[75].mxu0 }
0x2586   :  { %v4499_v18 = vadd.f32 %v2467_v15, %v4436_v26 }
0x2588   :  { %2470 = vrot.lane.b32.xlu0 %v4499_v18, %s3733_s7  ;;  %v2474_v39 = vpack.c.bf16 %v4499_v18, %v4499_v18 }
0x258a   :  { %3341 = vmatmul.mubr.msk.bf16.vlgmr.msra.gmra.mrb[68].mxu1 %vm163_vm1, %v2474_v39 }
0x258b   :  { %3363 = vmatpush3.bf16.msra.mxu1 %v3976_v33  ;;  %3364 = vmatprep.mubr.msk.bf16.mxu1 %vm3732_vm0, %v3731_v0 }
0x258c   :  { %2519 = vrot.lane.b32.xlu0 %v4499_v18, %s3735_s2  ;;  %3368 = vmatprep.subr.bf16.mxu1 %v3731_v0 }
0x2590   :  { %2522 = vrot.lane.b32.xlu0 %v4499_v18, %s3734_s25 }
0x25fa   :  { %v2471_v40 = vpop.permute.xlu0 %2470 }
0x25fb   :  { %2473 = vst.msk [vmem:[#allocation17 + $0x8] sm:$0xff] %vm494_vm7, %v2471_v40  ;;  %v2525_v20 = vsel %vm163_vm1, %v4499_v18, %v2471_v40 }
0x25fe   :  { %v2520_v41 = vpop.permute.xlu0 %2519 }
0x25ff   :  { %v2526_v23 = vsel %vm233_vm2, %v2525_v20, %v2520_v41 }
0x2602   :  { %v2523_v19 = vpop.permute.xlu0 %2522 }
0x2603   :  { %v2527_v24 = vsel %vm235_vm3, %v2526_v23, %v2523_v19 }
0x265d   :  { %v2512_v33 = vpop.f32.mrb[68].mxu1 }
0x265e   :  { %v2518_v22 = vsub.f32 %v2512_v33, %v4383_v46  ;;  %v3342_v37 = vpop.f32.mrb[69].mxu1 }
0x265f   :  { %v2515_v25 = vpop.f32.mrb[70].mxu1 }
0x2660   :  { %v2528_v26 = vmul.f32 %v2527_v24, %v2518_v22  ;;  %v3343_v28 = vpop.f32.mrb[71].mxu1 }
0x2662   :  { %v2529_v29 = vpack.c.bf16 %v2528_v26, %v2528_v26 }
0x2664   :  { %3353 = vmatmul.mubr.msk.bf16.vlgmr.msra.gmra.mrb[76].mxu0 %vm263_vm4, %v2529_v29 }
0x2665   :  { %3357 = vmatpush3.bf16.msra.mxu0 %v4388_v6  ;;  %3358 = vmatprep.mubr.msk.bf16.mxu0 %vm3732_vm0, %v3731_v0 }
0x2670   :  { %3359 = vmatmul.mubr.msk.bf16.vlgmr.msra.gmra.mrb[76].mxu0 %vm163_vm1, %v2474_v39 }
0x2743   :  { %v2608_v30 = vpop.f32.mrb[76].mxu0 }
0x2744   :  { %v3389_v31 = vadd.f32 %v4399_v54, %v2608_v30  ;;  %v3360_v46 = vpop.f32.mrb[77].mxu0 }
0x2745   :  { %v2611_v32 = vpop.f32.mrb[78].mxu0 }
0x2746   :  { %v2615_v34 = vmul.f32 1.442695, %v3389_v31  ;;  %v3361_v35 = vpop.f32.mrb[79].mxu0 }
0x2748   :  { %3495 = vpow2.f32 %v2615_v34 }
0x2752   :  { %v3496_v36 = vpop.eup %3495 }
0x2753   :  { %v2617_v38 = vsel %vm363_vm5, %v3496_v36, 0.0 }
0x2754   :  { %2618 = vadd.xlane.f32.xlu0 %v2617_v38 }
0x27e1   :  { %v2619_v42 = vpop.xlane.xlu0 %2618 }
0x27e2   :  { %3497 = vrcp.f32 %v2619_v42 }
0x27ec   :  { %v3498_v6 = vpop.eup %3497 }
0x27ed   :  { %v2621_v43 = vmul.f32 %v3498_v6, %v3496_v36 }
0x27ef   :  { %v2622_v44 = vpack.c.bf16 %v2621_v43, %v2621_v43 }
0x27f1   :  { %3365 = vmatmul.mubr.msk.bf16.vlgmr.msra.gmra.mrb[72].mxu1 %vm363_vm5, %v2622_v44 }
0x27f2   :  { %3369 = vmatpush3.bf16.msra.mxu1 %v4404_v9  ;;  %3376 = vmatprep.mubr.msk.bf16.mxu1 %vm3732_vm0, %v3731_v0 }
0x27f3   :  { %3370 = vmatprep.subr.bf16.mxu1 %v3731_v0 }
0x27f6   :  { %3371 = vmatpush3.bf16.msra.mxu1 %v4410_v21 }
0x27f7   :  { %3372 = vmatprep.subr.bf16.mxu1 %v3731_v0 }
0x27fa   :  { %3373 = vmatpush3.bf16.msra.mxu1 %v4414_v10 }
0x27fb   :  { %3374 = vmatprep.subr.bf16.mxu1 %v3731_v0 }
0x27fe   :  { %3375 = vmatpush3.bf16.msra.mxu1 %v4418_v12 }
0x28c4   :  { %v2660_v54 = vpop.f32.mrb[72].mxu1 }
0x28c5   :  { %v2666_v45 = vmul.f32 %v2660_v54, %v2518_v22  ;;  %v3366_v47 = vpop.f32.mrb[73].mxu1 }
0x28c6   :  { %v2663_v48 = vpop.f32.mrb[74].mxu1 }
0x28c7   :  { %v2667_v9 = vpack.c.bf16 %v2666_v45, %v2666_v45  ;;  %v3367_v4 = vpop.f32.mrb[75].mxu1 }
0x28c9   :  { %3377 = vmatmul.mubr.msk.bf16.vlgmr.msra.gmra.mrb[76].mxu1 %vm263_vm4, %v2667_v9 }
0x299c   :  { %v2705_v50 = vpop.f32.mrb[76].mxu1 }
0x299d   :  { %v2711_v51 = vsub.f32 0.0, %v2705_v50  ;;  %v3378_v52 = vpop.f32.mrb[77].mxu1 }
0x299e   :  { %v2708_v21 = vpop.f32.mrb[78].mxu1 }
0x299f   :  { %v2712_v5 = vmul.f32 %v2711_v51, %v4013_v49  ;;  %v3379_v7 = vpop.f32.mrb[79].mxu1 }
0x29a1   :  { %v2713_v10 = vadd.f32 %v2712_v5, %v4499_v18 }
0x29a3   :  { %2715 = vrot.lane.b32.xlu0 %v2713_v10, %s3735_s2 }
0x2a15   :  { %v2716_v0 = vpop.permute.xlu0 %2715 }
0x2a16   :  { %2718 = vst.msk [vmem:[#allocation17 + $0x8] sm:$0xff] %vm740_vm8, %v2716_v0 }
0x2a17   :  { %3698 = shalt.err (!%p3695_p12)
}
0x2a18   :  { %s3699_s3 = scalar_lea.hbm %s4563_s9, 256 }
0x2a19   :  { %p3700_p13 = scmp.ne.s32.totalorder %s4563_s9, %s3699_s3  ;;  %p3703_p0 = scmp.lt.u32.totalorder %s3699_s3, %s4563_s9 }
0x2a1b   :  { %p3705_p1 = pnand %p3703_p0, %p3700_p13 }
0x2a1d   :  { %3708 = shalt.err (!%p3705_p1)
}
0x2a1e   :  { %2728 = dma.vmem_to_hbm [thread:$0]  %s2726_s21, 256, %s4563_s9, [#allocation5]  }
0x2a1f   :  { %3719 = dma.done.wait [#allocation5], 256  }
0x2a20   :  { %3720 = vsyncadd [#allocation5], 4294967040 }
0x2a21   :  { %2732 = vsyncpa [#allocation4], 1 }
0x2a22   :  { %2733 = vsyncpa [#allocation7], 1 }
0x2a23   :  { %2734 = vsyncpa [#allocation10], 1 }
0x2a24   :  { %2735 = vsyncpa [#allocation13], 1 }
0x2a25   :  { %2736 = vsyncpa [#allocation16], 1 }
0x2a26   :  { %2737 = vsyncpa [#allocation5], 1 }

// kernel: tpu_custom_call.1
= control target key start
LH: loop header
LB: loop body
LE: loop exit
PB: predicated region body
PF: predicated region fallthrough
CT: control target
= control target key end

     0   :  { %15 = vsyncpa [#allocation4], 0  ;;  %s4554_s0 = inlined_call_operand.hbm [shape: f32[8,16], index: 0, kind: input, shape index: {}]   ;;  %s4555_s1 = inlined_call_operand.hbm [shape: f32[1,4], index: 1, kind: input, shape index: {}]   ;;  %s4556_s2 = inlined_call_operand.hbm [shape: bf16[16,64], index: 2, kind: input, shape index: {}]   ;;  %s4557_s3 = inlined_call_operand.hbm [shape: f32[1,64], index: 3, kind: input, shape index: {}]   ;;  %s4558_s4 = inlined_call_operand.hbm [shape: bf16[16,4], index: 4, kind: input, shape index: {}]   ;;  %s4559_s5 = inlined_call_operand.hbm [shape: bf16[64,4], index: 5, kind: input, shape index: {}]   ;;  %s4560_s6 = inlined_call_operand.hbm [shape: bf16[4,64], index: 6, kind: input, shape index: {}]   ;;  %s4561_s7 = inlined_call_operand.hbm [shape: bf16[64,16], index: 7, kind: input, shape index: {}]   ;;  %s4562_s8 = inlined_call_operand.<no memory space> [shape: f32[1], index: 8, kind: input, shape index: {}]   ;;  %s4563_s9 = inlined_call_operand.hbm [shape: f32[8,256], index: 9, kind: output, shape index: {}]  }
   0x1   :  { %16 = vsyncpa [#allocation7], 0 }
   0x2   :  { %17 = vsyncpa [#allocation10], 0 }
   0x3   :  { %18 = vsyncpa [#allocation13], 0 }
   0x4   :  { %19 = vsyncpa [#allocation16], 0 }
   0x5   :  { %20 = vsyncpa [#allocation5], 0  ;;  %s3721_s30 = smov [#allocation6]   ;;  %s3722_s11 = smov [#allocation9]  }
   0x6   :  { %s37_s10 = sshll.u32 %s3721_s30, 4  ;;  %s59_s12 = sshll.u32 %s3722_s11, 4  ;;  %s38_s10 = int_to_ptr.vmem [resolvable:$true] %s37_s10  ;;  %s60_s12 = int_to_ptr.vmem [resolvable:$true] %s59_s12 }
   0x7   :  { %s3511_s15 = scalar_lea.hbm %s4555_s1, 16 }
   0x8   :  { %p3512_p0 = scmp.ne.s32.totalorder %s4555_s1, %s3511_s15  ;;  %p3515_p1 = scmp.lt.u32.totalorder %s3511_s15, %s4555_s1 }
   0xa   :  { %p3517_p2 = pnand %p3515_p1, %p3512_p0 }
   0xc   :  { %3520 = shalt.err (!%p3517_p2)
}
   0xd   :  { %s3521_s20 = scalar_lea.vmem %s38_s10, 16  ;;  %s3525_s21 = scalar_lea.vmem %s38_s10, 32 }
   0xe   :  { %p3522_p3 = scmp.ne.s32.totalorder %s38_s10, %s3521_s20  ;;  %p3526_p4 = scmp.lt.s32.totalorder %s38_s10, %s38_s10 }
   0xf   :  { %p3527_p5 = scmp.lt.s32.totalorder %s3525_s21, %s3521_s20 }
  0x11   :  { %p3528_p6 = por %p3527_p5, %p3526_p4 }
  0x13   :  { %p3529_p7 = pnand %p3528_p6, %p3522_p3 }
  0x15   :  { %3532 = shalt.err (!%p3529_p7)
}
  0x16   :  { %40 = dma.hbm_to_vmem [thread:$0]  %s4555_s1, 16, %s38_s10, [#allocation7]  }
  0x17   :  { %s3533_s26 = scalar_lea.hbm %s4557_s3, 16 }
  0x18   :  { %p3534_p8 = scmp.ne.s32.totalorder %s4557_s3, %s3533_s26  ;;  %p3537_p9 = scmp.lt.u32.totalorder %s3533_s26, %s4557_s3 }
  0x1a   :  { %p3539_p10 = pnand %p3537_p9, %p3534_p8 }
  0x1c   :  { %3542 = shalt.err (!%p3539_p10)
}
  0x1d   :  { %s3543_s11 = scalar_lea.vmem %s60_s12, 16  ;;  %s3547_s13 = scalar_lea.vmem %s60_s12, 32 }
  0x1e   :  { %p3544_p11 = scmp.ne.s32.totalorder %s60_s12, %s3543_s11  ;;  %p3548_p12 = scmp.lt.s32.totalorder %s60_s12, %s60_s12 }
  0x1f   :  { %p3549_p13 = scmp.lt.s32.totalorder %s3547_s13, %s3543_s11 }
  0x21   :  { %p3550_p0 = por %p3549_p13, %p3548_p12 }
  0x23   :  { %p3551_p1 = pnand %p3550_p0, %p3544_p11 }
  0x25   :  { %3554 = shalt.err (!%p3551_p1)
}
  0x26   :  { %62 = dma.hbm_to_vmem [thread:$0]  %s4557_s3, 16, %s60_s12, [#allocation10]  }
  0x27   :  { %s3723_s14 = smov [#allocation12]   ;;  %s3724_s16 = smov [#allocation3]  }
  0x28   :  { %s80_s15 = sshll.u32 %s3723_s14, 4  ;;  %s27_s17 = sshll.u32 %s3724_s16, 4  ;;  %s81_s15 = int_to_ptr.vmem [resolvable:$true] %s80_s15  ;;  %s28_s17 = int_to_ptr.vmem [resolvable:$true] %s27_s17 }
  0x29   :  { %s3555_s20 = scalar_lea.hbm %s4559_s5, 512 }
  0x2a   :  { %p3556_p2 = scmp.ne.s32.totalorder %s4559_s5, %s3555_s20  ;;  %p3559_p3 = scmp.lt.u32.totalorder %s3555_s20, %s4559_s5 }
  0x2c   :  { %p3561_p4 = pnand %p3559_p3, %p3556_p2 }
  0x2e   :  { %3564 = shalt.err (!%p3561_p4)
}
  0x2f   :  { %s3565_s3 = scalar_lea.vmem %s81_s15, 512  ;;  %p3570_p6 = scmp.lt.s32.totalorder %s81_s15, %s81_s15 }
  0x30   :  { %p3566_p5 = scmp.ne.s32.totalorder %s81_s15, %s3565_s3  ;;  %p3571_p7 = scmp.lt.s32.totalorder %s3565_s3, %s3565_s3 }
  0x32   :  { %p3572_p8 = por %p3571_p7, %p3570_p6 }
  0x34   :  { %p3573_p9 = pnand %p3572_p8, %p3566_p5 }
  0x36   :  { %3576 = shalt.err (!%p3573_p9)
}
  0x37   :  { %s3725_s12 = smov 64   ;;  %s3726_s25 = smov 4  }
  0x38   :  { %86 = dma.hbm_to_vmem [thread:$0]  %s4559_s5, 512, %s81_s15, [#allocation13], %s3725_s12, %s3725_s12, %s3726_s25  }
  0x39   :  { %s3577_s30 = scalar_lea.hbm %s4554_s0, 128 }
  0x3a   :  { %p3578_p10 = scmp.ne.s32.totalorder %s4554_s0, %s3577_s30  ;;  %p3581_p11 = scmp.lt.u32.totalorder %s3577_s30, %s4554_s0 }
  0x3c   :  { %p3583_p12 = pnand %p3581_p11, %p3578_p10 }
  0x3e   :  { %3586 = shalt.err (!%p3583_p12)
}
  0x3f   :  { %s3587_s14 = scalar_lea.vmem %s28_s17, 128  ;;  %p3592_p0 = scmp.lt.s32.totalorder %s28_s17, %s28_s17 }
  0x40   :  { %p3588_p13 = scmp.ne.s32.totalorder %s28_s17, %s3587_s14  ;;  %p3593_p1 = scmp.lt.s32.totalorder %s3587_s14, %s3587_s14 }
  0x42   :  { %p3594_p2 = por %p3593_p1, %p3592_p0 }
  0x44   :  { %p3595_p3 = pnand %p3594_p2, %p3588_p13 }
  0x46   :  { %3598 = shalt.err (!%p3595_p3)
}
  0x47   :  { %30 = dma.hbm_to_vmem [thread:$0]  %s4554_s0, 128, %s28_s17, [#allocation4]  }
  0x48   :  { %s3727_s16 = smov [#allocation8]   ;;  %s3728_s19 = smov [#allocation11]  }
  0x49   :  { %s46_s18 = sshll.u32 %s3727_s16, 4  ;;  %s68_s20 = sshll.u32 %s3728_s19, 4  ;;  %s47_s18 = int_to_ptr.vmem [resolvable:$true] %s46_s18  ;;  %s3841_s20 = int_to_ptr.vmem [resolvable:$true] %s68_s20 }
  0x4a   :  { %s3599_s23 = scalar_lea.hbm %s4556_s2, 128 }
  0x4b   :  { %p3600_p4 = scmp.ne.s32.totalorder %s4556_s2, %s3599_s23  ;;  %p3603_p5 = scmp.lt.u32.totalorder %s3599_s23, %s4556_s2 }
  0x4d   :  { %p3605_p6 = pnand %p3603_p5, %p3600_p4 }
  0x4f   :  { %3608 = shalt.err (!%p3605_p6)
}
  0x50   :  { %s3609_s0 = scalar_lea.vmem %s47_s18, 128  ;;  %p3614_p8 = scmp.lt.s32.totalorder %s47_s18, %s47_s18 }
  0x51   :  { %p3610_p7 = scmp.ne.s32.totalorder %s47_s18, %s3609_s0  ;;  %p3615_p9 = scmp.lt.s32.totalorder %s3609_s0, %s3609_s0 }
  0x53   :  { %p3616_p10 = por %p3615_p9, %p3614_p8 }
  0x55   :  { %p3617_p11 = pnand %p3616_p10, %p3610_p7 }
  0x57   :  { %3620 = shalt.err (!%p3617_p11)
}
  0x58   :  { %52 = dma.hbm_to_vmem [thread:$0]  %s4556_s2, 128, %s47_s18, [#allocation7], %s3725_s12, %s3725_s12, %s3726_s25  }
  0x59   :  { %s3621_s11 = scalar_lea.hbm %s4558_s4, 128 }
  0x5a   :  { %p3622_p12 = scmp.ne.s32.totalorder %s4558_s4, %s3621_s11  ;;  %p3625_p13 = scmp.lt.u32.totalorder %s3621_s11, %s4558_s4 }
  0x5c   :  { %p3627_p0 = pnand %p3625_p13, %p3622_p12 }
  0x5e   :  { %3630 = shalt.err (!%p3627_p0)
}
  0x5f   :  { %s3631_s5 = scalar_lea.vmem %s3841_s20, 128  ;;  %p3636_p2 = scmp.lt.s32.totalorder %s3841_s20, %s3841_s20 }
  0x60   :  { %p3632_p1 = scmp.ne.s32.totalorder %s3841_s20, %s3631_s5  ;;  %p3637_p3 = scmp.lt.s32.totalorder %s3631_s5, %s3631_s5 }
  0x62   :  { %p3638_p4 = por %p3637_p3, %p3636_p2 }
  0x64   :  { %p3639_p5 = pnand %p3638_p4, %p3632_p1 }
  0x66   :  { %3642 = shalt.err (!%p3639_p5)
}
  0x67   :  { %74 = dma.hbm_to_vmem [thread:$0]  %s4558_s4, 128, %s3841_s20, [#allocation10], %s3725_s12, %s3725_s12, %s3726_s25  }
  0x68   :  { %s3729_s16 = smov [#allocation14]   ;;  %s3730_s19 = smov [#allocation15]  }
  0x69   :  { %s93_s18 = sshll.u32 %s3729_s16, 4  ;;  %s102_s21 = sshll.u32 %s3730_s19, 4  ;;  %s94_s18 = int_to_ptr.vmem [resolvable:$true] %s93_s18  ;;  %s3878_s21 = int_to_ptr.vmem [resolvable:$true] %s102_s21 }
  0x6a   :  { %s3643_s24 = scalar_lea.hbm %s4560_s6, 32 }
  0x6b   :  { %p3644_p6 = scmp.ne.s32.totalorder %s4560_s6, %s3643_s24  ;;  %p3647_p7 = scmp.lt.u32.totalorder %s3643_s24, %s4560_s6 }
  0x6d   :  { %p3649_p8 = pnand %p3647_p7, %p3644_p6 }
  0x6f   :  { %3652 = shalt.err (!%p3649_p8)
}
  0x70   :  { %s3653_s4 = scalar_lea.vmem %s94_s18, 32  ;;  %p3658_p10 = scmp.lt.s32.totalorder %s94_s18, %s94_s18 }
  0x71   :  { %p3654_p9 = scmp.ne.s32.totalorder %s94_s18, %s3653_s4  ;;  %p3659_p11 = scmp.lt.s32.totalorder %s3653_s4, %s3653_s4 }
  0x73   :  { %p3660_p12 = por %p3659_p11, %p3658_p10 }
  0x75   :  { %p3661_p13 = pnand %p3660_p12, %p3654_p9 }
  0x77   :  { %3664 = shalt.err (!%p3661_p13)
}
  0x78   :  { %96 = dma.hbm_to_vmem [thread:$0]  %s4560_s6, 32, %s94_s18, [#allocation13]  }
  0x79   :  { %s3665_s30 = scalar_lea.hbm %s4561_s7, 512 }
  0x7a   :  { %p3666_p0 = scmp.ne.s32.totalorder %s4561_s7, %s3665_s30  ;;  %p3669_p1 = scmp.lt.u32.totalorder %s3665_s30, %s4561_s7 }
  0x7c   :  { %p3671_p2 = pnand %p3669_p1, %p3666_p0 }
  0x7e   :  { %3674 = shalt.err (!%p3671_p2)
}
  0x7f   :  { %s3675_s14 = scalar_lea.vmem %s3878_s21, 512  ;;  %p3680_p4 = scmp.lt.s32.totalorder %s3878_s21, %s3878_s21 }
  0x80   :  { %p3676_p3 = scmp.ne.s32.totalorder %s3878_s21, %s3675_s14  ;;  %p3681_p5 = scmp.lt.s32.totalorder %s3675_s14, %s3675_s14 }
  0x82   :  { %p3682_p6 = por %p3681_p5, %p3680_p4 }
  0x84   :  { %p3683_p7 = pnand %p3682_p6, %p3676_p3 }
  0x86   :  { %3686 = shalt.err (!%p3683_p7)
}
  0x87   :  { %108 = dma.hbm_to_vmem [thread:$0]  %s4561_s7, 512, %s3878_s21, [#allocation16], %s3725_s12, %s3725_s12, %s3726_s25  }
  0x88   :  { %3709 = dma.done.wait [#allocation4], 128  }
  0x89   :  { %3710 = vsyncadd [#allocation4], 4294967168 }
  0x8a   :  { %3711 = dma.done.wait [#allocation7], 144  }
  0x8b   :  { %3712 = vsyncadd [#allocation7], 4294967152 }
  0x8c   :  { %3713 = dma.done.wait [#allocation10], 144  }
  0x8d   :  { %3714 = vsyncadd [#allocation10], 4294967152 }
  0x8e   :  { %3715 = dma.done.wait [#allocation13], 544  }
  0x8f   :  { %3716 = vsyncadd [#allocation13], 4294966752 }
  0x90   :  { %3717 = dma.done.wait [#allocation16], 512  }
  0x91   :  { %3718 = vsyncadd [#allocation16], 4294966784  ;;  %v3731_v0 = vmov 0.0   ;;  %vm3732_vm0 = vmmov 0   ;;  %v3918_v1 = vld [vmem:[#allocation8] sm:$0xff]   ;;  %v3920_v2 = vld [vmem:[#allocation3] sm:$0xff]  ;;  %v4013_v49 = vstv %s4562_s8 }
  0x92   :  { %2960 = vmatprep.subr.bf16.mxu0 %v3731_v0  ;;  %2962 = vmatprep.mubr.msk.bf16.mxu0 %vm3732_vm0, %v3731_v0  ;;  %vm163_vm1 = vcmask 130048   ;;  %v165_v3 = vpack.c.bf16 %v3920_v2, %v3920_v2  ;;  %s3733_s7 = smov 16   ;;  %v3929_v4 = vld [vmem:[#allocation12] sm:$0xff]   ;;  %s3734_s25 = smov 48   ;;  %v3935_v5 = vld [vmem:[#allocation12 + $0x8] sm:$0xff]   ;;  %v3944_v6 = vld [vmem:[#allocation12 + $0x10] sm:$0xff]  }
  0x93   :  { %2966 = vmatprep.subr.bf16.mxu1 %v3731_v0  ;;  %2974 = vmatprep.mubr.msk.bf16.mxu1 %vm3732_vm0, %v3731_v0  ;;  %164 = vst.msk [vmem:[#allocation17] sm:$0xff] %vm163_vm1, %v3920_v2  ;;  %s3735_s2 = smov 32   ;;  %v3949_v7 = vld [vmem:[#allocation12 + $0x18] sm:$0xff]   ;;  %vm233_vm2 = vcmask 261120   ;;  %v3955_v11 = vld [vmem:[#allocation9] ss:$0 sm:$0xff] }
  0x94   :  { %2961 = vmatpush3.bf16.msra.mxu0 %v3918_v1  ;;  %223 = vrot.lane.b32.xlu0 %v3920_v2, %s3733_s7  ;;  %vm235_vm3 = vcmask 392192   ;;  %vm263_vm4 = vcmask 523264   ;;  %v3960_v21 = vld [vmem:[#allocation11] sm:$0xff]   ;;  %v3972_v23 = vld [vmem:[#allocation6] ss:$0 sm:$0xff]  ;;  %vm363_vm5 = vcmask 31744  }
  0x95   :  { %229 = vrot.lane.b32.xlu1 %v3920_v2, %s3734_s25  ;;  %2984 = vmatprep.subr.bf16.mxu0 %v3731_v0  ;;  %v151_v32 = vld [vmem:[#allocation14] sm:$0x3]  ;;  %vm373_vm6 = vcmask 1041408   ;;  %v3980_v37 = vld [vmem:[#allocation15] sm:$0xff]   ;;  %v3984_v39 = vld [vmem:[#allocation15 + $0x8] sm:$0xff]   ;;  %vm494_vm7 = vcmask 261248  }
  0x96   :  { %2967 = vmatpush3.bf16.msra.mxu1 %v3929_v4  ;;  %v3976_v33 = vsel %vm373_vm6, %v151_v32, 0  ;;  %v3990_v40 = vld [vmem:[#allocation15 + $0x10] sm:$0xff]   ;;  %v3995_v41 = vld [vmem:[#allocation15 + $0x18] sm:$0xff]   ;;  %vm740_vm8 = vcmask 392448   ;;  %vm986_vm9 = vcmask 523648   ;;  %vm161_vm10 = vcmask 1047936  }
  0x97   :  { %2963 = vmatmul.mubr.msk.bf16.vlgmr.msra.gmra.mrb[0].mxu0 %vm163_vm1, %v165_v3  ;;  %2968 = vmatprep.subr.bf16.mxu1 %v3731_v0  ;;  %162 = vst.msk [vmem:[#allocation17 + $0x8] sm:$0xff] %vm161_vm10, %v3731_v0  ;;  %s3736_s8 = smov 80   ;;  %s3737_s18 = smov 96   ;;  %vm1232_vm11 = vcmask 654848   ;;  %vm1481_vm12 = vcmask 786048   ;;  %vm1730_vm13 = vcmask 917248  }
  0x98   :  { %226 = vrot.lane.b32.xlu0 %v3920_v2, %s3735_s2  ;;  %2986 = vmatprep.mubr.msk.bf16.mxu0 %vm3732_vm0, %v3731_v0  ;;  %s3738_s19 = smov 112   ;;  %vm1979_vm14 = vcmask 1048448  }
  0x99   :  { %2985 = vmatpush3.bf16.msra.mxu0 %v3976_v33 }
  0x9a   :  { %2969 = vmatpush3.bf16.msra.mxu1 %v3935_v5  ;;  %2990 = vmatprep.subr.bf16.mxu0 %v3731_v0 }
  0x9b   :  { %2970 = vmatprep.subr.bf16.mxu1 %v3731_v0 }
  0x9e   :  { %2971 = vmatpush3.bf16.msra.mxu1 %v3944_v6 }
  0x9f   :  { %2972 = vmatprep.subr.bf16.mxu1 %v3731_v0 }
  0xa2   :  { %2973 = vmatpush3.bf16.msra.mxu1 %v3949_v7 }
  0xa3   :  { %2978 = vmatprep.subr.bf16.mxu1 %v3731_v0 }
 0x106   :  { %v224_v8 = vpop.permute.xlu0 %223 }
 0x107   :  { %v232_v9 = vsel %vm163_vm1, %v3920_v2, %v224_v8  ;;  %v230_v13 = vpop.permute.xlu1 %229 }
 0x10a   :  { %v227_v10 = vpop.permute.xlu0 %226 }
 0x10b   :  { %v234_v12 = vsel %vm233_vm2, %v232_v9, %v227_v10 }
 0x10c   :  { %v236_v17 = vsel %vm235_vm3, %v234_v12, %v230_v13 }
 0x16a   :  { %v209_v14 = vpop.f32.mrb[0].mxu0 }
 0x16b   :  { %v221_v15 = vsub.f32 %v209_v14, %v3955_v11  ;;  %v2964_v16 = vpop.f32.mrb[1].mxu0 }
 0x16c   :  { %v212_v18 = vpop.f32.mrb[2].mxu0 }
 0x16d   :  { %v237_v19 = vmul.f32 %v236_v17, %v221_v15  ;;  %v2965_v20 = vpop.f32.mrb[3].mxu0 }
 0x16f   :  { %v238_v22 = vpack.c.bf16 %v237_v19, %v237_v19 }
 0x171   :  { %2975 = vmatmul.mubr.msk.bf16.vlgmr.msra.gmra.mrb[0].mxu1 %vm263_vm4, %v238_v22 }
 0x172   :  { %2979 = vmatpush3.bf16.msra.mxu1 %v3960_v21  ;;  %2980 = vmatprep.mubr.msk.bf16.mxu1 %vm3732_vm0, %v3731_v0 }
 0x173   :  { %3002 = vmatprep.subr.bf16.mxu1 %v3731_v0 }
 0x17d   :  { %2981 = vmatmul.mubr.msk.bf16.vlgmr.msra.gmra.mrb[0].mxu1 %vm163_vm1, %v165_v3 }
 0x17e   :  { %3003 = vmatpush3.bf16.msra.mxu1 %v3918_v1  ;;  %3004 = vmatprep.mubr.msk.bf16.mxu1 %vm3732_vm0, %v3731_v0 }
 0x17f   :  { %3026 = vmatprep.subr.bf16.mxu1 %v3731_v0 }
 0x250   :  { %v354_v24 = vpop.f32.mrb[0].mxu1 }
 0x251   :  { %v3380_v25 = vadd.f32 %v3972_v23, %v354_v24  ;;  %v2982_v26 = vpop.f32.mrb[1].mxu1 }
 0x252   :  { %v357_v27 = vpop.f32.mrb[2].mxu1 }
 0x253   :  { %v361_v28 = vmul.f32 1.442695, %v3380_v25  ;;  %v2983_v29 = vpop.f32.mrb[3].mxu1 }
 0x255   :  { %3459 = vpow2.f32 %v361_v28 }
 0x25f   :  { %v3460_v30 = vpop.eup %3459 }
 0x260   :  { %v364_v31 = vsel %vm363_vm5, %v3460_v30, 0.0 }
 0x261   :  { %365 = vadd.xlane.f32.xlu1 %v364_v31 }
 0x2ee   :  { %v366_v34 = vpop.xlane.xlu1 %365 }
 0x2ef   :  { %3461 = vrcp.f32 %v366_v34 }
 0x2f9   :  { %v3462_v35 = vpop.eup %3461 }
 0x2fa   :  { %v368_v36 = vmul.f32 %v3462_v35, %v3460_v30 }
 0x2fc   :  { %v369_v38 = vpack.c.bf16 %v368_v36, %v368_v36 }
 0x2fe   :  { %2987 = vmatmul.mubr.msk.bf16.vlgmr.msra.gmra.mrb[4].mxu0 %vm363_vm5, %v369_v38 }
 0x2ff   :  { %2991 = vmatpush3.bf16.msra.mxu0 %v3980_v37  ;;  %2998 = vmatprep.mubr.msk.bf16.mxu0 %vm3732_vm0, %v3731_v0 }
 0x300   :  { %2992 = vmatprep.subr.bf16.mxu0 %v3731_v0 }
 0x303   :  { %2993 = vmatpush3.bf16.msra.mxu0 %v3984_v39 }
 0x304   :  { %2994 = vmatprep.subr.bf16.mxu0 %v3731_v0 }
 0x307   :  { %2995 = vmatpush3.bf16.msra.mxu0 %v3990_v40 }
 0x308   :  { %2996 = vmatprep.subr.bf16.mxu0 %v3731_v0 }
 0x30b   :  { %2997 = vmatpush3.bf16.msra.mxu0 %v3995_v41 }
 0x30c   :  { %3008 = vmatprep.subr.bf16.mxu0 %v3731_v0 }
 0x3d1   :  { %v411_v42 = vpop.f32.mrb[4].mxu0 }
 0x3d2   :  { %v417_v43 = vmul.f32 %v411_v42, %v221_v15  ;;  %v2988_v44 = vpop.f32.mrb[5].mxu0 }
 0x3d3   :  { %v414_v45 = vpop.f32.mrb[6].mxu0 }
 0x3d4   :  { %v418_v46 = vpack.c.bf16 %v417_v43, %v417_v43  ;;  %v2989_v47 = vpop.f32.mrb[7].mxu0 }
 0x3d6   :  { %2999 = vmatmul.mubr.msk.bf16.vlgmr.msra.gmra.mrb[8].mxu0 %vm263_vm4, %v418_v46 }
 0x3d7   :  { %3009 = vmatpush3.bf16.msra.mxu0 %v3929_v4  ;;  %3016 = vmatprep.mubr.msk.bf16.mxu0 %vm3732_vm0, %v3731_v0 }
 0x3d8   :  { %3010 = vmatprep.subr.bf16.mxu0 %v3731_v0 }
 0x3db   :  { %3011 = vmatpush3.bf16.msra.mxu0 %v3935_v5 }
 0x3dc   :  { %3012 = vmatprep.subr.bf16.mxu0 %v3731_v0 }
 0x3df   :  { %3013 = vmatpush3.bf16.msra.mxu0 %v3944_v6 }
 0x3e0   :  { %3014 = vmatprep.subr.bf16.mxu0 %v3731_v0 }
 0x3e3   :  { %3015 = vmatpush3.bf16.msra.mxu0 %v3949_v7 }
 0x3e4   :  { %3020 = vmatprep.subr.bf16.mxu0 %v3731_v0 }
 0x4a9   :  { %v480_v48 = vpop.f32.mrb[8].mxu0 }
 0x4aa   :  { %v486_v50 = vsub.f32 0.0, %v480_v48  ;;  %v3000_v51 = vpop.f32.mrb[9].mxu0 }
 0x4ab   :  { %v483_v52 = vpop.f32.mrb[10].mxu0 }
 0x4ac   :  { %v488_v53 = vmul.f32 %v4013_v49, %v486_v50  ;;  %v3001_v54 = vpop.f32.mrb[11].mxu0 }
 0x4ae   :  { %v4017_v55 = vadd.f32 %v488_v53, %v3920_v2 }
 0x4b0   :  { %491 = vrot.lane.b32.xlu0 %v4017_v55, %s3733_s7  ;;  %v496_v56 = vpack.c.bf16 %v4017_v55, %v4017_v55 }
 0x4b2   :  { %3005 = vmatmul.mubr.msk.bf16.vlgmr.msra.gmra.mrb[4].mxu1 %vm163_vm1, %v496_v56 }
 0x4b3   :  { %3027 = vmatpush3.bf16.msra.mxu1 %v3976_v33  ;;  %3028 = vmatprep.mubr.msk.bf16.mxu1 %vm3732_vm0, %v3731_v0 }
 0x4b4   :  { %541 = vrot.lane.b32.xlu0 %v4017_v55, %s3735_s2  ;;  %3032 = vmatprep.subr.bf16.mxu1 %v3731_v0 }
 0x4b8   :  { %544 = vrot.lane.b32.xlu0 %v4017_v55, %s3734_s25 }
 0x522   :  { %v492_v57 = vpop.permute.xlu0 %491 }
 0x523   :  { %495 = vst.msk [vmem:[#allocation17] sm:$0xff] %vm494_vm7, %v492_v57  ;;  %v547_v60 = vsel %vm163_vm1, %v4017_v55, %v492_v57 }
 0x526   :  { %v542_v58 = vpop.permute.xlu0 %541 }
 0x527   :  { %v548_v62 = vsel %vm233_vm2, %v547_v60, %v542_v58 }
 0x52a   :  { %v545_v59 = vpop.permute.xlu0 %544 }
 0x52b   :  { %v549_v3 = vsel %vm235_vm3, %v548_v62, %v545_v59 }
 0x585   :  { %v534_v61 = vpop.f32.mrb[4].mxu1 }
 0x586   :  { %v540_v63 = vsub.f32 %v534_v61, %v3955_v11  ;;  %v3006_v2 = vpop.f32.mrb[5].mxu1 }
 0x587   :  { %v537_v8 = vpop.f32.mrb[6].mxu1 }
 0x588   :  { %v550_v9 = vmul.f32 %v549_v3, %v540_v63  ;;  %v3007_v10 = vpop.f32.mrb[7].mxu1 }
 0x58a   :  { %v551_v12 = vpack.c.bf16 %v550_v9, %v550_v9 }
 0x58c   :  { %3017 = vmatmul.mubr.msk.bf16.vlgmr.msra.gmra.mrb[12].mxu0 %vm263_vm4, %v551_v12 }
 0x58d   :  { %3021 = vmatpush3.bf16.msra.mxu0 %v3960_v21  ;;  %3022 = vmatprep.mubr.msk.bf16.mxu0 %vm3732_vm0, %v3731_v0 }
 0x58e   :  { %3044 = vmatprep.subr.bf16.mxu0 %v3731_v0 }
 0x598   :  { %3023 = vmatmul.mubr.msk.bf16.vlgmr.msra.gmra.mrb[12].mxu0 %vm163_vm1, %v496_v56 }
 0x599   :  { %3045 = vmatpush3.bf16.msra.mxu0 %v3918_v1  ;;  %3046 = vmatprep.mubr.msk.bf16.mxu0 %vm3732_vm0, %v3731_v0 }
 0x59a   :  { %3068 = vmatprep.subr.bf16.mxu0 %v3731_v0 }
 0x66b   :  { %v630_v13 = vpop.f32.mrb[12].mxu0 }
 0x66c   :  { %v3381_v14 = vadd.f32 %v3972_v23, %v630_v13  ;;  %v3024_v15 = vpop.f32.mrb[13].mxu0 }
 0x66d   :  { %v633_v16 = vpop.f32.mrb[14].mxu0 }
 0x66e   :  { %v637_v17 = vmul.f32 1.442695, %v3381_v14  ;;  %v3025_v18 = vpop.f32.mrb[15].mxu0 }
 0x670   :  { %3463 = vpow2.f32 %v637_v17 }
 0x67a   :  { %v3464_v19 = vpop.eup %3463 }
 0x67b   :  { %v639_v20 = vsel %vm363_vm5, %v3464_v19, 0.0 }
 0x67c   :  { %640 = vadd.xlane.f32.xlu0 %v639_v20 }
 0x709   :  { %v641_v22 = vpop.xlane.xlu0 %640 }
 0x70a   :  { %3465 = vrcp.f32 %v641_v22 }
 0x714   :  { %v3466_v24 = vpop.eup %3465 }
 0x715   :  { %v643_v25 = vmul.f32 %v3466_v24, %v3464_v19 }
 0x717   :  { %v644_v26 = vpack.c.bf16 %v643_v25, %v643_v25 }
 0x719   :  { %3029 = vmatmul.mubr.msk.bf16.vlgmr.msra.gmra.mrb[8].mxu1 %vm363_vm5, %v644_v26 }
 0x71a   :  { %3033 = vmatpush3.bf16.msra.mxu1 %v3980_v37  ;;  %3040 = vmatprep.mubr.msk.bf16.mxu1 %vm3732_vm0, %v3731_v0 }
 0x71b   :  { %3034 = vmatprep.subr.bf16.mxu1 %v3731_v0 }
 0x71e   :  { %3035 = vmatpush3.bf16.msra.mxu1 %v3984_v39 }
 0x71f   :  { %3036 = vmatprep.subr.bf16.mxu1 %v3731_v0 }
 0x722   :  { %3037 = vmatpush3.bf16.msra.mxu1 %v3990_v40 }
 0x723   :  { %3038 = vmatprep.subr.bf16.mxu1 %v3731_v0 }
 0x726   :  { %3039 = vmatpush3.bf16.msra.mxu1 %v3995_v41 }
 0x727   :  { %3050 = vmatprep.subr.bf16.mxu1 %v3731_v0 }
 0x7ec   :  { %v682_v27 = vpop.f32.mrb[8].mxu1 }
 0x7ed   :  { %v688_v28 = vmul.f32 %v682_v27, %v540_v63  ;;  %v3030_v29 = vpop.f32.mrb[9].mxu1 }
 0x7ee   :  { %v685_v30 = vpop.f32.mrb[10].mxu1 }
 0x7ef   :  { %v689_v31 = vpack.c.bf16 %v688_v28, %v688_v28  ;;  %v3031_v32 = vpop.f32.mrb[11].mxu1 }
 0x7f1   :  { %3041 = vmatmul.mubr.msk.bf16.vlgmr.msra.gmra.mrb[12].mxu1 %vm263_vm4, %v689_v31 }
 0x7f2   :  { %3051 = vmatpush3.bf16.msra.mxu1 %v3929_v4  ;;  %3058 = vmatprep.mubr.msk.bf16.mxu1 %vm3732_vm0, %v3731_v0 }
 0x7f3   :  { %3052 = vmatprep.subr.bf16.mxu1 %v3731_v0 }
 0x7f6   :  { %3053 = vmatpush3.bf16.msra.mxu1 %v3935_v5 }
 0x7f7   :  { %3054 = vmatprep.subr.bf16.mxu1 %v3731_v0 }
 0x7fa   :  { %3055 = vmatpush3.bf16.msra.mxu1 %v3944_v6 }
 0x7fb   :  { %3056 = vmatprep.subr.bf16.mxu1 %v3731_v0 }
 0x7fe   :  { %3057 = vmatpush3.bf16.msra.mxu1 %v3949_v7 }
 0x7ff   :  { %3062 = vmatprep.subr.bf16.mxu1 %v3731_v0 }
 0x8c4   :  { %v727_v34 = vpop.f32.mrb[12].mxu1 }
 0x8c5   :  { %v733_v35 = vsub.f32 0.0, %v727_v34  ;;  %v3042_v36 = vpop.f32.mrb[13].mxu1 }
 0x8c6   :  { %v730_v38 = vpop.f32.mrb[14].mxu1 }
 0x8c7   :  { %v734_v42 = vmul.f32 %v733_v35, %v4013_v49  ;;  %v3043_v43 = vpop.f32.mrb[15].mxu1 }
 0x8c9   :  { %v4074_v44 = vadd.f32 %v734_v42, %v4017_v55 }
 0x8cb   :  { %737 = vrot.lane.b32.xlu0 %v4074_v44, %s3735_s2  ;;  %787 = vrot.lane.b32.xlu1 %v4074_v44, %s3733_s7  ;;  %v742_v45 = vpack.c.bf16 %v4074_v44, %v4074_v44 }
 0x8cd   :  { %3047 = vmatmul.mubr.msk.bf16.vlgmr.msra.gmra.mrb[16].mxu0 %vm163_vm1, %v742_v45 }
 0x8ce   :  { %3069 = vmatpush3.bf16.msra.mxu0 %v3976_v33  ;;  %3070 = vmatprep.mubr.msk.bf16.mxu0 %vm3732_vm0, %v3731_v0 }
 0x8cf   :  { %790 = vrot.lane.b32.xlu1 %v4074_v44, %s3734_s25  ;;  %3074 = vmatprep.subr.bf16.mxu0 %v3731_v0 }
 0x93d   :  { %v738_v46 = vpop.permute.xlu0 %737  ;;  %v788_v47 = vpop.permute.xlu1 %787 }
 0x93e   :  { %741 = vst.msk [vmem:[#allocation17] sm:$0xff] %vm740_vm8, %v738_v46  ;;  %v793_v48 = vsel %vm163_vm1, %v4074_v44, %v788_v47 }
 0x93f   :  { %v794_v52 = vsel %vm233_vm2, %v793_v48, %v738_v46 }
 0x941   :  { %v791_v50 = vpop.permute.xlu1 %790 }
 0x942   :  { %v795_v55 = vsel %vm235_vm3, %v794_v52, %v791_v50 }
 0x9a0   :  { %v780_v51 = vpop.f32.mrb[16].mxu0 }
 0x9a1   :  { %v786_v53 = vsub.f32 %v780_v51, %v3955_v11  ;;  %v3048_v54 = vpop.f32.mrb[17].mxu0 }
 0x9a2   :  { %v783_v56 = vpop.f32.mrb[18].mxu0 }
 0x9a3   :  { %v796_v57 = vmul.f32 %v795_v55, %v786_v53  ;;  %v3049_v58 = vpop.f32.mrb[19].mxu0 }
 0x9a5   :  { %v797_v59 = vpack.c.bf16 %v796_v57, %v796_v57 }
 0x9a7   :  { %3059 = vmatmul.mubr.msk.bf16.vlgmr.msra.gmra.mrb[16].mxu1 %vm263_vm4, %v797_v59 }
 0x9a8   :  { %3063 = vmatpush3.bf16.msra.mxu1 %v3960_v21  ;;  %3064 = vmatprep.mubr.msk.bf16.mxu1 %vm3732_vm0, %v3731_v0 }
 0x9a9   :  { %3086 = vmatprep.subr.bf16.mxu1 %v3731_v0 }
 0x9b3   :  { %3065 = vmatmul.mubr.msk.bf16.vlgmr.msra.gmra.mrb[16].mxu1 %vm163_vm1, %v742_v45 }
 0x9b4   :  { %3087 = vmatpush3.bf16.msra.mxu1 %v3918_v1  ;;  %3088 = vmatprep.mubr.msk.bf16.mxu1 %vm3732_vm0, %v3731_v0 }
 0x9b5   :  { %3110 = vmatprep.subr.bf16.mxu1 %v3731_v0 }
 0xa86   :  { %v876_v60 = vpop.f32.mrb[16].mxu1 }
 0xa87   :  { %v3382_v61 = vadd.f32 %v3972_v23, %v876_v60  ;;  %v3066_v62 = vpop.f32.mrb[17].mxu1 }
 0xa88   :  { %v879_v63 = vpop.f32.mrb[18].mxu1 }
 0xa89   :  { %v883_v2 = vmul.f32 1.442695, %v3382_v61  ;;  %v3067_v3 = vpop.f32.mrb[19].mxu1 }
 0xa8b   :  { %3467 = vpow2.f32 %v883_v2 }
 0xa95   :  { %v3468_v8 = vpop.eup %3467 }
 0xa96   :  { %v885_v9 = vsel %vm363_vm5, %v3468_v8, 0.0 }
 0xa97   :  { %886 = vadd.xlane.f32.xlu1 %v885_v9 }
 0xb24   :  { %v887_v10 = vpop.xlane.xlu1 %886 }
 0xb25   :  { %3469 = vrcp.f32 %v887_v10 }
 0xb2f   :  { %v3470_v12 = vpop.eup %3469 }
 0xb30   :  { %v889_v13 = vmul.f32 %v3470_v12, %v3468_v8 }
 0xb32   :  { %v890_v14 = vpack.c.bf16 %v889_v13, %v889_v13 }
 0xb34   :  { %3071 = vmatmul.mubr.msk.bf16.vlgmr.msra.gmra.mrb[20].mxu0 %vm363_vm5, %v890_v14 }
 0xb35   :  { %3075 = vmatpush3.bf16.msra.mxu0 %v3980_v37  ;;  %3082 = vmatprep.mubr.msk.bf16.mxu0 %vm3732_vm0, %v3731_v0 }
 0xb36   :  { %3076 = vmatprep.subr.bf16.mxu0 %v3731_v0 }
 0xb39   :  { %3077 = vmatpush3.bf16.msra.mxu0 %v3984_v39 }
 0xb3a   :  { %3078 = vmatprep.subr.bf16.mxu0 %v3731_v0 }
 0xb3d   :  { %3079 = vmatpush3.bf16.msra.mxu0 %v3990_v40 }
 0xb3e   :  { %3080 = vmatprep.subr.bf16.mxu0 %v3731_v0 }
 0xb41   :  { %3081 = vmatpush3.bf16.msra.mxu0 %v3995_v41 }
 0xb42   :  { %3092 = vmatprep.subr.bf16.mxu0 %v3731_v0 }
 0xc07   :  { %v928_v15 = vpop.f32.mrb[20].mxu0 }
 0xc08   :  { %v934_v16 = vmul.f32 %v928_v15, %v786_v53  ;;  %v3072_v17 = vpop.f32.mrb[21].mxu0 }
 0xc09   :  { %v931_v18 = vpop.f32.mrb[22].mxu0 }
 0xc0a   :  { %v935_v19 = vpack.c.bf16 %v934_v16, %v934_v16  ;;  %v3073_v20 = vpop.f32.mrb[23].mxu0 }
 0xc0c   :  { %3083 = vmatmul.mubr.msk.bf16.vlgmr.msra.gmra.mrb[24].mxu0 %vm263_vm4, %v935_v19 }
 0xc0d   :  { %3093 = vmatpush3.bf16.msra.mxu0 %v3929_v4  ;;  %3100 = vmatprep.mubr.msk.bf16.mxu0 %vm3732_vm0, %v3731_v0 }
 0xc0e   :  { %3094 = vmatprep.subr.bf16.mxu0 %v3731_v0 }
 0xc11   :  { %3095 = vmatpush3.bf16.msra.mxu0 %v3935_v5 }
 0xc12   :  { %3096 = vmatprep.subr.bf16.mxu0 %v3731_v0 }
 0xc15   :  { %3097 = vmatpush3.bf16.msra.mxu0 %v3944_v6 }
 0xc16   :  { %3098 = vmatprep.subr.bf16.mxu0 %v3731_v0 }
 0xc19   :  { %3099 = vmatpush3.bf16.msra.mxu0 %v3949_v7 }
 0xc1a   :  { %3104 = vmatprep.subr.bf16.mxu0 %v3731_v0 }
 0xcdf   :  { %v973_v22 = vpop.f32.mrb[24].mxu0 }
 0xce0   :  { %v979_v24 = vsub.f32 0.0, %v973_v22  ;;  %v3084_v25 = vpop.f32.mrb[25].mxu0 }
 0xce1   :  { %v976_v26 = vpop.f32.mrb[26].mxu0 }
 0xce2   :  { %v980_v27 = vmul.f32 %v979_v24, %v4013_v49  ;;  %v3085_v28 = vpop.f32.mrb[27].mxu0 }
 0xce4   :  { %v4131_v29 = vadd.f32 %v980_v27, %v4074_v44 }
 0xce6   :  { %1033 = vrot.lane.b32.xlu0 %v4131_v29, %s3733_s7  ;;  %v988_v30 = vpack.c.bf16 %v4131_v29, %v4131_v29 }
 0xce8   :  { %3089 = vmatmul.mubr.msk.bf16.vlgmr.msra.gmra.mrb[20].mxu1 %vm163_vm1, %v988_v30 }
 0xce9   :  { %3111 = vmatpush3.bf16.msra.mxu1 %v3976_v33  ;;  %3112 = vmatprep.mubr.msk.bf16.mxu1 %vm3732_vm0, %v3731_v0 }
 0xcea   :  { %1036 = vrot.lane.b32.xlu0 %v4131_v29, %s3735_s2  ;;  %3116 = vmatprep.subr.bf16.mxu1 %v3731_v0 }
 0xcee   :  { %983 = vrot.lane.b32.xlu0 %v4131_v29, %s3734_s25 }
 0xd58   :  { %v1034_v31 = vpop.permute.xlu0 %1033 }
 0xd59   :  { %v1039_v32 = vsel %vm163_vm1, %v4131_v29, %v1034_v31 }
 0xd5c   :  { %v1037_v34 = vpop.permute.xlu0 %1036 }
 0xd5d   :  { %v1040_v35 = vsel %vm233_vm2, %v1039_v32, %v1037_v34 }
 0xd60   :  { %v984_v36 = vpop.permute.xlu0 %983 }
 0xd61   :  { %987 = vst.msk [vmem:[#allocation17] sm:$0xff] %vm986_vm9, %v984_v36  ;;  %v1041_v44 = vsel %vm235_vm3, %v1040_v35, %v984_v36 }
 0xdbb   :  { %v1026_v38 = vpop.f32.mrb[20].mxu1 }
 0xdbc   :  { %v1032_v42 = vsub.f32 %v1026_v38, %v3955_v11  ;;  %v3090_v43 = vpop.f32.mrb[21].mxu1 }
 0xdbd   :  { %v1029_v45 = vpop.f32.mrb[22].mxu1 }
 0xdbe   :  { %v1042_v46 = vmul.f32 %v1041_v44, %v1032_v42  ;;  %v3091_v47 = vpop.f32.mrb[23].mxu1 }
 0xdc0   :  { %v1043_v48 = vpack.c.bf16 %v1042_v46, %v1042_v46 }
 0xdc2   :  { %3101 = vmatmul.mubr.msk.bf16.vlgmr.msra.gmra.mrb[28].mxu0 %vm263_vm4, %v1043_v48 }
 0xdc3   :  { %3105 = vmatpush3.bf16.msra.mxu0 %v3960_v21  ;;  %3106 = vmatprep.mubr.msk.bf16.mxu0 %vm3732_vm0, %v3731_v0 }
 0xdc4   :  { %3128 = vmatprep.subr.bf16.mxu0 %v3731_v0 }
 0xdce   :  { %3107 = vmatmul.mubr.msk.bf16.vlgmr.msra.gmra.mrb[28].mxu0 %vm163_vm1, %v988_v30 }
 0xdcf   :  { %3129 = vmatpush3.bf16.msra.mxu0 %v3918_v1  ;;  %3130 = vmatprep.mubr.msk.bf16.mxu0 %vm3732_vm0, %v3731_v0 }
 0xdd0   :  { %3152 = vmatprep.subr.bf16.mxu0 %v3731_v0 }
 0xea1   :  { %v1122_v50 = vpop.f32.mrb[28].mxu0 }
 0xea2   :  { %v3383_v51 = vadd.f32 %v3972_v23, %v1122_v50  ;;  %v3108_v52 = vpop.f32.mrb[29].mxu0 }
 0xea3   :  { %v1125_v53 = vpop.f32.mrb[30].mxu0 }
 0xea4   :  { %v1129_v54 = vmul.f32 1.442695, %v3383_v51  ;;  %v3109_v55 = vpop.f32.mrb[31].mxu0 }
 0xea6   :  { %3471 = vpow2.f32 %v1129_v54 }
 0xeb0   :  { %v3472_v56 = vpop.eup %3471 }
 0xeb1   :  { %v1131_v57 = vsel %vm363_vm5, %v3472_v56, 0.0 }
 0xeb2   :  { %1132 = vadd.xlane.f32.xlu0 %v1131_v57 }
 0xf3f   :  { %v1133_v58 = vpop.xlane.xlu0 %1132 }
 0xf40   :  { %3473 = vrcp.f32 %v1133_v58 }
 0xf4a   :  { %v3474_v59 = vpop.eup %3473 }
 0xf4b   :  { %v1135_v60 = vmul.f32 %v3474_v59, %v3472_v56 }
 0xf4d   :  { %v1136_v61 = vpack.c.bf16 %v1135_v60, %v1135_v60 }
 0xf4f   :  { %3113 = vmatmul.mubr.msk.bf16.vlgmr.msra.gmra.mrb[24].mxu1 %vm363_vm5, %v1136_v61 }
 0xf50   :  { %3117 = vmatpush3.bf16.msra.mxu1 %v3980_v37  ;;  %3124 = vmatprep.mubr.msk.bf16.mxu1 %vm3732_vm0, %v3731_v0 }
 0xf51   :  { %3118 = vmatprep.subr.bf16.mxu1 %v3731_v0 }
 0xf54   :  { %3119 = vmatpush3.bf16.msra.mxu1 %v3984_v39 }
 0xf55   :  { %3120 = vmatprep.subr.bf16.mxu1 %v3731_v0 }
 0xf58   :  { %3121 = vmatpush3.bf16.msra.mxu1 %v3990_v40 }
 0xf59   :  { %3122 = vmatprep.subr.bf16.mxu1 %v3731_v0 }
 0xf5c   :  { %3123 = vmatpush3.bf16.msra.mxu1 %v3995_v41 }
 0xf5d   :  { %3134 = vmatprep.subr.bf16.mxu1 %v3731_v0 }
0x1022   :  { %v1174_v62 = vpop.f32.mrb[24].mxu1 }
0x1023   :  { %v1180_v63 = vmul.f32 %v1174_v62, %v1032_v42  ;;  %v3114_v2 = vpop.f32.mrb[25].mxu1 }
0x1024   :  { %v1177_v3 = vpop.f32.mrb[26].mxu1 }
0x1025   :  { %v1181_v8 = vpack.c.bf16 %v1180_v63, %v1180_v63  ;;  %v3115_v9 = vpop.f32.mrb[27].mxu1 }
0x1027   :  { %3125 = vmatmul.mubr.msk.bf16.vlgmr.msra.gmra.mrb[28].mxu1 %vm263_vm4, %v1181_v8 }
0x1028   :  { %3135 = vmatpush3.bf16.msra.mxu1 %v3929_v4  ;;  %3142 = vmatprep.mubr.msk.bf16.mxu1 %vm3732_vm0, %v3731_v0 }
0x1029   :  { %3136 = vmatprep.subr.bf16.mxu1 %v3731_v0 }
0x102c   :  { %3137 = vmatpush3.bf16.msra.mxu1 %v3935_v5 }
0x102d   :  { %3138 = vmatprep.subr.bf16.mxu1 %v3731_v0 }
0x1030   :  { %3139 = vmatpush3.bf16.msra.mxu1 %v3944_v6 }
0x1031   :  { %3140 = vmatprep.subr.bf16.mxu1 %v3731_v0 }
0x1034   :  { %3141 = vmatpush3.bf16.msra.mxu1 %v3949_v7 }
0x1035   :  { %3146 = vmatprep.subr.bf16.mxu1 %v3731_v0 }
0x10fa   :  { %v1219_v10 = vpop.f32.mrb[28].mxu1 }
0x10fb   :  { %v1225_v12 = vsub.f32 0.0, %v1219_v10  ;;  %v3126_v13 = vpop.f32.mrb[29].mxu1 }
0x10fc   :  { %v1222_v14 = vpop.f32.mrb[30].mxu1 }
0x10fd   :  { %v1226_v15 = vmul.f32 %v1225_v12, %v4013_v49  ;;  %v3127_v16 = vpop.f32.mrb[31].mxu1 }
0x10ff   :  { %v4187_v17 = vadd.f32 %v1226_v15, %v4131_v29 }
0x1101   :  { %1285 = vrot.lane.b32.xlu0 %v4187_v17, %s3734_s25  ;;  %1279 = vrot.lane.b32.xlu1 %v4187_v17, %s3733_s7  ;;  %v1234_v18 = vpack.c.bf16 %v4187_v17, %v4187_v17 }
0x1103   :  { %3131 = vmatmul.mubr.msk.bf16.vlgmr.msra.gmra.mrb[32].mxu0 %vm163_vm1, %v1234_v18 }
0x1104   :  { %3153 = vmatpush3.bf16.msra.mxu0 %v3976_v33  ;;  %3154 = vmatprep.mubr.msk.bf16.mxu0 %vm3732_vm0, %v3731_v0 }
0x1105   :  { %1282 = vrot.lane.b32.xlu1 %v4187_v17, %s3735_s2  ;;  %3158 = vmatprep.subr.bf16.mxu0 %v3731_v0 }
0x1173   :  { %v1280_v19 = vpop.permute.xlu1 %1279  ;;  %v1286_v26 = vpop.permute.xlu0 %1285 }
0x1174   :  { %v1288_v22 = vsel %vm163_vm1, %v4187_v17, %v1280_v19 }
0x1177   :  { %v1283_v20 = vpop.permute.xlu1 %1282 }
0x1178   :  { %v1289_v24 = vsel %vm233_vm2, %v1288_v22, %v1283_v20 }
0x1179   :  { %v1290_v29 = vsel %vm235_vm3, %v1289_v24, %v1286_v26 }
0x11d6   :  { %v1272_v25 = vpop.f32.mrb[32].mxu0 }
0x11d7   :  { %v1278_v27 = vsub.f32 %v1272_v25, %v3955_v11  ;;  %v3132_v28 = vpop.f32.mrb[33].mxu0 }
0x11d8   :  { %v1275_v30 = vpop.f32.mrb[34].mxu0 }
0x11d9   :  { %v1291_v31 = vmul.f32 %v1290_v29, %v1278_v27  ;;  %v3133_v32 = vpop.f32.mrb[35].mxu0 }
0x11db   :  { %v1292_v34 = vpack.c.bf16 %v1291_v31, %v1291_v31 }
0x11dd   :  { %3143 = vmatmul.mubr.msk.bf16.vlgmr.msra.gmra.mrb[32].mxu1 %vm263_vm4, %v1292_v34 }
0x11de   :  { %3147 = vmatpush3.bf16.msra.mxu1 %v3960_v21  ;;  %3148 = vmatprep.mubr.msk.bf16.mxu1 %vm3732_vm0, %v3731_v0 }
0x11df   :  { %3170 = vmatprep.subr.bf16.mxu1 %v3731_v0 }
0x11e9   :  { %3149 = vmatmul.mubr.msk.bf16.vlgmr.msra.gmra.mrb[32].mxu1 %vm163_vm1, %v1234_v18 }
0x11ea   :  { %3171 = vmatpush3.bf16.msra.mxu1 %v3918_v1  ;;  %3172 = vmatprep.mubr.msk.bf16.mxu1 %vm3732_vm0, %v3731_v0 }
0x11eb   :  { %3194 = vmatprep.subr.bf16.mxu1 %v3731_v0 }
0x12bc   :  { %v1371_v35 = vpop.f32.mrb[32].mxu1 }
0x12bd   :  { %v3384_v36 = vadd.f32 %v3972_v23, %v1371_v35  ;;  %v3150_v38 = vpop.f32.mrb[33].mxu1 }
0x12be   :  { %v1374_v42 = vpop.f32.mrb[34].mxu1 }
0x12bf   :  { %v1378_v43 = vmul.f32 1.442695, %v3384_v36  ;;  %v3151_v44 = vpop.f32.mrb[35].mxu1 }
0x12c1   :  { %3475 = vpow2.f32 %v1378_v43 }
0x12cb   :  { %v3476_v45 = vpop.eup %3475 }
0x12cc   :  { %v1380_v46 = vsel %vm363_vm5, %v3476_v45, 0.0 }
0x12cd   :  { %1381 = vadd.xlane.f32.xlu1 %v1380_v46 }
0x135a   :  { %v1382_v47 = vpop.xlane.xlu1 %1381 }
0x135b   :  { %3477 = vrcp.f32 %v1382_v47 }
0x1365   :  { %v3478_v48 = vpop.eup %3477 }
0x1366   :  { %v1384_v50 = vmul.f32 %v3478_v48, %v3476_v45 }
0x1368   :  { %v1385_v51 = vpack.c.bf16 %v1384_v50, %v1384_v50 }
0x136a   :  { %3155 = vmatmul.mubr.msk.bf16.vlgmr.msra.gmra.mrb[36].mxu0 %vm363_vm5, %v1385_v51 }
0x136b   :  { %3159 = vmatpush3.bf16.msra.mxu0 %v3980_v37  ;;  %3166 = vmatprep.mubr.msk.bf16.mxu0 %vm3732_vm0, %v3731_v0 }
0x136c   :  { %3160 = vmatprep.subr.bf16.mxu0 %v3731_v0 }
0x136f   :  { %3161 = vmatpush3.bf16.msra.mxu0 %v3984_v39 }
0x1370   :  { %3162 = vmatprep.subr.bf16.mxu0 %v3731_v0 }
0x1373   :  { %3163 = vmatpush3.bf16.msra.mxu0 %v3990_v40 }
0x1374   :  { %3164 = vmatprep.subr.bf16.mxu0 %v3731_v0 }
0x1377   :  { %3165 = vmatpush3.bf16.msra.mxu0 %v3995_v41 }
0x1378   :  { %3176 = vmatprep.subr.bf16.mxu0 %v3731_v0 }
0x143d   :  { %v1423_v52 = vpop.f32.mrb[36].mxu0 }
0x143e   :  { %v1429_v53 = vmul.f32 %v1423_v52, %v1278_v27  ;;  %v3156_v54 = vpop.f32.mrb[37].mxu0 }
0x143f   :  { %v1426_v55 = vpop.f32.mrb[38].mxu0 }
0x1440   :  { %v1430_v56 = vpack.c.bf16 %v1429_v53, %v1429_v53  ;;  %v3157_v57 = vpop.f32.mrb[39].mxu0 }
0x1442   :  { %3167 = vmatmul.mubr.msk.bf16.vlgmr.msra.gmra.mrb[40].mxu0 %vm263_vm4, %v1430_v56 }
0x1443   :  { %3177 = vmatpush3.bf16.msra.mxu0 %v3929_v4  ;;  %3184 = vmatprep.mubr.msk.bf16.mxu0 %vm3732_vm0, %v3731_v0 }
0x1444   :  { %3178 = vmatprep.subr.bf16.mxu0 %v3731_v0 }
0x1447   :  { %3179 = vmatpush3.bf16.msra.mxu0 %v3935_v5 }
0x1448   :  { %3180 = vmatprep.subr.bf16.mxu0 %v3731_v0 }
0x144b   :  { %3181 = vmatpush3.bf16.msra.mxu0 %v3944_v6 }
0x144c   :  { %3182 = vmatprep.subr.bf16.mxu0 %v3731_v0 }
0x144f   :  { %3183 = vmatpush3.bf16.msra.mxu0 %v3949_v7 }
0x1450   :  { %3188 = vmatprep.subr.bf16.mxu0 %v3731_v0 }
0x1515   :  { %v1468_v58 = vpop.f32.mrb[40].mxu0 }
0x1516   :  { %v1474_v59 = vsub.f32 0.0, %v1468_v58  ;;  %v3168_v60 = vpop.f32.mrb[41].mxu0 }
0x1517   :  { %v1471_v61 = vpop.f32.mrb[42].mxu0 }
0x1518   :  { %v1475_v62 = vmul.f32 %v1474_v59, %v4013_v49  ;;  %v3169_v63 = vpop.f32.mrb[43].mxu0 }
0x151a   :  { %v4243_v2 = vadd.f32 %v1475_v62, %v4187_v17 }
0x151c   :  { %1528 = vrot.lane.b32.xlu0 %v4243_v2, %s3733_s7  ;;  %v1483_v3 = vpack.c.bf16 %v4243_v2, %v4243_v2 }
0x151e   :  { %3173 = vmatmul.mubr.msk.bf16.vlgmr.msra.gmra.mrb[36].mxu1 %vm163_vm1, %v1483_v3 }
0x151f   :  { %3195 = vmatpush3.bf16.msra.mxu1 %v3976_v33  ;;  %3196 = vmatprep.mubr.msk.bf16.mxu1 %vm3732_vm0, %v3731_v0 }
0x1520   :  { %1531 = vrot.lane.b32.xlu0 %v4243_v2, %s3735_s2  ;;  %3200 = vmatprep.subr.bf16.mxu1 %v3731_v0 }
0x1524   :  { %1534 = vrot.lane.b32.xlu0 %v4243_v2, %s3734_s25 }
0x158e   :  { %v1529_v8 = vpop.permute.xlu0 %1528 }
0x158f   :  { %v1537_v12 = vsel %vm163_vm1, %v4243_v2, %v1529_v8  ;;  %v4325_v8 = vld [vmem:[#allocation8] sm:$0xff]  }
0x1592   :  { %v1532_v9 = vpop.permute.xlu0 %1531 }
0x1593   :  { %v1538_v14 = vsel %vm233_vm2, %v1537_v12, %v1532_v9 }
0x1596   :  { %v1535_v10 = vpop.permute.xlu0 %1534 }
0x1597   :  { %v1539_v18 = vsel %vm235_vm3, %v1538_v14, %v1535_v10 }
0x15f1   :  { %v1521_v13 = vpop.f32.mrb[36].mxu1 }
0x15f2   :  { %v1527_v15 = vsub.f32 %v1521_v13, %v3955_v11  ;;  %v3174_v16 = vpop.f32.mrb[37].mxu1 }
0x15f3   :  { %v1524_v19 = vpop.f32.mrb[38].mxu1 }
0x15f4   :  { %v1540_v20 = vmul.f32 %v1539_v18, %v1527_v15  ;;  %v3175_v22 = vpop.f32.mrb[39].mxu1 }
0x15f6   :  { %v1541_v24 = vpack.c.bf16 %v1540_v20, %v1540_v20 }
0x15f8   :  { %3185 = vmatmul.mubr.msk.bf16.vlgmr.msra.gmra.mrb[44].mxu0 %vm263_vm4, %v1541_v24 }
0x15f9   :  { %3189 = vmatpush3.bf16.msra.mxu0 %v3960_v21  ;;  %3190 = vmatprep.mubr.msk.bf16.mxu0 %vm3732_vm0, %v3731_v0 }
0x15fa   :  { %3212 = vmatprep.subr.bf16.mxu0 %v3731_v0 }
0x1604   :  { %3191 = vmatmul.mubr.msk.bf16.vlgmr.msra.gmra.mrb[44].mxu0 %vm163_vm1, %v1483_v3 }
0x1605   :  { %3213 = vmatpush3.bf16.msra.mxu0 %v3918_v1  ;;  %3214 = vmatprep.mubr.msk.bf16.mxu0 %vm3732_vm0, %v3731_v0 }
0x1606   :  { %3236 = vmatprep.subr.bf16.mxu0 %v3731_v0 }
0x16d7   :  { %v1620_v25 = vpop.f32.mrb[44].mxu0 }
0x16d8   :  { %v3385_v26 = vadd.f32 %v3972_v23, %v1620_v25  ;;  %v3192_v27 = vpop.f32.mrb[45].mxu0 }
0x16d9   :  { %v1623_v28 = vpop.f32.mrb[46].mxu0  ;;  %v4345_v27 = vld [vmem:[#allocation12] sm:$0xff]  }
0x16da   :  { %v1627_v29 = vmul.f32 1.442695, %v3385_v26  ;;  %v3193_v30 = vpop.f32.mrb[47].mxu0 }
0x16dc   :  { %3479 = vpow2.f32 %v1627_v29 }
0x16e6   :  { %v3480_v31 = vpop.eup %3479 }
0x16e7   :  { %v1629_v32 = vsel %vm363_vm5, %v3480_v31, 0.0 }
0x16e8   :  { %1630 = vadd.xlane.f32.xlu0 %v1629_v32 }
0x1775   :  { %v1631_v34 = vpop.xlane.xlu0 %1630 }
0x1776   :  { %3481 = vrcp.f32 %v1631_v34 }
0x1780   :  { %v3482_v1 = vpop.eup %3481 }
0x1781   :  { %v1633_v35 = vmul.f32 %v3482_v1, %v3480_v31 }
0x1783   :  { %v1634_v36 = vpack.c.bf16 %v1633_v35, %v1633_v35 }
0x1785   :  { %3197 = vmatmul.mubr.msk.bf16.vlgmr.msra.gmra.mrb[40].mxu1 %vm363_vm5, %v1634_v36 }
0x1786   :  { %3201 = vmatpush3.bf16.msra.mxu1 %v3980_v37  ;;  %3208 = vmatprep.mubr.msk.bf16.mxu1 %vm3732_vm0, %v3731_v0 }
0x1787   :  { %3202 = vmatprep.subr.bf16.mxu1 %v3731_v0 }
0x178a   :  { %3203 = vmatpush3.bf16.msra.mxu1 %v3984_v39 }
0x178b   :  { %3204 = vmatprep.subr.bf16.mxu1 %v3731_v0 }
0x178e   :  { %3205 = vmatpush3.bf16.msra.mxu1 %v3990_v40 }
0x178f   :  { %3206 = vmatprep.subr.bf16.mxu1 %v3731_v0 }
0x1792   :  { %3207 = vmatpush3.bf16.msra.mxu1 %v3995_v41 }
0x1793   :  { %3218 = vmatprep.subr.bf16.mxu1 %v3731_v0 }
0x1858   :  { %v1672_v38 = vpop.f32.mrb[40].mxu1 }
0x1859   :  { %v1678_v42 = vmul.f32 %v1672_v38, %v1527_v15  ;;  %v3198_v43 = vpop.f32.mrb[41].mxu1 }
0x185a   :  { %v1675_v44 = vpop.f32.mrb[42].mxu1 }
0x185b   :  { %v1679_v45 = vpack.c.bf16 %v1678_v42, %v1678_v42  ;;  %v3199_v46 = vpop.f32.mrb[43].mxu1 }
0x185c   :  { %v4383_v46 = vld [vmem:[#allocation9] ss:$0 sm:$0xff] }
0x185d   :  { %3209 = vmatmul.mubr.msk.bf16.vlgmr.msra.gmra.mrb[44].mxu1 %vm263_vm4, %v1679_v45 }
0x185e   :  { %3219 = vmatpush3.bf16.msra.mxu1 %v3929_v4  ;;  %3226 = vmatprep.mubr.msk.bf16.mxu1 %vm3732_vm0, %v3731_v0 }
0x185f   :  { %3220 = vmatprep.subr.bf16.mxu1 %v3731_v0 }
0x1862   :  { %3221 = vmatpush3.bf16.msra.mxu1 %v3935_v5 }
0x1863   :  { %3222 = vmatprep.subr.bf16.mxu1 %v3731_v0 }
0x1866   :  { %3223 = vmatpush3.bf16.msra.mxu1 %v3944_v6 }
0x1867   :  { %3224 = vmatprep.subr.bf16.mxu1 %v3731_v0 }
0x186a   :  { %3225 = vmatpush3.bf16.msra.mxu1 %v3949_v7 }
0x186b   :  { %3230 = vmatprep.subr.bf16.mxu1 %v3731_v0 }
0x1930   :  { %v1717_v47 = vpop.f32.mrb[44].mxu1 }
0x1931   :  { %v1723_v48 = vsub.f32 0.0, %v1717_v47  ;;  %v3210_v4 = vpop.f32.mrb[45].mxu1 }
0x1932   :  { %v1720_v50 = vpop.f32.mrb[46].mxu1 }
0x1933   :  { %v1724_v51 = vmul.f32 %v1723_v48, %v4013_v49  ;;  %v3211_v52 = vpop.f32.mrb[47].mxu1 }
0x1935   :  { %v4299_v53 = vadd.f32 %v1724_v51, %v4243_v2 }
0x1937   :  { %1777 = vrot.lane.b32.xlu1 %v4299_v53, %s3733_s7  ;;  %v1732_v5 = vpack.c.bf16 %v4299_v53, %v4299_v53 }
0x1939   :  { %3215 = vmatmul.mubr.msk.bf16.vlgmr.msra.gmra.mrb[48].mxu0 %vm163_vm1, %v1732_v5 }
0x193a   :  { %3237 = vmatpush3.bf16.msra.mxu0 %v3976_v33  ;;  %3238 = vmatprep.mubr.msk.bf16.mxu0 %vm3732_vm0, %v3731_v0 }
0x193b   :  { %1780 = vrot.lane.b32.xlu1 %v4299_v53, %s3735_s2  ;;  %3242 = vmatprep.subr.bf16.mxu0 %v3731_v0 }
0x193f   :  { %1783 = vrot.lane.b32.xlu1 %v4299_v53, %s3734_s25 }
0x19a9   :  { %v1778_v6 = vpop.permute.xlu1 %1777 }
0x19aa   :  { %v1786_v55 = vsel %vm163_vm1, %v4299_v53, %v1778_v6  ;;  %v4388_v6 = vld [vmem:[#allocation11] sm:$0xff]  }
0x19ad   :  { %v1781_v7 = vpop.permute.xlu1 %1780 }
0x19ae   :  { %v1787_v57 = vsel %vm233_vm2, %v1786_v55, %v1781_v7 }
0x19b1   :  { %v1784_v54 = vpop.permute.xlu1 %1783 }
0x19b2   :  { %v1788_v60 = vsel %vm235_vm3, %v1787_v57, %v1784_v54  ;;  %v4399_v54 = vld [vmem:[#allocation6] ss:$0 sm:$0xff] }
0x1a0c   :  { %v1770_v56 = vpop.f32.mrb[48].mxu0 }
0x1a0d   :  { %v1776_v58 = vsub.f32 %v1770_v56, %v3955_v11  ;;  %v3216_v59 = vpop.f32.mrb[49].mxu0 }
0x1a0e   :  { %v1773_v61 = vpop.f32.mrb[50].mxu0 }
0x1a0f   :  { %v1789_v62 = vmul.f32 %v1788_v60, %v1776_v58  ;;  %v3217_v63 = vpop.f32.mrb[51].mxu0 }
0x1a11   :  { %v1790_v3 = vpack.c.bf16 %v1789_v62, %v1789_v62 }
0x1a13   :  { %3227 = vmatmul.mubr.msk.bf16.vlgmr.msra.gmra.mrb[48].mxu1 %vm263_vm4, %v1790_v3 }
0x1a14   :  { %3231 = vmatpush3.bf16.msra.mxu1 %v3960_v21  ;;  %3232 = vmatprep.mubr.msk.bf16.mxu1 %vm3732_vm0, %v3731_v0 }
0x1a15   :  { %3254 = vmatprep.subr.bf16.mxu1 %v3731_v0 }
0x1a1f   :  { %3233 = vmatmul.mubr.msk.bf16.vlgmr.msra.gmra.mrb[48].mxu1 %vm163_vm1, %v1732_v5 }
0x1a20   :  { %3255 = vmatpush3.bf16.msra.mxu1 %v4325_v8  ;;  %3256 = vmatprep.mubr.msk.bf16.mxu1 %vm3732_vm0, %v3731_v0 }
0x1a21   :  { %3278 = vmatprep.subr.bf16.mxu1 %v3731_v0 }
0x1af2   :  { %v1869_v11 = vpop.f32.mrb[48].mxu1 }
0x1af3   :  { %v3386_v9 = vadd.f32 %v3972_v23, %v1869_v11  ;;  %v3234_v21 = vpop.f32.mrb[49].mxu1 }
0x1af4   :  { %v1872_v10 = vpop.f32.mrb[50].mxu1  ;;  %v4410_v21 = vld [vmem:[#allocation15 + $0x8] sm:$0xff]  }
0x1af5   :  { %v1876_v12 = vmul.f32 1.442695, %v3386_v9  ;;  %v3235_v13 = vpop.f32.mrb[51].mxu1  ;;  %v4404_v9 = vld [vmem:[#allocation15] sm:$0xff]   ;;  %v4414_v10 = vld [vmem:[#allocation15 + $0x10] sm:$0xff]  }
0x1af7   :  { %3483 = vpow2.f32 %v1876_v12  ;;  %v4418_v12 = vld [vmem:[#allocation15 + $0x18] sm:$0xff]  }
0x1b01   :  { %v3484_v14 = vpop.eup %3483 }
0x1b02   :  { %v1878_v15 = vsel %vm363_vm5, %v3484_v14, 0.0 }
0x1b03   :  { %1879 = vadd.xlane.f32.xlu1 %v1878_v15 }
0x1b90   :  { %v1880_v16 = vpop.xlane.xlu1 %1879 }
0x1b91   :  { %3485 = vrcp.f32 %v1880_v16 }
0x1b9b   :  { %v3486_v18 = vpop.eup %3485 }
0x1b9c   :  { %v1882_v19 = vmul.f32 %v3486_v18, %v3484_v14 }
0x1b9e   :  { %v1883_v20 = vpack.c.bf16 %v1882_v19, %v1882_v19 }
0x1ba0   :  { %3239 = vmatmul.mubr.msk.bf16.vlgmr.msra.gmra.mrb[52].mxu0 %vm363_vm5, %v1883_v20 }
0x1ba1   :  { %3243 = vmatpush3.bf16.msra.mxu0 %v3980_v37  ;;  %3250 = vmatprep.mubr.msk.bf16.mxu0 %vm3732_vm0, %v3731_v0 }
0x1ba2   :  { %3244 = vmatprep.subr.bf16.mxu0 %v3731_v0 }
0x1ba5   :  { %3245 = vmatpush3.bf16.msra.mxu0 %v3984_v39  ;;  %v4351_v39 = vld [vmem:[#allocation12 + $0x8] sm:$0xff]  }
0x1ba6   :  { %3246 = vmatprep.subr.bf16.mxu0 %v3731_v0 }
0x1ba9   :  { %3247 = vmatpush3.bf16.msra.mxu0 %v3990_v40  ;;  %v4355_v40 = vld [vmem:[#allocation12 + $0x10] sm:$0xff]  }
0x1baa   :  { %3248 = vmatprep.subr.bf16.mxu0 %v3731_v0 }
0x1bad   :  { %3249 = vmatpush3.bf16.msra.mxu0 %v3995_v41  ;;  %v4359_v41 = vld [vmem:[#allocation12 + $0x18] sm:$0xff]  }
0x1bae   :  { %3260 = vmatprep.subr.bf16.mxu0 %v3731_v0 }
0x1c73   :  { %v1921_v23 = vpop.f32.mrb[52].mxu0 }
0x1c74   :  { %v1927_v22 = vmul.f32 %v1921_v23, %v1776_v58  ;;  %v3240_v37 = vpop.f32.mrb[53].mxu0 }
0x1c75   :  { %v1924_v24 = vpop.f32.mrb[54].mxu0 }
0x1c76   :  { %v1928_v25 = vpack.c.bf16 %v1927_v22, %v1927_v22  ;;  %v3241_v26 = vpop.f32.mrb[55].mxu0 }
0x1c78   :  { %3251 = vmatmul.mubr.msk.bf16.vlgmr.msra.gmra.mrb[56].mxu0 %vm263_vm4, %v1928_v25 }
0x1c79   :  { %3261 = vmatpush3.bf16.msra.mxu0 %v4345_v27  ;;  %3268 = vmatprep.mubr.msk.bf16.mxu0 %vm3732_vm0, %v3731_v0 }
0x1c7a   :  { %3262 = vmatprep.subr.bf16.mxu0 %v3731_v0 }
0x1c7d   :  { %3263 = vmatpush3.bf16.msra.mxu0 %v4351_v39 }
0x1c7e   :  { %3264 = vmatprep.subr.bf16.mxu0 %v3731_v0 }
0x1c81   :  { %3265 = vmatpush3.bf16.msra.mxu0 %v4355_v40 }
0x1c82   :  { %3266 = vmatprep.subr.bf16.mxu0 %v3731_v0 }
0x1c85   :  { %3267 = vmatpush3.bf16.msra.mxu0 %v4359_v41 }
0x1c86   :  { %3272 = vmatprep.subr.bf16.mxu0 %v3731_v0 }
0x1d4b   :  { %v1966_v28 = vpop.f32.mrb[56].mxu0 }
0x1d4c   :  { %v1972_v29 = vsub.f32 0.0, %v1966_v28  ;;  %v3252_v30 = vpop.f32.mrb[57].mxu0 }
0x1d4d   :  { %v1969_v31 = vpop.f32.mrb[58].mxu0 }
0x1d4e   :  { %v1973_v32 = vmul.f32 %v1972_v29, %v4013_v49  ;;  %v3253_v34 = vpop.f32.mrb[59].mxu0 }
0x1d50   :  { %v4365_v1 = vadd.f32 %v1973_v32, %v4299_v53 }
0x1d52   :  { %2026 = vrot.lane.b32.xlu0 %v4365_v1, %s3733_s7  ;;  %v1981_v35 = vpack.c.bf16 %v4365_v1, %v4365_v1 }
0x1d54   :  { %3257 = vmatmul.mubr.msk.bf16.vlgmr.msra.gmra.mrb[52].mxu1 %vm163_vm1, %v1981_v35 }
0x1d55   :  { %3279 = vmatpush3.bf16.msra.mxu1 %v3976_v33  ;;  %3280 = vmatprep.mubr.msk.bf16.mxu1 %vm3732_vm0, %v3731_v0 }
0x1d56   :  { %2029 = vrot.lane.b32.xlu0 %v4365_v1, %s3735_s2  ;;  %3284 = vmatprep.subr.bf16.mxu1 %v3731_v0 }
0x1d5a   :  { %2032 = vrot.lane.b32.xlu0 %v4365_v1, %s3734_s25 }
0x1dc4   :  { %v2027_v36 = vpop.permute.xlu0 %2026 }
0x1dc5   :  { %v2035_v43 = vsel %vm163_vm1, %v4365_v1, %v2027_v36 }
0x1dc8   :  { %v2030_v38 = vpop.permute.xlu0 %2029 }
0x1dc9   :  { %v2036_v45 = vsel %vm233_vm2, %v2035_v43, %v2030_v38 }
0x1dcc   :  { %v2033_v42 = vpop.permute.xlu0 %2032 }
0x1dcd   :  { %v2037_v4 = vsel %vm235_vm3, %v2036_v45, %v2033_v42 }
0x1e27   :  { %v2019_v44 = vpop.f32.mrb[52].mxu1 }
0x1e28   :  { %v2025_v47 = vsub.f32 %v2019_v44, %v4383_v46  ;;  %v3258_v48 = vpop.f32.mrb[53].mxu1 }
0x1e29   :  { %v2022_v50 = vpop.f32.mrb[54].mxu1 }
0x1e2a   :  { %v2038_v51 = vmul.f32 %v2037_v4, %v2025_v47  ;;  %v3259_v52 = vpop.f32.mrb[55].mxu1 }
0x1e2c   :  { %v2039_v5 = vpack.c.bf16 %v2038_v51, %v2038_v51 }
0x1e2e   :  { %3269 = vmatmul.mubr.msk.bf16.vlgmr.msra.gmra.mrb[60].mxu0 %vm263_vm4, %v2039_v5 }
0x1e2f   :  { %3273 = vmatpush3.bf16.msra.mxu0 %v4388_v6  ;;  %3274 = vmatprep.mubr.msk.bf16.mxu0 %vm3732_vm0, %v3731_v0 }
0x1e30   :  { %3296 = vmatprep.subr.bf16.mxu0 %v3731_v0 }
0x1e3a   :  { %3275 = vmatmul.mubr.msk.bf16.vlgmr.msra.gmra.mrb[60].mxu0 %vm163_vm1, %v1981_v35 }
0x1e3b   :  { %3297 = vmatpush3.bf16.msra.mxu0 %v4325_v8  ;;  %3298 = vmatprep.mubr.msk.bf16.mxu0 %vm3732_vm0, %v3731_v0 }
0x1e3c   :  { %3320 = vmatprep.subr.bf16.mxu0 %v3731_v0 }
0x1f0d   :  { %v2118_v7 = vpop.f32.mrb[60].mxu0 }
0x1f0e   :  { %v3387_v55 = vadd.f32 %v4399_v54, %v2118_v7  ;;  %v3276_v56 = vpop.f32.mrb[61].mxu0 }
0x1f0f   :  { %v2121_v57 = vpop.f32.mrb[62].mxu0 }
0x1f10   :  { %v2125_v58 = vmul.f32 1.442695, %v3387_v55  ;;  %v3277_v59 = vpop.f32.mrb[63].mxu0 }
0x1f12   :  { %3487 = vpow2.f32 %v2125_v58 }
0x1f1c   :  { %v3488_v60 = vpop.eup %3487 }
0x1f1d   :  { %v2127_v61 = vsel %vm363_vm5, %v3488_v60, 0.0 }
0x1f1e   :  { %2128 = vadd.xlane.f32.xlu0 %v2127_v61 }
0x1fab   :  { %v2129_v62 = vpop.xlane.xlu0 %2128 }
0x1fac   :  { %3489 = vrcp.f32 %v2129_v62 }
0x1fb6   :  { %v3490_v63 = vpop.eup %3489 }
0x1fb7   :  { %v2131_v3 = vmul.f32 %v3490_v63, %v3488_v60 }
0x1fb9   :  { %v2132_v11 = vpack.c.bf16 %v2131_v3, %v2131_v3 }
0x1fbb   :  { %3281 = vmatmul.mubr.msk.bf16.vlgmr.msra.gmra.mrb[56].mxu1 %vm363_vm5, %v2132_v11 }
0x1fbc   :  { %3285 = vmatpush3.bf16.msra.mxu1 %v4404_v9  ;;  %3292 = vmatprep.mubr.msk.bf16.mxu1 %vm3732_vm0, %v3731_v0 }
0x1fbd   :  { %3286 = vmatprep.subr.bf16.mxu1 %v3731_v0 }
0x1fc0   :  { %3287 = vmatpush3.bf16.msra.mxu1 %v4410_v21 }
0x1fc1   :  { %3288 = vmatprep.subr.bf16.mxu1 %v3731_v0 }
0x1fc4   :  { %3289 = vmatpush3.bf16.msra.mxu1 %v4414_v10 }
0x1fc5   :  { %3290 = vmatprep.subr.bf16.mxu1 %v3731_v0 }
0x1fc8   :  { %3291 = vmatpush3.bf16.msra.mxu1 %v4418_v12 }
0x1fc9   :  { %3302 = vmatprep.subr.bf16.mxu1 %v3731_v0 }
0x208e   :  { %v2170_v13 = vpop.f32.mrb[56].mxu1 }
0x208f   :  { %v2176_v14 = vmul.f32 %v2170_v13, %v2025_v47  ;;  %v3282_v15 = vpop.f32.mrb[57].mxu1 }
0x2090   :  { %v2173_v16 = vpop.f32.mrb[58].mxu1 }
0x2091   :  { %v2177_v18 = vpack.c.bf16 %v2176_v14, %v2176_v14  ;;  %v3283_v19 = vpop.f32.mrb[59].mxu1 }
0x2093   :  { %3293 = vmatmul.mubr.msk.bf16.vlgmr.msra.gmra.mrb[60].mxu1 %vm263_vm4, %v2177_v18 }
0x2094   :  { %3303 = vmatpush3.bf16.msra.mxu1 %v4345_v27  ;;  %3310 = vmatprep.mubr.msk.bf16.mxu1 %vm3732_vm0, %v3731_v0 }
0x2095   :  { %3304 = vmatprep.subr.bf16.mxu1 %v3731_v0 }
0x2098   :  { %3305 = vmatpush3.bf16.msra.mxu1 %v4351_v39 }
0x2099   :  { %3306 = vmatprep.subr.bf16.mxu1 %v3731_v0 }
0x209c   :  { %3307 = vmatpush3.bf16.msra.mxu1 %v4355_v40 }
0x209d   :  { %3308 = vmatprep.subr.bf16.mxu1 %v3731_v0 }
0x20a0   :  { %3309 = vmatpush3.bf16.msra.mxu1 %v4359_v41 }
0x20a1   :  { %3314 = vmatprep.subr.bf16.mxu1 %v3731_v0 }
0x2166   :  { %v2215_v20 = vpop.f32.mrb[60].mxu1 }
0x2167   :  { %v2221_v23 = vsub.f32 0.0, %v2215_v20  ;;  %v3294_v22 = vpop.f32.mrb[61].mxu1 }
0x2168   :  { %v2218_v37 = vpop.f32.mrb[62].mxu1 }
0x2169   :  { %v2222_v24 = vmul.f32 %v2221_v23, %v4013_v49  ;;  %v3295_v25 = vpop.f32.mrb[63].mxu1 }
0x216b   :  { %v4436_v26 = vadd.f32 %v2222_v24, %v4365_v1 }
0x216d   :  { %2271 = vrot.lane.b32.xlu1 %v4436_v26, %s3733_s7  ;;  %v2225_v28 = vpack.c.bf16 %v4436_v26, %v4436_v26  ;;  %2224 = vst.msk [vmem:[#allocation17 + $0x8] sm:$0xff] %vm163_vm1, %v4436_v26 }
0x216f   :  { %3299 = vmatmul.mubr.msk.bf16.vlgmr.msra.gmra.mrb[64].mxu0 %vm163_vm1, %v2225_v28 }
0x2170   :  { %3321 = vmatpush3.bf16.msra.mxu0 %v3976_v33  ;;  %3322 = vmatprep.mubr.msk.bf16.mxu0 %vm3732_vm0, %v3731_v0 }
0x2171   :  { %2274 = vrot.lane.b32.xlu1 %v4436_v26, %s3735_s2  ;;  %3326 = vmatprep.subr.bf16.mxu0 %v3731_v0 }
0x2175   :  { %2277 = vrot.lane.b32.xlu1 %v4436_v26, %s3734_s25 }
0x21df   :  { %v2272_v29 = vpop.permute.xlu1 %2271 }
0x21e0   :  { %v2280_v32 = vsel %vm163_vm1, %v4436_v26, %v2272_v29 }
0x21e3   :  { %v2275_v30 = vpop.permute.xlu1 %2274 }
0x21e4   :  { %v2281_v35 = vsel %vm233_vm2, %v2280_v32, %v2275_v30 }
0x21e7   :  { %v2278_v31 = vpop.permute.xlu1 %2277 }
0x21e8   :  { %v2282_v42 = vsel %vm235_vm3, %v2281_v35, %v2278_v31 }
0x2242   :  { %v2263_v34 = vpop.f32.mrb[64].mxu0 }
0x2243   :  { %v2269_v36 = vsub.f32 %v2263_v34, %v4383_v46  ;;  %v3300_v38 = vpop.f32.mrb[65].mxu0 }
0x2244   :  { %v2266_v43 = vpop.f32.mrb[66].mxu0 }
0x2245   :  { %v2283_v44 = vmul.f32 %v2282_v42, %v2269_v36  ;;  %v3301_v45 = vpop.f32.mrb[67].mxu0 }
0x2247   :  { %v2284_v47 = vpack.c.bf16 %v2283_v44, %v2283_v44 }
0x2249   :  { %3311 = vmatmul.mubr.msk.bf16.vlgmr.msra.gmra.mrb[64].mxu1 %vm263_vm4, %v2284_v47 }
0x224a   :  { %3315 = vmatpush3.bf16.msra.mxu1 %v4388_v6  ;;  %3316 = vmatprep.mubr.msk.bf16.mxu1 %vm3732_vm0, %v3731_v0 }
0x224b   :  { %3338 = vmatprep.subr.bf16.mxu1 %v3731_v0 }
0x2255   :  { %3317 = vmatmul.mubr.msk.bf16.vlgmr.msra.gmra.mrb[64].mxu1 %vm163_vm1, %v2225_v28 }
0x2256   :  { %3339 = vmatpush3.bf16.msra.mxu1 %v4325_v8  ;;  %3340 = vmatprep.mubr.msk.bf16.mxu1 %vm3732_vm0, %v3731_v0 }
0x2257   :  { %3362 = vmatprep.subr.bf16.mxu1 %v3731_v0 }
0x2328   :  { %v2363_v48 = vpop.f32.mrb[64].mxu1 }
0x2329   :  { %v3388_v4 = vadd.f32 %v4399_v54, %v2363_v48  ;;  %v3318_v50 = vpop.f32.mrb[65].mxu1 }
0x232a   :  { %v2366_v51 = vpop.f32.mrb[66].mxu1 }
0x232b   :  { %v2370_v52 = vmul.f32 1.442695, %v3388_v4  ;;  %v3319_v5 = vpop.f32.mrb[67].mxu1 }
0x232d   :  { %3491 = vpow2.f32 %v2370_v52 }
0x2337   :  { %v3492_v7 = vpop.eup %3491 }
0x2338   :  { %v2372_v55 = vsel %vm363_vm5, %v3492_v7, 0.0 }
0x2339   :  { %2373 = vadd.xlane.f32.xlu1 %v2372_v55 }
0x234a   :  { %1229 = vrot.lane.b32.xlu1 %v4187_v17, %s3725_s12  ;;  %s3739_s12 = smov [#allocation17]  }
0x234b   :  { %s2725_s21 = sshll.u32 %s3739_s12, 4  ;;  %s2726_s21 = int_to_ptr.vmem [resolvable:$true] %s2725_s21 }
0x234c   :  { %s3687_s22 = scalar_lea.vmem %s2726_s21, 256  ;;  %p3692_p9 = scmp.lt.s32.totalorder %s2726_s21, %s2726_s21 }
0x234d   :  { %p3688_p8 = scmp.ne.s32.totalorder %s2726_s21, %s3687_s22  ;;  %p3693_p10 = scmp.lt.s32.totalorder %s3687_s22, %s3687_s22 }
0x234e   :  { %1478 = vrot.lane.b32.xlu1 %v4243_v2, %s3736_s8 }
0x234f   :  { %p3694_p11 = por %p3693_p10, %p3692_p9 }
0x2351   :  { %p3695_p12 = pnand %p3694_p11, %p3688_p8 }
0x2352   :  { %1727 = vrot.lane.b32.xlu1 %v4299_v53, %s3737_s18 }
0x2356   :  { %1976 = vrot.lane.b32.xlu1 %v4365_v1, %s3738_s19 }
0x23c6   :  { %v2374_v8 = vpop.xlane.xlu1 %2373 }
0x23c7   :  { %3493 = vrcp.f32 %v2374_v8 }
0x23ca   :  { %v1230_v56 = vpop.permute.xlu1 %1229 }
0x23cb   :  { %1233 = vst.msk [vmem:[#allocation17] sm:$0xff] %vm1232_vm11, %v1230_v56 }
0x23ce   :  { %v1479_v57 = vpop.permute.xlu1 %1478 }
0x23cf   :  { %1482 = vst.msk [vmem:[#allocation17] sm:$0xff] %vm1481_vm12, %v1479_v57 }
0x23d1   :  { %v3494_v58 = vpop.eup %3493 }
0x23d2   :  { %v2376_v17 = vmul.f32 %v3494_v58, %v3492_v7  ;;  %v1728_v59 = vpop.permute.xlu1 %1727 }
0x23d3   :  { %1731 = vst.msk [vmem:[#allocation17] sm:$0xff] %vm1730_vm13, %v1728_v59 }
0x23d4   :  { %v2377_v2 = vpack.c.bf16 %v2376_v17, %v2376_v17 }
0x23d6   :  { %3323 = vmatmul.mubr.msk.bf16.vlgmr.msra.gmra.mrb[68].mxu0 %vm363_vm5, %v2377_v2  ;;  %v1977_v53 = vpop.permute.xlu1 %1976 }
0x23d7   :  { %3327 = vmatpush3.bf16.msra.mxu0 %v4404_v9  ;;  %3334 = vmatprep.mubr.msk.bf16.mxu0 %vm3732_vm0, %v3731_v0  ;;  %1980 = vst.msk [vmem:[#allocation17] sm:$0xff] %vm1979_vm14, %v1977_v53 }
0x23d8   :  { %3328 = vmatprep.subr.bf16.mxu0 %v3731_v0 }
0x23db   :  { %3329 = vmatpush3.bf16.msra.mxu0 %v4410_v21 }
0x23dc   :  { %3330 = vmatprep.subr.bf16.mxu0 %v3731_v0 }
0x23df   :  { %3331 = vmatpush3.bf16.msra.mxu0 %v4414_v10 }
0x23e0   :  { %3332 = vmatprep.subr.bf16.mxu0 %v3731_v0 }
0x23e3   :  { %3333 = vmatpush3.bf16.msra.mxu0 %v4418_v12 }
0x23e4   :  { %3344 = vmatprep.subr.bf16.mxu0 %v3731_v0 }
0x24a9   :  { %v2415_v1 = vpop.f32.mrb[68].mxu0 }
0x24aa   :  { %v2421_v60 = vmul.f32 %v2415_v1, %v2269_v36  ;;  %v3324_v61 = vpop.f32.mrb[69].mxu0 }
0x24ab   :  { %v2418_v62 = vpop.f32.mrb[70].mxu0 }
0x24ac   :  { %v2422_v63 = vpack.c.bf16 %v2421_v60, %v2421_v60  ;;  %v3325_v3 = vpop.f32.mrb[71].mxu0 }
0x24ae   :  { %3335 = vmatmul.mubr.msk.bf16.vlgmr.msra.gmra.mrb[72].mxu0 %vm263_vm4, %v2422_v63 }
0x24af   :  { %3345 = vmatpush3.bf16.msra.mxu0 %v4345_v27  ;;  %3352 = vmatprep.mubr.msk.bf16.mxu0 %vm3732_vm0, %v3731_v0 }
0x24b0   :  { %3346 = vmatprep.subr.bf16.mxu0 %v3731_v0 }
0x24b3   :  { %3347 = vmatpush3.bf16.msra.mxu0 %v4351_v39 }
0x24b4   :  { %3348 = vmatprep.subr.bf16.mxu0 %v3731_v0 }
0x24b7   :  { %3349 = vmatpush3.bf16.msra.mxu0 %v4355_v40 }
0x24b8   :  { %3350 = vmatprep.subr.bf16.mxu0 %v3731_v0 }
0x24bb   :  { %3351 = vmatpush3.bf16.msra.mxu0 %v4359_v41 }
0x24bc   :  { %3356 = vmatprep.subr.bf16.mxu0 %v3731_v0 }
0x2581   :  { %v2460_v11 = vpop.f32.mrb[72].mxu0 }
0x2582   :  { %v2466_v13 = vsub.f32 0.0, %v2460_v11  ;;  %v3336_v27 = vpop.f32.mrb[73].mxu0 }
0x2583   :  { %v2463_v14 = vpop.f32.mrb[74].mxu0 }
0x2584   :  { %v2467_v15 = vmul.f32 %v2466_v13, %v4013_v49  ;;  %v3337_v16 = vpop.f32.mrb[75].mxu0 }
0x2586   :  { %v4499_v18 = vadd.f32 %v2467_v15, %v4436_v26 }
0x2588   :  { %2470 = vrot.lane.b32.xlu0 %v4499_v18, %s3733_s7  ;;  %v2474_v39 = vpack.c.bf16 %v4499_v18, %v4499_v18 }
0x258a   :  { %3341 = vmatmul.mubr.msk.bf16.vlgmr.msra.gmra.mrb[68].mxu1 %vm163_vm1, %v2474_v39 }
0x258b   :  { %3363 = vmatpush3.bf16.msra.mxu1 %v3976_v33  ;;  %3364 = vmatprep.mubr.msk.bf16.mxu1 %vm3732_vm0, %v3731_v0 }
0x258c   :  { %2519 = vrot.lane.b32.xlu0 %v4499_v18, %s3735_s2  ;;  %3368 = vmatprep.subr.bf16.mxu1 %v3731_v0 }
0x2590   :  { %2522 = vrot.lane.b32.xlu0 %v4499_v18, %s3734_s25 }
0x25fa   :  { %v2471_v40 = vpop.permute.xlu0 %2470 }
0x25fb   :  { %2473 = vst.msk [vmem:[#allocation17 + $0x8] sm:$0xff] %vm494_vm7, %v2471_v40  ;;  %v2525_v20 = vsel %vm163_vm1, %v4499_v18, %v2471_v40 }
0x25fe   :  { %v2520_v41 = vpop.permute.xlu0 %2519 }
0x25ff   :  { %v2526_v23 = vsel %vm233_vm2, %v2525_v20, %v2520_v41 }
0x2602   :  { %v2523_v19 = vpop.permute.xlu0 %2522 }
0x2603   :  { %v2527_v24 = vsel %vm235_vm3, %v2526_v23, %v2523_v19 }
0x265d   :  { %v2512_v33 = vpop.f32.mrb[68].mxu1 }
0x265e   :  { %v2518_v22 = vsub.f32 %v2512_v33, %v4383_v46  ;;  %v3342_v37 = vpop.f32.mrb[69].mxu1 }
0x265f   :  { %v2515_v25 = vpop.f32.mrb[70].mxu1 }
0x2660   :  { %v2528_v26 = vmul.f32 %v2527_v24, %v2518_v22  ;;  %v3343_v28 = vpop.f32.mrb[71].mxu1 }
0x2662   :  { %v2529_v29 = vpack.c.bf16 %v2528_v26, %v2528_v26 }
0x2664   :  { %3353 = vmatmul.mubr.msk.bf16.vlgmr.msra.gmra.mrb[76].mxu0 %vm263_vm4, %v2529_v29 }
0x2665   :  { %3357 = vmatpush3.bf16.msra.mxu0 %v4388_v6  ;;  %3358 = vmatprep.mubr.msk.bf16.mxu0 %vm3732_vm0, %v3731_v0 }
0x2670   :  { %3359 = vmatmul.mubr.msk.bf16.vlgmr.msra.gmra.mrb[76].mxu0 %vm163_vm1, %v2474_v39 }
0x2743   :  { %v2608_v30 = vpop.f32.mrb[76].mxu0 }
0x2744   :  { %v3389_v31 = vadd.f32 %v4399_v54, %v2608_v30  ;;  %v3360_v46 = vpop.f32.mrb[77].mxu0 }
0x2745   :  { %v2611_v32 = vpop.f32.mrb[78].mxu0 }
0x2746   :  { %v2615_v34 = vmul.f32 1.442695, %v3389_v31  ;;  %v3361_v35 = vpop.f32.mrb[79].mxu0 }
0x2748   :  { %3495 = vpow2.f32 %v2615_v34 }
0x2752   :  { %v3496_v36 = vpop.eup %3495 }
0x2753   :  { %v2617_v38 = vsel %vm363_vm5, %v3496_v36, 0.0 }
0x2754   :  { %2618 = vadd.xlane.f32.xlu0 %v2617_v38 }
0x27e1   :  { %v2619_v42 = vpop.xlane.xlu0 %2618 }
0x27e2   :  { %3497 = vrcp.f32 %v2619_v42 }
0x27ec   :  { %v3498_v6 = vpop.eup %3497 }
0x27ed   :  { %v2621_v43 = vmul.f32 %v3498_v6, %v3496_v36 }
0x27ef   :  { %v2622_v44 = vpack.c.bf16 %v2621_v43, %v2621_v43 }
0x27f1   :  { %3365 = vmatmul.mubr.msk.bf16.vlgmr.msra.gmra.mrb[72].mxu1 %vm363_vm5, %v2622_v44 }
0x27f2   :  { %3369 = vmatpush3.bf16.msra.mxu1 %v4404_v9  ;;  %3376 = vmatprep.mubr.msk.bf16.mxu1 %vm3732_vm0, %v3731_v0 }
0x27f3   :  { %3370 = vmatprep.subr.bf16.mxu1 %v3731_v0 }
0x27f6   :  { %3371 = vmatpush3.bf16.msra.mxu1 %v4410_v21 }
0x27f7   :  { %3372 = vmatprep.subr.bf16.mxu1 %v3731_v0 }
0x27fa   :  { %3373 = vmatpush3.bf16.msra.mxu1 %v4414_v10 }
0x27fb   :  { %3374 = vmatprep.subr.bf16.mxu1 %v3731_v0 }
0x27fe   :  { %3375 = vmatpush3.bf16.msra.mxu1 %v4418_v12 }
0x28c4   :  { %v2660_v54 = vpop.f32.mrb[72].mxu1 }
0x28c5   :  { %v2666_v45 = vmul.f32 %v2660_v54, %v2518_v22  ;;  %v3366_v47 = vpop.f32.mrb[73].mxu1 }
0x28c6   :  { %v2663_v48 = vpop.f32.mrb[74].mxu1 }
0x28c7   :  { %v2667_v9 = vpack.c.bf16 %v2666_v45, %v2666_v45  ;;  %v3367_v4 = vpop.f32.mrb[75].mxu1 }
0x28c9   :  { %3377 = vmatmul.mubr.msk.bf16.vlgmr.msra.gmra.mrb[76].mxu1 %vm263_vm4, %v2667_v9 }
0x299c   :  { %v2705_v50 = vpop.f32.mrb[76].mxu1 }
0x299d   :  { %v2711_v51 = vsub.f32 0.0, %v2705_v50  ;;  %v3378_v52 = vpop.f32.mrb[77].mxu1 }
0x299e   :  { %v2708_v21 = vpop.f32.mrb[78].mxu1 }
0x299f   :  { %v2712_v5 = vmul.f32 %v2711_v51, %v4013_v49  ;;  %v3379_v7 = vpop.f32.mrb[79].mxu1 }
0x29a1   :  { %v2713_v10 = vadd.f32 %v2712_v5, %v4499_v18 }
0x29a3   :  { %2715 = vrot.lane.b32.xlu0 %v2713_v10, %s3735_s2 }
0x2a15   :  { %v2716_v0 = vpop.permute.xlu0 %2715 }
0x2a16   :  { %2718 = vst.msk [vmem:[#allocation17 + $0x8] sm:$0xff] %vm740_vm8, %v2716_v0 }
0x2a17   :  { %3698 = shalt.err (!%p3695_p12)
}
0x2a18   :  { %s3699_s3 = scalar_lea.hbm %s4563_s9, 256 }
0x2a19   :  { %p3700_p13 = scmp.ne.s32.totalorder %s4563_s9, %s3699_s3  ;;  %p3703_p0 = scmp.lt.u32.totalorder %s3699_s3, %s4563_s9 }
0x2a1b   :  { %p3705_p1 = pnand %p3703_p0, %p3700_p13 }
0x2a1d   :  { %3708 = shalt.err (!%p3705_p1)
}
0x2a1e   :  { %2728 = dma.vmem_to_hbm [thread:$0]  %s2726_s21, 256, %s4563_s9, [#allocation5]  }
0x2a1f   :  { %3719 = dma.done.wait [#allocation5], 256  }
0x2a20   :  { %3720 = vsyncadd [#allocation5], 4294967040 }
0x2a21   :  { %2732 = vsyncpa [#allocation4], 1 }
0x2a22   :  { %2733 = vsyncpa [#allocation7], 1 }
0x2a23   :  { %2734 = vsyncpa [#allocation10], 1 }
0x2a24   :  { %2735 = vsyncpa [#allocation13], 1 }
0x2a25   :  { %2736 = vsyncpa [#allocation16], 1 }
0x2a26   :  { %2737 = vsyncpa [#allocation5], 1 }

</bundles_post_ra>
